<compile_context>
chip_gen: v7x
topology: tpu7x:2x2x1
jax: 0.10.0
libtpu: 0.0.40
codegen_flags: <defaults>
</compile_context>

<pallas_src>
import functools

import jax
import jax.numpy as jnp
from jax import lax
from jax.experimental import pallas as pl
from jax.experimental.pallas import tpu as pltpu


# -------------------------------------------------------------------------------------
# Kernel: shared k x k depthwise spatial blur over a block of TP independent planes
# -------------------------------------------------------------------------------------
def _sharesep_kernel(w_ref, x_ref, o_ref, xpad_ref, *, H, W, k, p):
    # w_ref   : (k*k,) f32 in SMEM  -- shared spatial taps (scalars)
    # x_ref   : (1, TP, H, W)       -- TP independent (n, c, d) planes
    # o_ref   : (1, TP, H, W)
    # xpad_ref: (TP, H+2p, W+2p) f32 VMEM scratch holding the zero-halo plane
    TP = x_ref.shape[1]
    Hp, Wp = H + 2 * p, W + 2 * p

    if p > 0:
        # Zero only the halo bands (the interior is overwritten below).  Done every
        # step so correctness does not depend on grid sharding / scratch reuse.
        zrow = jnp.zeros((TP, p, Wp), jnp.float32)
        zcol = jnp.zeros((TP, Hp, p), jnp.float32)
        xpad_ref[:, 0:p, :] = zrow
        xpad_ref[:, p + H:Hp, :] = zrow
        xpad_ref[:, :, 0:p] = zcol
        xpad_ref[:, :, p + W:Wp] = zcol

    # Stage the block into the padded scratch (single VMEM->VMEM copy).
    xpad_ref[:, p:p + H, p:p + W] = x_ref[0].astype(jnp.float32)

    # k*k taps: SMEM scalar weight * shifted window, accumulated in registers.
    acc = jnp.zeros((TP, H, W), jnp.float32)
    for i in range(k):
        for j in range(k):
            acc = acc + w_ref[i * k + j] * xpad_ref[:, i:i + H, j:j + W]

    # Single store of the output block.
    o_ref[...] = acc.reshape(1, TP, H, W).astype(o_ref.dtype)


def _pick_planes_per_block(N, P, H, W, elem_bytes, target_bytes=2 << 20):
    """Largest divisor of P whose block stays under ~2 MiB; if N == 1, keep >= 2
    blocks along the plane axis so a 2-TensorCore chip can shard the grid."""
    max_tp = P if N > 1 else max(1, P // 2)
    tp = 1
    for cand in range(1, max_tp + 1):
        if P % cand == 0 and cand * H * W * elem_bytes <= target_bytes:
            tp = cand
    return tp


def sharesep_conv3d(x, weight):
    """x: (N, C, D, H, W);  weight: (1, 1, 1, k, k) (or any shape with k*k elements),
    the single shared depthwise spatial kernel.  Returns (N, C, D, H, W)."""
    N, C, D, H, W = x.shape
    w_flat = jnp.asarray(weight, jnp.float32).reshape(-1)
    k = int(round(float(w_flat.shape[0]) ** 0.5))
    assert k * k == w_flat.shape[0] and k % 2 == 1, "kernel size should be odd"
    p = (k - 1) // 2

    # Every (n, c, d) plane is independent -> collapse (C, D) into one plane axis.
    # This reshape is metadata-only (no HBM traffic, no transpose).
    P = C * D
    xf = x.reshape(N, P, H, W)

    elem_bytes = jnp.dtype(x.dtype).itemsize
    TP = _pick_planes_per_block(N, P, H, W, elem_bytes)

    kernel = functools.partial(_sharesep_kernel, H=H, W=W, k=k, p=p)
    out = pl.pallas_call(
        kernel,
        out_shape=jax.ShapeDtypeStruct((N, P, H, W), x.dtype),
        grid_spec=pltpu.PrefetchScalarGridSpec(
            num_scalar_prefetch=0,
            grid=(N, P // TP),
            in_specs=[
                # shared taps as SMEM scalars (tiny, no per-step DMA, no broadcast)
                pl.BlockSpec(memory_space=pltpu.MemorySpace.SMEM),
                pl.BlockSpec((1, TP, H, W), lambda n, t: (n, t, 0, 0)),
            ],
            out_specs=pl.BlockSpec((1, TP, H, W), lambda n, t: (n, t, 0, 0)),
            scratch_shapes=[pltpu.VMEM((TP, H + 2 * p, W + 2 * p), jnp.float32)],
        ),
        compiler_params=pltpu.CompilerParams(
            dimension_semantics=("parallel", "parallel"),
            vmem_limit_bytes=32 * 1024 * 1024,
        ),
    )(w_flat, xf)
    return out.reshape(N, C, D, H, W)


# -------------------------------------------------------------------------------------
# Pure-JAX reference (correctness check only)
# -------------------------------------------------------------------------------------
def _ref_sharesep(x, weight):
    N, C, D, H, W = x.shape
    k = weight.shape[-1]
    p = (k - 1) // 2
    rhs = jnp.broadcast_to(
        jnp.asarray(weight, jnp.float32).reshape(1, 1, 1, k, k), (C, 1, 1, k, k))
    dn = lax.conv_dimension_numbers(x.shape, rhs.shape, ('NCDHW', 'OIDHW', 'NCDHW'))
    out = lax.conv_general_dilated(
        x.astype(jnp.float32), rhs, (1, 1, 1),
        [(0, 0), (p, p), (p, p)],
        dimension_numbers=dn, feature_group_count=C,
        precision=lax.Precision.HIGHEST)
    return out.astype(x.dtype)


if __name__ == "__main__":
    N, C, D, H, W = 2, 4, 8, 16, 16
    kernel_size = 3
    p = (kernel_size - 1) // 2

    key = jax.random.PRNGKey(0)
    kx, kw = jax.random.split(key)
    x = jax.random.normal(kx, (N, C, D, H, W), jnp.float32)   # PyTorch NCDHW input

    # 1) Module default init: center-delta weight -> identity mapping.
    w_delta = jnp.zeros((1, 1, 1, kernel_size, kernel_size), jnp.float32)
    w_delta = w_delta.at[0, 0, 0, p, p].set(1.0)
    out_id = jax.block_until_ready(sharesep_conv3d(x, w_delta))
    assert out_id.shape == x.shape
    assert jnp.allclose(out_id, x, atol=1e-6), float(jnp.max(jnp.abs(out_id - x)))

    # 2) General (trained) shared weight vs. lax depthwise-conv reference.
    w_rand = jax.random.normal(kw, (1, 1, 1, kernel_size, kernel_size), jnp.float32)
    out = jax.block_until_ready(sharesep_conv3d(x, w_rand))
    ref = jax.block_until_ready(_ref_sharesep(x, w_rand))
    assert out.shape == ref.shape
    assert jnp.allclose(out, ref, atol=1e-4, rtol=1e-4), (
        float(jnp.max(jnp.abs(out - ref))))

    print("KERNEL_OK")
</pallas_src>

<mosaic_0001>
module attributes {stable_mosaic.version = 11 : i64} {
  func.func @_sharesep_kernel(%arg0: i32, %arg1: i32, %arg2: memref<9xf32, #tpu.memory_space<smem>>, %arg3: memref<1x32x16x16xf32, #tpu.memory_space<vmem>>, %arg4: memref<1x32x16x16xf32, #tpu.memory_space<vmem>>, %arg5: memref<32x18x18xf32, #tpu.memory_space<vmem>>) attributes {dimension_semantics = [#tpu.dimension_semantics<parallel>, #tpu.dimension_semantics<parallel>], iteration_bounds = array<i64: 2, 1>, scalar_prefetch = 0 : i64, scratch_operands = 1 : i64, tpu.core_type = #tpu.core_type<tc>, window_params = [{transform_indices = @transform_0, window_bounds = array<i64: 9>}, {transform_indices = @transform_1, window_bounds = array<i64: 1, 32, 16, 16>}, {transform_indices = @transform_2, window_bounds = array<i64: 1, 32, 16, 16>}]} {
    %cst = arith.constant 0.000000e+00 : f32
    %0 = vector.broadcast %cst : f32 to vector<32x1x18xf32>
    %cst_0 = arith.constant 0.000000e+00 : f32
    %1 = vector.broadcast %cst_0 : f32 to vector<32x18x1xf32>
    %c0 = arith.constant 0 : index
    %c0_1 = arith.constant 0 : index
    %c0_2 = arith.constant 0 : index
    %2 = vector.load %arg5[%c0, %c0_1, %c0_2] : memref<32x18x18xf32, #tpu.memory_space<vmem>>, vector<32x1x18xf32>
    tpu.vector_store %arg5[%c0, %c0_1, %c0_2], %0 {strides = array<i32>} : memref<32x18x18xf32, #tpu.memory_space<vmem>>, vector<32x1x18xf32>,
    %c0_3 = arith.constant 0 : index
    %c17 = arith.constant 17 : index
    %c0_4 = arith.constant 0 : index
    %3 = vector.load %arg5[%c0_3, %c17, %c0_4] : memref<32x18x18xf32, #tpu.memory_space<vmem>>, vector<32x1x18xf32>
    tpu.vector_store %arg5[%c0_3, %c17, %c0_4], %0 {strides = array<i32>} : memref<32x18x18xf32, #tpu.memory_space<vmem>>, vector<32x1x18xf32>,
    %c0_5 = arith.constant 0 : index
    %c0_6 = arith.constant 0 : index
    %c0_7 = arith.constant 0 : index
    %4 = vector.load %arg5[%c0_5, %c0_6, %c0_7] : memref<32x18x18xf32, #tpu.memory_space<vmem>>, vector<32x18x1xf32>
    tpu.vector_store %arg5[%c0_5, %c0_6, %c0_7], %1 {strides = array<i32>} : memref<32x18x18xf32, #tpu.memory_space<vmem>>, vector<32x18x1xf32>,
    %c0_8 = arith.constant 0 : index
    %c0_9 = arith.constant 0 : index
    %c17_10 = arith.constant 17 : index
    %5 = vector.load %arg5[%c0_8, %c0_9, %c17_10] : memref<32x18x18xf32, #tpu.memory_space<vmem>>, vector<32x18x1xf32>
    tpu.vector_store %arg5[%c0_8, %c0_9, %c17_10], %1 {strides = array<i32>} : memref<32x18x18xf32, #tpu.memory_space<vmem>>, vector<32x18x1xf32>,
    %c0_11 = arith.constant 0 : index
    %c0_12 = arith.constant 0 : index
    %c0_13 = arith.constant 0 : index
    %c0_14 = arith.constant 0 : index
    %6 = vector.load %arg3[%c0_11, %c0_12, %c0_13, %c0_14] : memref<1x32x16x16xf32, #tpu.memory_space<vmem>>, vector<1x32x16x16xf32>
    %7 = vector.shape_cast %6 : vector<1x32x16x16xf32> to vector<32x16x16xf32>
    %c0_15 = arith.constant 0 : index
    %c1 = arith.constant 1 : index
    %c1_16 = arith.constant 1 : index
    %8 = vector.load %arg5[%c0_15, %c1, %c1_16] : memref<32x18x18xf32, #tpu.memory_space<vmem>>, vector<32x16x16xf32>
    tpu.vector_store %arg5[%c0_15, %c1, %c1_16], %7 {strides = array<i32>} : memref<32x18x18xf32, #tpu.memory_space<vmem>>, vector<32x16x16xf32>,
    %cst_17 = arith.constant 0.000000e+00 : f32
    %9 = vector.broadcast %cst_17 : f32 to vector<32x16x16xf32>
    %c0_18 = arith.constant 0 : index
    %10 = memref.load %arg2[%c0_18] : memref<9xf32, #tpu.memory_space<smem>>
    %c0_19 = arith.constant 0 : index
    %c0_20 = arith.constant 0 : index
    %c0_21 = arith.constant 0 : index
    %11 = vector.load %arg5[%c0_19, %c0_20, %c0_21] : memref<32x18x18xf32, #tpu.memory_space<vmem>>, vector<32x16x16xf32>
    %12 = vector.broadcast %10 : f32 to vector<32x16x16xf32>
    %13 = arith.mulf %12, %11 : vector<32x16x16xf32>
    %14 = arith.addf %9, %13 : vector<32x16x16xf32>
    %c1_22 = arith.constant 1 : index
    %15 = memref.load %arg2[%c1_22] : memref<9xf32, #tpu.memory_space<smem>>
    %c0_23 = arith.constant 0 : index
    %c0_24 = arith.constant 0 : index
    %c1_25 = arith.constant 1 : index
    %16 = vector.load %arg5[%c0_23, %c0_24, %c1_25] : memref<32x18x18xf32, #tpu.memory_space<vmem>>, vector<32x16x16xf32>
    %17 = vector.broadcast %15 : f32 to vector<32x16x16xf32>
    %18 = arith.mulf %17, %16 : vector<32x16x16xf32>
    %19 = arith.addf %14, %18 : vector<32x16x16xf32>
    %c2 = arith.constant 2 : index
    %20 = memref.load %arg2[%c2] : memref<9xf32, #tpu.memory_space<smem>>
    %c0_26 = arith.constant 0 : index
    %c0_27 = arith.constant 0 : index
    %c2_28 = arith.constant 2 : index
    %21 = vector.load %arg5[%c0_26, %c0_27, %c2_28] : memref<32x18x18xf32, #tpu.memory_space<vmem>>, vector<32x16x16xf32>
    %22 = vector.broadcast %20 : f32 to vector<32x16x16xf32>
    %23 = arith.mulf %22, %21 : vector<32x16x16xf32>
    %24 = arith.addf %19, %23 : vector<32x16x16xf32>
    %c3 = arith.constant 3 : index
    %25 = memref.load %arg2[%c3] : memref<9xf32, #tpu.memory_space<smem>>
    %c0_29 = arith.constant 0 : index
    %c1_30 = arith.constant 1 : index
    %c0_31 = arith.constant 0 : index
    %26 = vector.load %arg5[%c0_29, %c1_30, %c0_31] : memref<32x18x18xf32, #tpu.memory_space<vmem>>, vector<32x16x16xf32>
    %27 = vector.broadcast %25 : f32 to vector<32x16x16xf32>
    %28 = arith.mulf %27, %26 : vector<32x16x16xf32>
    %29 = arith.addf %24, %28 : vector<32x16x16xf32>
    %c4 = arith.constant 4 : index
    %30 = memref.load %arg2[%c4] : memref<9xf32, #tpu.memory_space<smem>>
    %c0_32 = arith.constant 0 : index
    %c1_33 = arith.constant 1 : index
    %c1_34 = arith.constant 1 : index
    %31 = vector.load %arg5[%c0_32, %c1_33, %c1_34] : memref<32x18x18xf32, #tpu.memory_space<vmem>>, vector<32x16x16xf32>
    %32 = vector.broadcast %30 : f32 to vector<32x16x16xf32>
    %33 = arith.mulf %32, %31 : vector<32x16x16xf32>
    %34 = arith.addf %29, %33 : vector<32x16x16xf32>
    %c5 = arith.constant 5 : index
    %35 = memref.load %arg2[%c5] : memref<9xf32, #tpu.memory_space<smem>>
    %c0_35 = arith.constant 0 : index
    %c1_36 = arith.constant 1 : index
    %c2_37 = arith.constant 2 : index
    %36 = vector.load %arg5[%c0_35, %c1_36, %c2_37] : memref<32x18x18xf32, #tpu.memory_space<vmem>>, vector<32x16x16xf32>
    %37 = vector.broadcast %35 : f32 to vector<32x16x16xf32>
    %38 = arith.mulf %37, %36 : vector<32x16x16xf32>
    %39 = arith.addf %34, %38 : vector<32x16x16xf32>
    %c6 = arith.constant 6 : index
    %40 = memref.load %arg2[%c6] : memref<9xf32, #tpu.memory_space<smem>>
    %c0_38 = arith.constant 0 : index
    %c2_39 = arith.constant 2 : index
    %c0_40 = arith.constant 0 : index
    %41 = vector.load %arg5[%c0_38, %c2_39, %c0_40] : memref<32x18x18xf32, #tpu.memory_space<vmem>>, vector<32x16x16xf32>
    %42 = vector.broadcast %40 : f32 to vector<32x16x16xf32>
    %43 = arith.mulf %42, %41 : vector<32x16x16xf32>
    %44 = arith.addf %39, %43 : vector<32x16x16xf32>
    %c7 = arith.constant 7 : index
    %45 = memref.load %arg2[%c7] : memref<9xf32, #tpu.memory_space<smem>>
    %c0_41 = arith.constant 0 : index
    %c2_42 = arith.constant 2 : index
    %c1_43 = arith.constant 1 : index
    %46 = vector.load %arg5[%c0_41, %c2_42, %c1_43] : memref<32x18x18xf32, #tpu.memory_space<vmem>>, vector<32x16x16xf32>
    %47 = vector.broadcast %45 : f32 to vector<32x16x16xf32>
    %48 = arith.mulf %47, %46 : vector<32x16x16xf32>
    %49 = arith.addf %44, %48 : vector<32x16x16xf32>
    %c8 = arith.constant 8 : index
    %50 = memref.load %arg2[%c8] : memref<9xf32, #tpu.memory_space<smem>>
    %c0_44 = arith.constant 0 : index
    %c2_45 = arith.constant 2 : index
    %c2_46 = arith.constant 2 : index
    %51 = vector.load %arg5[%c0_44, %c2_45, %c2_46] : memref<32x18x18xf32, #tpu.memory_space<vmem>>, vector<32x16x16xf32>
    %52 = vector.broadcast %50 : f32 to vector<32x16x16xf32>
    %53 = arith.mulf %52, %51 : vector<32x16x16xf32>
    %54 = arith.addf %49, %53 : vector<32x16x16xf32>
    %55 = vector.shape_cast %54 : vector<32x16x16xf32> to vector<1x32x16x16xf32>
    %c0_47 = arith.constant 0 : index
    %c0_48 = arith.constant 0 : index
    %c0_49 = arith.constant 0 : index
    %c0_50 = arith.constant 0 : index
    %56 = vector.load %arg4[%c0_47, %c0_48, %c0_49, %c0_50] : memref<1x32x16x16xf32, #tpu.memory_space<vmem>>, vector<1x32x16x16xf32>
    tpu.vector_store %arg4[%c0_47, %c0_48, %c0_49, %c0_50], %55 {strides = array<i32>} : memref<1x32x16x16xf32, #tpu.memory_space<vmem>>, vector<1x32x16x16xf32>,
    return
  }
  func.func @transform_0(%arg0: i32, %arg1: i32) -> i32 {
    %c0_i32 = arith.constant 0 : i32
    %c0_i32_0 = arith.constant 0 : i32
    return %c0_i32 : i32
  }
  func.func @transform_1(%arg0: i32, %arg1: i32) -> (i32, i32, i32, i32) {
    %c0_i32 = arith.constant 0 : i32
    %c0_i32_0 = arith.constant 0 : i32
    %c0_i32_1 = arith.constant 0 : i32
    return %arg0, %arg1, %c0_i32, %c0_i32_0 : i32, i32, i32, i32
  }
  func.func @transform_2(%arg0: i32, %arg1: i32) -> (i32, i32, i32, i32) {
    %c0_i32 = arith.constant 0 : i32
    %c0_i32_0 = arith.constant 0 : i32
    %c0_i32_1 = arith.constant 0 : i32
    return %arg0, %arg1, %c0_i32, %c0_i32_0 : i32, i32, i32, i32
  }
}

</mosaic_0001>

<bundles_post_ra>
// kernel: tpu_custom_call.1
= control target key start
LH: loop header
LB: loop body
LE: loop exit
PB: predicated region body
PF: predicated region fallthrough
CT: control target
= control target key end

     0   :  { %7 = vsyncpa [#allocation4], 0  ;;  %s4126_s9 = smov 0   ;;  %s4128_s10 = smov 0   ;;  %s7852_s0 = inlined_call_operand.vmem [shape: f32[9], index: 0, kind: input, shape index: {}]   ;;  %s7853_s1 = inlined_call_operand.vmem [shape: f32[2,32,16,16], index: 1, kind: input, shape index: {}]   ;;  %s7854_s2 = inlined_call_operand.vmem [shape: f32[2,32,16,16], index: 2, kind: output, shape index: {}]  }
   0x1   :  { %s4130_s11 = smov 0  }
   0x2 LB: > { %s3919_s12 = sadd.s32 4294967295, %s4104_s11   ;;  %s25_s13 = sadd.s32 1, %s4100_s10  ;;  %s4104_s11 = sphi %s4130_s11, %s13_s11   ;;  %s4100_s10 = sphi %s4128_s10, %s8386_s10   ;;  %s4096_s9 = sphi %s4126_s9, %s8385_s9  }
   0x3   : > { %p27_p0 = scmp.ge.s32.totalorder %s25_s13, 2  ;;  %p3921_p1 = scmp.ge.s32.totalorder %s4104_s11, 1 }
   0x4   : > { %p107_p2 = scmp.lt.s32.totalorder %s4104_s11, 3  ;;  %p4151_p4 = scmp.eq.s32.totalorder %s3919_s12, 0 }
   0x5   : > { %s8388_s13 = smov (%p27_p0, %s25_s13), 0  ;;  %s120_s18 = sshll.u32 %s7852_s0, 4  ;;  %s121_s18 = int_to_ptr.vmem [resolvable:$true] %s120_s18 }
   0x6   : > { %p4147_p3 = pnand %p3921_p1, %p107_p2  ;;  %s4063_s19 = scalar_lea.vmem %s121_s18, 16 }
   0x7   : > { %p4064_p7 = scmp.ne.s32.totalorder %s121_s18, %s4063_s19  ;;  %p4071_p11 = scmp.lt.s32.totalorder %s121_s18, %s121_s18 }
   0x8   : > { %p3946_p5 = pneg %p4147_p3  ;;  %p4072_p12 = scmp.lt.s32.totalorder %s4063_s19, %s4063_s19 }
   0xa   : > { %p3947_p6 = pnand %p4151_p4, %p3946_p5  ;;  %p4073_p13 = por %p4072_p12, %p4071_p11 }
   0xc   : > { %p4065_p8 = pneg %p3947_p6 }
   0xe   : > { %p4066_p9 = pnand %p4065_p8, %p4064_p7 }
  0x10   : > { %p4067_p10 = pneg %p4066_p9 }
  0x12   : > { %p4074_p0 = pnand %p4073_p13, %p4067_p10 }
  0x14   : > { %4077 = shalt.err (!%p4074_p0)
}
  0x15   : > { %s4106_s20 = smov [#allocation3]   ;;  %147 = sbr.rel (%p4147_p3) target bundleno = 1053 (0x41d), region = 28 }
  0x16   : > { %3949 = dma.vmem_to_smem (!%p3947_p6), %s121_s18, 16, %s4106_s20, [#allocation4]  }
  0x1c   : > { %4091 = dma.done.wait (%p4151_p4), [#allocation4], 16  }
  0x1d   : > { %4093 = vsyncadd (%p4151_p4), [#allocation4], 4294967280 }
  0x1e   : > { %153 = sfence }
  0x1f   : > { %p181_p1 = scmp.lt.s32.totalorder %s4096_s9, 1  ;;  %vm202_vm0 = vcmask 139264   ;;  %vm267_vm1 = vcmask 7168   ;;  %vm365_vm2 = vcmask 146568   ;;  %v4107_v0 = vmov 0.0   ;;  %s4108_s25 = smov 1  }
  0x20   : > { %204 = vst.msk [vmem:[#allocation2 + $0x18] sm:$0x1] %vm202_vm0, %v4107_v0  ;;  %203 = vst.msk [vmem:[#allocation2] sm:$0x1] %vm202_vm0, %v4107_v0  ;;  %vm270_vm3 = vcmask 1024   ;;  %vm368_vm4 = vcmask 140424  }
  0x21   : > { %273 = vst.msk [vmem:[#allocation2 + $0x20] sm:$0xff] %vm267_vm1, %v4107_v0  ;;  %269 = vst.msk [vmem:[#allocation2 + $0x8] sm:$0xff] %vm267_vm1, %v4107_v0  ;;  %s8390_s9 = smov (!%p181_p1, %s4096_s9), 1  ;;  %vm783_vm5 = vcmask 138248   ;;  %s3930_s26 = sld [smem:[#allocation3 + $0x1]]  ;;  %vm3746_vm6 = vcmask 130048  }
  0x22   : > { %205 = vst.msk [vmem:[#allocation2 + $0x30] sm:$0x1] %vm202_vm0, %v4107_v0  ;;  %206 = vst.msk [vmem:[#allocation2 + $0x48] sm:$0x1] %vm202_vm0, %v4107_v0  ;;  %s3940_s21 = sshll.u32 %s8390_s9, 9  ;;  %s4109_s27 = smov 127  }
  0x23   : > { %207 = vst.msk [vmem:[#allocation2 + $0x60] sm:$0x1] %vm202_vm0, %v4107_v0  ;;  %208 = vst.msk [vmem:[#allocation2 + $0x78] sm:$0x1] %vm202_vm0, %v4107_v0  ;;  %s4692_s24 = scalar_lea.vmem %s7853_s1, %s3940_s21  ;;  %s3931_s28 = sld [smem:[#allocation3 + $0x2]] }
  0x24   : > { %209 = vst.msk [vmem:[#allocation2 + $0x90] sm:$0x1] %vm202_vm0, %v4107_v0  ;;  %210 = vst.msk [vmem:[#allocation2 + $0xa8] sm:$0x1] %vm202_vm0, %v4107_v0  ;;  %v465_v1 = vld [vmem:[%s4692_s24 + $0x10] sm:$0xff]  ;;  %v463_v2 = vld [vmem:[%s4692_s24] sm:$0xff]  ;;  %s7581_s15 = scalar_lea.vmem %s7854_s2, %s3940_s21 }
  0x25   : > { %211 = vst.msk [vmem:[#allocation2 + $0xc0] sm:$0x1] %vm202_vm0, %v4107_v0  ;;  %212 = vst.msk [vmem:[#allocation2 + $0xd8] sm:$0x1] %vm202_vm0, %v4107_v0  ;;  %595 = vrot.lane.b32.xlu1 %v465_v1, %s4108_s25  ;;  %591 = vrot.lane.b32.xlu0 %v463_v2, %s4108_s25  ;;  %v466_v3 = vld [vmem:[%s4692_s24 + $0x18] sm:$0xff]  ;;  %v464_v4 = vld [vmem:[%s4692_s24 + $0x8] sm:$0xff] }
  0x26   : > { %213 = vst.msk [vmem:[#allocation2 + $0xf0] sm:$0x1] %vm202_vm0, %v4107_v0  ;;  %214 = vst.msk [vmem:[#allocation2 + $0x108] sm:$0x1] %vm202_vm0, %v4107_v0  ;;  %v467_v5 = vld [vmem:[%s4692_s24 + $0x20] sm:$0xff]  ;;  %v468_v6 = vld [vmem:[%s4692_s24 + $0x28] sm:$0xff] }
  0x27   : > { %215 = vst.msk [vmem:[#allocation2 + $0x120] sm:$0x1] %vm202_vm0, %v4107_v0  ;;  %216 = vst.msk [vmem:[#allocation2 + $0x138] sm:$0x1] %vm202_vm0, %v4107_v0  ;;  %v469_v7 = vld [vmem:[%s4692_s24 + $0x30] sm:$0xff]  ;;  %v470_v8 = vld [vmem:[%s4692_s24 + $0x38] sm:$0xff] }
  0x28   : > { %217 = vst.msk [vmem:[#allocation2 + $0x150] sm:$0x1] %vm202_vm0, %v4107_v0  ;;  %218 = vst.msk [vmem:[#allocation2 + $0x168] sm:$0x1] %vm202_vm0, %v4107_v0  ;;  %v471_v9 = vld [vmem:[%s4692_s24 + $0x40] sm:$0xff]  ;;  %v472_v10 = vld [vmem:[%s4692_s24 + $0x48] sm:$0xff] }
  0x29   : > { %219 = vst.msk [vmem:[#allocation2 + $0x180] sm:$0x1] %vm202_vm0, %v4107_v0  ;;  %220 = vst.msk [vmem:[#allocation2 + $0x198] sm:$0x1] %vm202_vm0, %v4107_v0  ;;  %597 = vrot.lane.b32.xlu1 %v466_v3, %s4108_s25  ;;  %593 = vrot.lane.b32.xlu0 %v464_v4, %s4108_s25  ;;  %v473_v11 = vld [vmem:[%s4692_s24 + $0x50] sm:$0xff]  ;;  %v474_v12 = vld [vmem:[%s4692_s24 + $0x58] sm:$0xff] }
  0x2a   : > { %221 = vst.msk [vmem:[#allocation2 + $0x1b0] sm:$0x1] %vm202_vm0, %v4107_v0  ;;  %222 = vst.msk [vmem:[#allocation2 + $0x1c8] sm:$0x1] %vm202_vm0, %v4107_v0  ;;  %v475_v13 = vld [vmem:[%s4692_s24 + $0x60] sm:$0xff]  ;;  %v476_v14 = vld [vmem:[%s4692_s24 + $0x68] sm:$0xff] }
  0x2b   : > { %223 = vst.msk [vmem:[#allocation2 + $0x1e0] sm:$0x1] %vm202_vm0, %v4107_v0  ;;  %224 = vst.msk [vmem:[#allocation2 + $0x1f8] sm:$0x1] %vm202_vm0, %v4107_v0  ;;  %v477_v15 = vld [vmem:[%s4692_s24 + $0x70] sm:$0xff]  ;;  %v478_v16 = vld [vmem:[%s4692_s24 + $0x78] sm:$0xff] }
  0x2c   : > { %225 = vst.msk [vmem:[#allocation2 + $0x210] sm:$0x1] %vm202_vm0, %v4107_v0  ;;  %226 = vst.msk [vmem:[#allocation2 + $0x228] sm:$0x1] %vm202_vm0, %v4107_v0  ;;  %v479_v17 = vld [vmem:[%s4692_s24 + $0x80] sm:$0xff]  ;;  %v480_v18 = vld [vmem:[%s4692_s24 + $0x88] sm:$0xff] }
  0x2d   : > { %227 = vst.msk [vmem:[#allocation2 + $0x240] sm:$0x1] %vm202_vm0, %v4107_v0  ;;  %228 = vst.msk [vmem:[#allocation2 + $0x258] sm:$0x1] %vm202_vm0, %v4107_v0  ;;  %599 = vrot.lane.b32.xlu0 %v467_v5, %s4108_s25  ;;  %601 = vrot.lane.b32.xlu1 %v468_v6, %s4108_s25  ;;  %v481_v19 = vld [vmem:[%s4692_s24 + $0x90] sm:$0xff]  ;;  %v482_v20 = vld [vmem:[%s4692_s24 + $0x98] sm:$0xff] }
  0x2e   : > { %229 = vst.msk [vmem:[#allocation2 + $0x270] sm:$0x1] %vm202_vm0, %v4107_v0  ;;  %230 = vst.msk [vmem:[#allocation2 + $0x288] sm:$0x1] %vm202_vm0, %v4107_v0  ;;  %v483_v21 = vld [vmem:[%s4692_s24 + $0xa0] sm:$0xff]  ;;  %v484_v22 = vld [vmem:[%s4692_s24 + $0xa8] sm:$0xff] }
  0x2f   : > { %231 = vst.msk [vmem:[#allocation2 + $0x2a0] sm:$0x1] %vm202_vm0, %v4107_v0  ;;  %232 = vst.msk [vmem:[#allocation2 + $0x2b8] sm:$0x1] %vm202_vm0, %v4107_v0  ;;  %v485_v23 = vld [vmem:[%s4692_s24 + $0xb0] sm:$0xff]  ;;  %v486_v24 = vld [vmem:[%s4692_s24 + $0xb8] sm:$0xff] }
  0x30   : > { %233 = vst.msk [vmem:[#allocation2 + $0x2d0] sm:$0x1] %vm202_vm0, %v4107_v0  ;;  %234 = vst.msk [vmem:[#allocation2 + $0x2e8] sm:$0x1] %vm202_vm0, %v4107_v0  ;;  %v487_v25 = vld [vmem:[%s4692_s24 + $0xc0] sm:$0xff]  ;;  %v488_v26 = vld [vmem:[%s4692_s24 + $0xc8] sm:$0xff] }
  0x31   : > { %235 = vst.msk [vmem:[#allocation2 + $0x11] sm:$0x1] %vm202_vm0, %v4107_v0  ;;  %236 = vst.msk [vmem:[#allocation2 + $0x29] sm:$0x1] %vm202_vm0, %v4107_v0  ;;  %603 = vrot.lane.b32.xlu0 %v469_v7, %s4108_s25  ;;  %605 = vrot.lane.b32.xlu1 %v470_v8, %s4108_s25  ;;  %v489_v27 = vld [vmem:[%s4692_s24 + $0xd0] sm:$0xff]  ;;  %v490_v28 = vld [vmem:[%s4692_s24 + $0xd8] sm:$0xff] }
  0x32   : > { %237 = vst.msk [vmem:[#allocation2 + $0x41] sm:$0x1] %vm202_vm0, %v4107_v0  ;;  %238 = vst.msk [vmem:[#allocation2 + $0x59] sm:$0x1] %vm202_vm0, %v4107_v0  ;;  %v491_v29 = vld [vmem:[%s4692_s24 + $0xe0] sm:$0xff]  ;;  %v492_v30 = vld [vmem:[%s4692_s24 + $0xe8] sm:$0xff]  ;;  %v4828_v8 = vstv %s3930_s26 }
  0x33   : > { %239 = vst.msk [vmem:[#allocation2 + $0x71] sm:$0x1] %vm202_vm0, %v4107_v0  ;;  %240 = vst.msk [vmem:[#allocation2 + $0x89] sm:$0x1] %vm202_vm0, %v4107_v0  ;;  %v493_v31 = vld [vmem:[%s4692_s24 + $0xf0] sm:$0xff]  ;;  %v494_v32 = vld [vmem:[%s4692_s24 + $0xf8] sm:$0xff] }
  0x34   : > { %241 = vst.msk [vmem:[#allocation2 + $0xa1] sm:$0x1] %vm202_vm0, %v4107_v0  ;;  %242 = vst.msk [vmem:[#allocation2 + $0xb9] sm:$0x1] %vm202_vm0, %v4107_v0  ;;  %v495_v33 = vld [vmem:[%s4692_s24 + $0x100] sm:$0xff]  ;;  %v496_v34 = vld [vmem:[%s4692_s24 + $0x108] sm:$0xff] }
  0x35   : > { %243 = vst.msk [vmem:[#allocation2 + $0xd1] sm:$0x1] %vm202_vm0, %v4107_v0  ;;  %244 = vst.msk [vmem:[#allocation2 + $0xe9] sm:$0x1] %vm202_vm0, %v4107_v0  ;;  %607 = vrot.lane.b32.xlu0 %v471_v9, %s4108_s25  ;;  %609 = vrot.lane.b32.xlu1 %v472_v10, %s4108_s25  ;;  %v497_v35 = vld [vmem:[%s4692_s24 + $0x110] sm:$0xff]  ;;  %v498_v36 = vld [vmem:[%s4692_s24 + $0x118] sm:$0xff] }
  0x36   : > { %245 = vst.msk [vmem:[#allocation2 + $0x101] sm:$0x1] %vm202_vm0, %v4107_v0  ;;  %246 = vst.msk [vmem:[#allocation2 + $0x119] sm:$0x1] %vm202_vm0, %v4107_v0  ;;  %v499_v37 = vld [vmem:[%s4692_s24 + $0x120] sm:$0xff]  ;;  %v500_v38 = vld [vmem:[%s4692_s24 + $0x128] sm:$0xff] }
  0x37   : > { %247 = vst.msk [vmem:[#allocation2 + $0x131] sm:$0x1] %vm202_vm0, %v4107_v0  ;;  %248 = vst.msk [vmem:[#allocation2 + $0x149] sm:$0x1] %vm202_vm0, %v4107_v0  ;;  %v501_v39 = vld [vmem:[%s4692_s24 + $0x130] sm:$0xff]  ;;  %v502_v40 = vld [vmem:[%s4692_s24 + $0x138] sm:$0xff] }
  0x38   : > { %249 = vst.msk [vmem:[#allocation2 + $0x161] sm:$0x1] %vm202_vm0, %v4107_v0  ;;  %250 = vst.msk [vmem:[#allocation2 + $0x179] sm:$0x1] %vm202_vm0, %v4107_v0  ;;  %v503_v41 = vld [vmem:[%s4692_s24 + $0x140] sm:$0xff]  ;;  %v504_v42 = vld [vmem:[%s4692_s24 + $0x148] sm:$0xff] }
  0x39   : > { %251 = vst.msk [vmem:[#allocation2 + $0x191] sm:$0x1] %vm202_vm0, %v4107_v0  ;;  %252 = vst.msk [vmem:[#allocation2 + $0x1a9] sm:$0x1] %vm202_vm0, %v4107_v0  ;;  %611 = vrot.lane.b32.xlu0 %v473_v11, %s4108_s25  ;;  %613 = vrot.lane.b32.xlu1 %v474_v12, %s4108_s25  ;;  %v505_v43 = vld [vmem:[%s4692_s24 + $0x150] sm:$0xff]  ;;  %v506_v44 = vld [vmem:[%s4692_s24 + $0x158] sm:$0xff] }
  0x3a   : > { %253 = vst.msk [vmem:[#allocation2 + $0x1c1] sm:$0x1] %vm202_vm0, %v4107_v0  ;;  %254 = vst.msk [vmem:[#allocation2 + $0x1d9] sm:$0x1] %vm202_vm0, %v4107_v0  ;;  %v507_v45 = vld [vmem:[%s4692_s24 + $0x160] sm:$0xff]  ;;  %v508_v46 = vld [vmem:[%s4692_s24 + $0x168] sm:$0xff] }
  0x3b   : > { %255 = vst.msk [vmem:[#allocation2 + $0x1f1] sm:$0x1] %vm202_vm0, %v4107_v0  ;;  %256 = vst.msk [vmem:[#allocation2 + $0x209] sm:$0x1] %vm202_vm0, %v4107_v0  ;;  %v509_v47 = vld [vmem:[%s4692_s24 + $0x170] sm:$0xff]  ;;  %v510_v48 = vld [vmem:[%s4692_s24 + $0x178] sm:$0xff] }
  0x3c   : > { %257 = vst.msk [vmem:[#allocation2 + $0x221] sm:$0x1] %vm202_vm0, %v4107_v0  ;;  %258 = vst.msk [vmem:[#allocation2 + $0x239] sm:$0x1] %vm202_vm0, %v4107_v0  ;;  %v511_v49 = vld [vmem:[%s4692_s24 + $0x180] sm:$0xff]  ;;  %v512_v50 = vld [vmem:[%s4692_s24 + $0x188] sm:$0xff] }
  0x3d   : > { %259 = vst.msk [vmem:[#allocation2 + $0x251] sm:$0x1] %vm202_vm0, %v4107_v0  ;;  %260 = vst.msk [vmem:[#allocation2 + $0x269] sm:$0x1] %vm202_vm0, %v4107_v0  ;;  %615 = vrot.lane.b32.xlu0 %v475_v13, %s4108_s25  ;;  %617 = vrot.lane.b32.xlu1 %v476_v14, %s4108_s25  ;;  %v513_v51 = vld [vmem:[%s4692_s24 + $0x190] sm:$0xff]  ;;  %v514_v52 = vld [vmem:[%s4692_s24 + $0x198] sm:$0xff] }
  0x3e   : > { %261 = vst.msk [vmem:[#allocation2 + $0x281] sm:$0x1] %vm202_vm0, %v4107_v0  ;;  %262 = vst.msk [vmem:[#allocation2 + $0x299] sm:$0x1] %vm202_vm0, %v4107_v0  ;;  %v515_v53 = vld [vmem:[%s4692_s24 + $0x1a0] sm:$0xff]  ;;  %v516_v54 = vld [vmem:[%s4692_s24 + $0x1a8] sm:$0xff] }
  0x3f   : > { %263 = vst.msk [vmem:[#allocation2 + $0x2b1] sm:$0x1] %vm202_vm0, %v4107_v0  ;;  %264 = vst.msk [vmem:[#allocation2 + $0x2c9] sm:$0x1] %vm202_vm0, %v4107_v0  ;;  %v517_v55 = vld [vmem:[%s4692_s24 + $0x1b0] sm:$0xff]  ;;  %v518_v56 = vld [vmem:[%s4692_s24 + $0x1b8] sm:$0xff] }
  0x40   : > { %265 = vst.msk [vmem:[#allocation2 + $0x2e1] sm:$0x1] %vm202_vm0, %v4107_v0  ;;  %266 = vst.msk [vmem:[#allocation2 + $0x2f9] sm:$0x1] %vm202_vm0, %v4107_v0  ;;  %v519_v57 = vld [vmem:[%s4692_s24 + $0x1c0] sm:$0xff]  ;;  %v520_v58 = vld [vmem:[%s4692_s24 + $0x1c8] sm:$0xff] }
  0x41   : > { %276 = vst.msk [vmem:[#allocation2 + $0x38] sm:$0xff] %vm267_vm1, %v4107_v0  ;;  %279 = vst.msk [vmem:[#allocation2 + $0x50] sm:$0xff] %vm267_vm1, %v4107_v0  ;;  %619 = vrot.lane.b32.xlu0 %v477_v15, %s4108_s25  ;;  %621 = vrot.lane.b32.xlu1 %v478_v16, %s4108_s25  ;;  %v521_v59 = vld [vmem:[%s4692_s24 + $0x1d0] sm:$0xff]  ;;  %v522_v60 = vld [vmem:[%s4692_s24 + $0x1d8] sm:$0xff]  ;;  %s4110_s29 = smov 126   ;;  %s848_s30 = sld [smem:[#allocation3]] }
  0x42   : > { %282 = vst.msk [vmem:[#allocation2 + $0x68] sm:$0xff] %vm267_vm1, %v4107_v0  ;;  %285 = vst.msk [vmem:[#allocation2 + $0x80] sm:$0xff] %vm267_vm1, %v4107_v0  ;;  %v523_v63 = vld [vmem:[%s4692_s24 + $0x1e0] sm:$0xff]  ;;  %v525_v3 = vld [vmem:[%s4692_s24 + $0x1f0] sm:$0xff]  ;;  %s3932_s3 = sld [smem:[#allocation3 + $0x3]]  ;;  %s5528_s4 = sld [smem:[#allocation3 + $0x4]] }
  0x43   : > { %288 = vst.msk [vmem:[#allocation2 + $0x98] sm:$0xff] %vm267_vm1, %v4107_v0  ;;  %291 = vst.msk [vmem:[#allocation2 + $0xb0] sm:$0xff] %vm267_vm1, %v4107_v0  ;;  %v526_v4 = vld [vmem:[%s4692_s24 + $0x1f8] sm:$0xff]  ;;  %s3934_s5 = sld [smem:[#allocation3 + $0x5]]  ;;  %s3935_s6 = sld [smem:[#allocation3 + $0x6]] }
  0x44   : > { %294 = vst.msk [vmem:[#allocation2 + $0xc8] sm:$0xff] %vm267_vm1, %v4107_v0  ;;  %297 = vst.msk [vmem:[#allocation2 + $0xe0] sm:$0xff] %vm267_vm1, %v4107_v0  ;;  %s6551_s7 = sld [smem:[#allocation3 + $0x7]]  ;;  %s3937_s8 = sld [smem:[#allocation3 + $0x8]] }
  0x45   : > { %300 = vst.msk [vmem:[#allocation2 + $0xf8] sm:$0xff] %vm267_vm1, %v4107_v0  ;;  %303 = vst.msk [vmem:[#allocation2 + $0x110] sm:$0xff] %vm267_vm1, %v4107_v0  ;;  %623 = vrot.lane.b32.xlu0 %v479_v17, %s4108_s25  ;;  %625 = vrot.lane.b32.xlu1 %v480_v18, %s4108_s25 }
  0x46   : > { %306 = vst.msk [vmem:[#allocation2 + $0x128] sm:$0xff] %vm267_vm1, %v4107_v0  ;;  %309 = vst.msk [vmem:[#allocation2 + $0x140] sm:$0xff] %vm267_vm1, %v4107_v0 }
  0x47   : > { %312 = vst.msk [vmem:[#allocation2 + $0x158] sm:$0xff] %vm267_vm1, %v4107_v0  ;;  %315 = vst.msk [vmem:[#allocation2 + $0x170] sm:$0xff] %vm267_vm1, %v4107_v0 }
  0x48   : > { %318 = vst.msk [vmem:[#allocation2 + $0x188] sm:$0xff] %vm267_vm1, %v4107_v0  ;;  %321 = vst.msk [vmem:[#allocation2 + $0x1a0] sm:$0xff] %vm267_vm1, %v4107_v0 }
  0x49   : > { %324 = vst.msk [vmem:[#allocation2 + $0x1b8] sm:$0xff] %vm267_vm1, %v4107_v0  ;;  %327 = vst.msk [vmem:[#allocation2 + $0x1d0] sm:$0xff] %vm267_vm1, %v4107_v0  ;;  %627 = vrot.lane.b32.xlu0 %v481_v19, %s4108_s25  ;;  %629 = vrot.lane.b32.xlu1 %v482_v20, %s4108_s25 }
  0x4a   : > { %330 = vst.msk [vmem:[#allocation2 + $0x1e8] sm:$0xff] %vm267_vm1, %v4107_v0  ;;  %333 = vst.msk [vmem:[#allocation2 + $0x200] sm:$0xff] %vm267_vm1, %v4107_v0 }
  0x4b   : > { %336 = vst.msk [vmem:[#allocation2 + $0x218] sm:$0xff] %vm267_vm1, %v4107_v0  ;;  %339 = vst.msk [vmem:[#allocation2 + $0x230] sm:$0xff] %vm267_vm1, %v4107_v0 }
  0x4c   : > { %342 = vst.msk [vmem:[#allocation2 + $0x248] sm:$0xff] %vm267_vm1, %v4107_v0  ;;  %345 = vst.msk [vmem:[#allocation2 + $0x260] sm:$0xff] %vm267_vm1, %v4107_v0 }
  0x4d   : > { %348 = vst.msk [vmem:[#allocation2 + $0x278] sm:$0xff] %vm267_vm1, %v4107_v0  ;;  %351 = vst.msk [vmem:[#allocation2 + $0x290] sm:$0xff] %vm267_vm1, %v4107_v0  ;;  %631 = vrot.lane.b32.xlu0 %v483_v21, %s4108_s25  ;;  %633 = vrot.lane.b32.xlu1 %v484_v22, %s4108_s25 }
  0x4e   : > { %354 = vst.msk [vmem:[#allocation2 + $0x2a8] sm:$0xff] %vm267_vm1, %v4107_v0  ;;  %357 = vst.msk [vmem:[#allocation2 + $0x2c0] sm:$0xff] %vm267_vm1, %v4107_v0 }
  0x4f   : > { %360 = vst.msk [vmem:[#allocation2 + $0x2d8] sm:$0xff] %vm267_vm1, %v4107_v0  ;;  %363 = vst.msk [vmem:[#allocation2 + $0x2f0] sm:$0xff] %vm267_vm1, %v4107_v0 }
  0x50   : > { %272 = vst.msk [vmem:[#allocation2 + $0x18] sm:$0xff] %vm267_vm1, %v4107_v0  ;;  %268 = vst.msk [vmem:[#allocation2] sm:$0xff] %vm267_vm1, %v4107_v0 }
  0x51   : > { %371 = vst.msk [vmem:[#allocation2 + $0x20] sm:$0xff] %vm365_vm2, %v4107_v0  ;;  %367 = vst.msk [vmem:[#allocation2 + $0x8] sm:$0xff] %vm365_vm2, %v4107_v0  ;;  %635 = vrot.lane.b32.xlu0 %v485_v23, %s4108_s25  ;;  %637 = vrot.lane.b32.xlu1 %v486_v24, %s4108_s25 }
  0x52   : > { %275 = vst.msk [vmem:[#allocation2 + $0x30] sm:$0xff] %vm267_vm1, %v4107_v0  ;;  %278 = vst.msk [vmem:[#allocation2 + $0x48] sm:$0xff] %vm267_vm1, %v4107_v0 }
  0x53   : > { %281 = vst.msk [vmem:[#allocation2 + $0x60] sm:$0xff] %vm267_vm1, %v4107_v0  ;;  %284 = vst.msk [vmem:[#allocation2 + $0x78] sm:$0xff] %vm267_vm1, %v4107_v0 }
  0x54   : > { %287 = vst.msk [vmem:[#allocation2 + $0x90] sm:$0xff] %vm267_vm1, %v4107_v0  ;;  %290 = vst.msk [vmem:[#allocation2 + $0xa8] sm:$0xff] %vm267_vm1, %v4107_v0 }
  0x55   : > { %293 = vst.msk [vmem:[#allocation2 + $0xc0] sm:$0xff] %vm267_vm1, %v4107_v0  ;;  %296 = vst.msk [vmem:[#allocation2 + $0xd8] sm:$0xff] %vm267_vm1, %v4107_v0  ;;  %639 = vrot.lane.b32.xlu0 %v487_v25, %s4108_s25  ;;  %641 = vrot.lane.b32.xlu1 %v488_v26, %s4108_s25 }
  0x56   : > { %299 = vst.msk [vmem:[#allocation2 + $0xf0] sm:$0xff] %vm267_vm1, %v4107_v0  ;;  %302 = vst.msk [vmem:[#allocation2 + $0x108] sm:$0xff] %vm267_vm1, %v4107_v0 }
  0x57   : > { %305 = vst.msk [vmem:[#allocation2 + $0x120] sm:$0xff] %vm267_vm1, %v4107_v0  ;;  %308 = vst.msk [vmem:[#allocation2 + $0x138] sm:$0xff] %vm267_vm1, %v4107_v0 }
  0x58   : > { %311 = vst.msk [vmem:[#allocation2 + $0x150] sm:$0xff] %vm267_vm1, %v4107_v0  ;;  %314 = vst.msk [vmem:[#allocation2 + $0x168] sm:$0xff] %vm267_vm1, %v4107_v0 }
  0x59   : > { %317 = vst.msk [vmem:[#allocation2 + $0x180] sm:$0xff] %vm267_vm1, %v4107_v0  ;;  %320 = vst.msk [vmem:[#allocation2 + $0x198] sm:$0xff] %vm267_vm1, %v4107_v0  ;;  %643 = vrot.lane.b32.xlu0 %v489_v27, %s4108_s25  ;;  %645 = vrot.lane.b32.xlu1 %v490_v28, %s4108_s25 }
  0x5a   : > { %323 = vst.msk [vmem:[#allocation2 + $0x1b0] sm:$0xff] %vm267_vm1, %v4107_v0  ;;  %326 = vst.msk [vmem:[#allocation2 + $0x1c8] sm:$0xff] %vm267_vm1, %v4107_v0 }
  0x5b   : > { %329 = vst.msk [vmem:[#allocation2 + $0x1e0] sm:$0xff] %vm267_vm1, %v4107_v0  ;;  %332 = vst.msk [vmem:[#allocation2 + $0x1f8] sm:$0xff] %vm267_vm1, %v4107_v0 }
  0x5c   : > { %335 = vst.msk [vmem:[#allocation2 + $0x210] sm:$0xff] %vm267_vm1, %v4107_v0  ;;  %338 = vst.msk [vmem:[#allocation2 + $0x228] sm:$0xff] %vm267_vm1, %v4107_v0 }
  0x5d   : > { %341 = vst.msk [vmem:[#allocation2 + $0x240] sm:$0xff] %vm267_vm1, %v4107_v0  ;;  %344 = vst.msk [vmem:[#allocation2 + $0x258] sm:$0xff] %vm267_vm1, %v4107_v0  ;;  %647 = vrot.lane.b32.xlu0 %v491_v29, %s4108_s25  ;;  %649 = vrot.lane.b32.xlu1 %v492_v30, %s4108_s25 }
  0x5e   : > { %347 = vst.msk [vmem:[#allocation2 + $0x270] sm:$0xff] %vm267_vm1, %v4107_v0  ;;  %350 = vst.msk [vmem:[#allocation2 + $0x288] sm:$0xff] %vm267_vm1, %v4107_v0 }
  0x5f   : > { %353 = vst.msk [vmem:[#allocation2 + $0x2a0] sm:$0xff] %vm267_vm1, %v4107_v0  ;;  %356 = vst.msk [vmem:[#allocation2 + $0x2b8] sm:$0xff] %vm267_vm1, %v4107_v0 }
  0x60   : > { %359 = vst.msk [vmem:[#allocation2 + $0x2d0] sm:$0xff] %vm267_vm1, %v4107_v0  ;;  %362 = vst.msk [vmem:[#allocation2 + $0x2e8] sm:$0xff] %vm267_vm1, %v4107_v0 }
  0x61   : > { %374 = vst.msk [vmem:[#allocation2 + $0x38] sm:$0xff] %vm365_vm2, %v4107_v0  ;;  %377 = vst.msk [vmem:[#allocation2 + $0x50] sm:$0xff] %vm365_vm2, %v4107_v0  ;;  %651 = vrot.lane.b32.xlu0 %v493_v31, %s4108_s25  ;;  %653 = vrot.lane.b32.xlu1 %v494_v32, %s4108_s25 }
  0x62   : > { %380 = vst.msk [vmem:[#allocation2 + $0x68] sm:$0xff] %vm365_vm2, %v4107_v0  ;;  %383 = vst.msk [vmem:[#allocation2 + $0x80] sm:$0xff] %vm365_vm2, %v4107_v0 }
  0x63   : > { %386 = vst.msk [vmem:[#allocation2 + $0x98] sm:$0xff] %vm365_vm2, %v4107_v0  ;;  %389 = vst.msk [vmem:[#allocation2 + $0xb0] sm:$0xff] %vm365_vm2, %v4107_v0 }
  0x64   : > { %392 = vst.msk [vmem:[#allocation2 + $0xc8] sm:$0xff] %vm365_vm2, %v4107_v0  ;;  %395 = vst.msk [vmem:[#allocation2 + $0xe0] sm:$0xff] %vm365_vm2, %v4107_v0 }
  0x65   : > { %398 = vst.msk [vmem:[#allocation2 + $0xf8] sm:$0xff] %vm365_vm2, %v4107_v0  ;;  %401 = vst.msk [vmem:[#allocation2 + $0x110] sm:$0xff] %vm365_vm2, %v4107_v0  ;;  %655 = vrot.lane.b32.xlu0 %v495_v33, %s4108_s25  ;;  %657 = vrot.lane.b32.xlu1 %v496_v34, %s4108_s25 }
  0x66   : > { %404 = vst.msk [vmem:[#allocation2 + $0x128] sm:$0xff] %vm365_vm2, %v4107_v0  ;;  %407 = vst.msk [vmem:[#allocation2 + $0x140] sm:$0xff] %vm365_vm2, %v4107_v0 }
  0x67   : > { %410 = vst.msk [vmem:[#allocation2 + $0x158] sm:$0xff] %vm365_vm2, %v4107_v0  ;;  %413 = vst.msk [vmem:[#allocation2 + $0x170] sm:$0xff] %vm365_vm2, %v4107_v0 }
  0x68   : > { %416 = vst.msk [vmem:[#allocation2 + $0x188] sm:$0xff] %vm365_vm2, %v4107_v0  ;;  %419 = vst.msk [vmem:[#allocation2 + $0x1a0] sm:$0xff] %vm365_vm2, %v4107_v0 }
  0x69   : > { %422 = vst.msk [vmem:[#allocation2 + $0x1b8] sm:$0xff] %vm365_vm2, %v4107_v0  ;;  %425 = vst.msk [vmem:[#allocation2 + $0x1d0] sm:$0xff] %vm365_vm2, %v4107_v0  ;;  %659 = vrot.lane.b32.xlu0 %v497_v35, %s4108_s25  ;;  %661 = vrot.lane.b32.xlu1 %v498_v36, %s4108_s25 }
  0x6a   : > { %428 = vst.msk [vmem:[#allocation2 + $0x1e8] sm:$0xff] %vm365_vm2, %v4107_v0  ;;  %431 = vst.msk [vmem:[#allocation2 + $0x200] sm:$0xff] %vm365_vm2, %v4107_v0 }
  0x6b   : > { %434 = vst.msk [vmem:[#allocation2 + $0x218] sm:$0xff] %vm365_vm2, %v4107_v0  ;;  %437 = vst.msk [vmem:[#allocation2 + $0x230] sm:$0xff] %vm365_vm2, %v4107_v0 }
  0x6c   : > { %440 = vst.msk [vmem:[#allocation2 + $0x248] sm:$0xff] %vm365_vm2, %v4107_v0  ;;  %443 = vst.msk [vmem:[#allocation2 + $0x260] sm:$0xff] %vm365_vm2, %v4107_v0 }
  0x6d   : > { %446 = vst.msk [vmem:[#allocation2 + $0x278] sm:$0xff] %vm365_vm2, %v4107_v0  ;;  %449 = vst.msk [vmem:[#allocation2 + $0x290] sm:$0xff] %vm365_vm2, %v4107_v0  ;;  %663 = vrot.lane.b32.xlu0 %v499_v37, %s4108_s25  ;;  %665 = vrot.lane.b32.xlu1 %v500_v38, %s4108_s25 }
  0x6e   : > { %452 = vst.msk [vmem:[#allocation2 + $0x2a8] sm:$0xff] %vm365_vm2, %v4107_v0  ;;  %455 = vst.msk [vmem:[#allocation2 + $0x2c0] sm:$0xff] %vm365_vm2, %v4107_v0 }
  0x6f   : > { %458 = vst.msk [vmem:[#allocation2 + $0x2d8] sm:$0xff] %vm365_vm2, %v4107_v0  ;;  %461 = vst.msk [vmem:[#allocation2 + $0x2f0] sm:$0xff] %vm365_vm2, %v4107_v0 }
  0x70   : > { %274 = vst.msk [vmem:[#allocation2 + $0x28] sm:$0x3] %vm270_vm3, %v4107_v0  ;;  %271 = vst.msk [vmem:[#allocation2 + $0x10] sm:$0x3] %vm270_vm3, %v4107_v0 }
  0x71   : > { %277 = vst.msk [vmem:[#allocation2 + $0x40] sm:$0x3] %vm270_vm3, %v4107_v0  ;;  %280 = vst.msk [vmem:[#allocation2 + $0x58] sm:$0x3] %vm270_vm3, %v4107_v0  ;;  %667 = vrot.lane.b32.xlu0 %v501_v39, %s4108_s25  ;;  %669 = vrot.lane.b32.xlu1 %v502_v40, %s4108_s25 }
  0x72   : > { %283 = vst.msk [vmem:[#allocation2 + $0x70] sm:$0x3] %vm270_vm3, %v4107_v0  ;;  %286 = vst.msk [vmem:[#allocation2 + $0x88] sm:$0x3] %vm270_vm3, %v4107_v0 }
  0x73   : > { %289 = vst.msk [vmem:[#allocation2 + $0xa0] sm:$0x3] %vm270_vm3, %v4107_v0  ;;  %292 = vst.msk [vmem:[#allocation2 + $0xb8] sm:$0x3] %vm270_vm3, %v4107_v0 }
  0x74   : > { %295 = vst.msk [vmem:[#allocation2 + $0xd0] sm:$0x3] %vm270_vm3, %v4107_v0  ;;  %298 = vst.msk [vmem:[#allocation2 + $0xe8] sm:$0x3] %vm270_vm3, %v4107_v0 }
  0x75   : > { %301 = vst.msk [vmem:[#allocation2 + $0x100] sm:$0x3] %vm270_vm3, %v4107_v0  ;;  %304 = vst.msk [vmem:[#allocation2 + $0x118] sm:$0x3] %vm270_vm3, %v4107_v0  ;;  %671 = vrot.lane.b32.xlu0 %v503_v41, %s4108_s25  ;;  %673 = vrot.lane.b32.xlu1 %v504_v42, %s4108_s25 }
  0x76   : > { %307 = vst.msk [vmem:[#allocation2 + $0x130] sm:$0x3] %vm270_vm3, %v4107_v0  ;;  %310 = vst.msk [vmem:[#allocation2 + $0x148] sm:$0x3] %vm270_vm3, %v4107_v0 }
  0x77   : > { %313 = vst.msk [vmem:[#allocation2 + $0x160] sm:$0x3] %vm270_vm3, %v4107_v0  ;;  %316 = vst.msk [vmem:[#allocation2 + $0x178] sm:$0x3] %vm270_vm3, %v4107_v0 }
  0x78   : > { %319 = vst.msk [vmem:[#allocation2 + $0x190] sm:$0x3] %vm270_vm3, %v4107_v0  ;;  %322 = vst.msk [vmem:[#allocation2 + $0x1a8] sm:$0x3] %vm270_vm3, %v4107_v0 }
  0x79   : > { %325 = vst.msk [vmem:[#allocation2 + $0x1c0] sm:$0x3] %vm270_vm3, %v4107_v0  ;;  %328 = vst.msk [vmem:[#allocation2 + $0x1d8] sm:$0x3] %vm270_vm3, %v4107_v0  ;;  %675 = vrot.lane.b32.xlu0 %v505_v43, %s4108_s25  ;;  %677 = vrot.lane.b32.xlu1 %v506_v44, %s4108_s25 }
  0x7a   : > { %331 = vst.msk [vmem:[#allocation2 + $0x1f0] sm:$0x3] %vm270_vm3, %v4107_v0  ;;  %334 = vst.msk [vmem:[#allocation2 + $0x208] sm:$0x3] %vm270_vm3, %v4107_v0 }
  0x7b   : > { %337 = vst.msk [vmem:[#allocation2 + $0x220] sm:$0x3] %vm270_vm3, %v4107_v0  ;;  %340 = vst.msk [vmem:[#allocation2 + $0x238] sm:$0x3] %vm270_vm3, %v4107_v0 }
  0x7c   : > { %343 = vst.msk [vmem:[#allocation2 + $0x250] sm:$0x3] %vm270_vm3, %v4107_v0  ;;  %346 = vst.msk [vmem:[#allocation2 + $0x268] sm:$0x3] %vm270_vm3, %v4107_v0 }
  0x7d   : > { %349 = vst.msk [vmem:[#allocation2 + $0x280] sm:$0x3] %vm270_vm3, %v4107_v0  ;;  %352 = vst.msk [vmem:[#allocation2 + $0x298] sm:$0x3] %vm270_vm3, %v4107_v0  ;;  %679 = vrot.lane.b32.xlu0 %v507_v45, %s4108_s25  ;;  %681 = vrot.lane.b32.xlu1 %v508_v46, %s4108_s25 }
  0x7e   : > { %355 = vst.msk [vmem:[#allocation2 + $0x2b0] sm:$0x3] %vm270_vm3, %v4107_v0  ;;  %358 = vst.msk [vmem:[#allocation2 + $0x2c8] sm:$0x3] %vm270_vm3, %v4107_v0 }
  0x7f   : > { %361 = vst.msk [vmem:[#allocation2 + $0x2e0] sm:$0x3] %vm270_vm3, %v4107_v0  ;;  %364 = vst.msk [vmem:[#allocation2 + $0x2f8] sm:$0x3] %vm270_vm3, %v4107_v0 }
  0x80   : > { %370 = vst.msk [vmem:[#allocation2 + $0x18] sm:$0xff] %vm365_vm2, %v4107_v0  ;;  %366 = vst.msk [vmem:[#allocation2] sm:$0xff] %vm365_vm2, %v4107_v0 }
  0x81   : > { %373 = vst.msk [vmem:[#allocation2 + $0x30] sm:$0xff] %vm365_vm2, %v4107_v0  ;;  %376 = vst.msk [vmem:[#allocation2 + $0x48] sm:$0xff] %vm365_vm2, %v4107_v0  ;;  %683 = vrot.lane.b32.xlu0 %v509_v47, %s4108_s25  ;;  %685 = vrot.lane.b32.xlu1 %v510_v48, %s4108_s25 }
  0x82   : > { %379 = vst.msk [vmem:[#allocation2 + $0x60] sm:$0xff] %vm365_vm2, %v4107_v0  ;;  %382 = vst.msk [vmem:[#allocation2 + $0x78] sm:$0xff] %vm365_vm2, %v4107_v0 }
  0x83   : > { %385 = vst.msk [vmem:[#allocation2 + $0x90] sm:$0xff] %vm365_vm2, %v4107_v0  ;;  %388 = vst.msk [vmem:[#allocation2 + $0xa8] sm:$0xff] %vm365_vm2, %v4107_v0 }
  0x84   : > { %391 = vst.msk [vmem:[#allocation2 + $0xc0] sm:$0xff] %vm365_vm2, %v4107_v0  ;;  %394 = vst.msk [vmem:[#allocation2 + $0xd8] sm:$0xff] %vm365_vm2, %v4107_v0 }
  0x85   : > { %397 = vst.msk [vmem:[#allocation2 + $0xf0] sm:$0xff] %vm365_vm2, %v4107_v0  ;;  %400 = vst.msk [vmem:[#allocation2 + $0x108] sm:$0xff] %vm365_vm2, %v4107_v0  ;;  %687 = vrot.lane.b32.xlu0 %v511_v49, %s4108_s25  ;;  %689 = vrot.lane.b32.xlu1 %v512_v50, %s4108_s25 }
  0x86   : > { %403 = vst.msk [vmem:[#allocation2 + $0x120] sm:$0xff] %vm365_vm2, %v4107_v0  ;;  %406 = vst.msk [vmem:[#allocation2 + $0x138] sm:$0xff] %vm365_vm2, %v4107_v0 }
  0x87   : > { %409 = vst.msk [vmem:[#allocation2 + $0x150] sm:$0xff] %vm365_vm2, %v4107_v0  ;;  %412 = vst.msk [vmem:[#allocation2 + $0x168] sm:$0xff] %vm365_vm2, %v4107_v0 }
  0x88   : > { %415 = vst.msk [vmem:[#allocation2 + $0x180] sm:$0xff] %vm365_vm2, %v4107_v0  ;;  %418 = vst.msk [vmem:[#allocation2 + $0x198] sm:$0xff] %vm365_vm2, %v4107_v0 }
  0x89   : > { %421 = vst.msk [vmem:[#allocation2 + $0x1b0] sm:$0xff] %vm365_vm2, %v4107_v0  ;;  %424 = vst.msk [vmem:[#allocation2 + $0x1c8] sm:$0xff] %vm365_vm2, %v4107_v0  ;;  %691 = vrot.lane.b32.xlu0 %v513_v51, %s4108_s25  ;;  %693 = vrot.lane.b32.xlu1 %v514_v52, %s4108_s25 }
  0x8a   : > { %427 = vst.msk [vmem:[#allocation2 + $0x1e0] sm:$0xff] %vm365_vm2, %v4107_v0  ;;  %430 = vst.msk [vmem:[#allocation2 + $0x1f8] sm:$0xff] %vm365_vm2, %v4107_v0 }
  0x8b   : > { %433 = vst.msk [vmem:[#allocation2 + $0x210] sm:$0xff] %vm365_vm2, %v4107_v0  ;;  %436 = vst.msk [vmem:[#allocation2 + $0x228] sm:$0xff] %vm365_vm2, %v4107_v0 }
  0x8c   : > { %439 = vst.msk [vmem:[#allocation2 + $0x240] sm:$0xff] %vm365_vm2, %v4107_v0  ;;  %442 = vst.msk [vmem:[#allocation2 + $0x258] sm:$0xff] %vm365_vm2, %v4107_v0 }
  0x8d   : > { %445 = vst.msk [vmem:[#allocation2 + $0x270] sm:$0xff] %vm365_vm2, %v4107_v0  ;;  %448 = vst.msk [vmem:[#allocation2 + $0x288] sm:$0xff] %vm365_vm2, %v4107_v0  ;;  %695 = vrot.lane.b32.xlu0 %v515_v53, %s4108_s25  ;;  %697 = vrot.lane.b32.xlu1 %v516_v54, %s4108_s25 }
  0x8e   : > { %451 = vst.msk [vmem:[#allocation2 + $0x2a0] sm:$0xff] %vm365_vm2, %v4107_v0  ;;  %454 = vst.msk [vmem:[#allocation2 + $0x2b8] sm:$0xff] %vm365_vm2, %v4107_v0 }
  0x8f   : > { %457 = vst.msk [vmem:[#allocation2 + $0x2d0] sm:$0xff] %vm365_vm2, %v4107_v0  ;;  %460 = vst.msk [vmem:[#allocation2 + $0x2e8] sm:$0xff] %vm365_vm2, %v4107_v0 }
  0x90   : > { %372 = vst.msk [vmem:[#allocation2 + $0x28] sm:$0x3] %vm368_vm4, %v4107_v0  ;;  %369 = vst.msk [vmem:[#allocation2 + $0x10] sm:$0x3] %vm368_vm4, %v4107_v0 }
  0x91   : > { %375 = vst.msk [vmem:[#allocation2 + $0x40] sm:$0x3] %vm368_vm4, %v4107_v0  ;;  %378 = vst.msk [vmem:[#allocation2 + $0x58] sm:$0x3] %vm368_vm4, %v4107_v0  ;;  %699 = vrot.lane.b32.xlu0 %v517_v55, %s4108_s25  ;;  %701 = vrot.lane.b32.xlu1 %v518_v56, %s4108_s25 }
  0x92   : > { %381 = vst.msk [vmem:[#allocation2 + $0x70] sm:$0x3] %vm368_vm4, %v4107_v0  ;;  %384 = vst.msk [vmem:[#allocation2 + $0x88] sm:$0x3] %vm368_vm4, %v4107_v0 }
  0x93   : > { %387 = vst.msk [vmem:[#allocation2 + $0xa0] sm:$0x3] %vm368_vm4, %v4107_v0  ;;  %390 = vst.msk [vmem:[#allocation2 + $0xb8] sm:$0x3] %vm368_vm4, %v4107_v0 }
  0x94   : > { %393 = vst.msk [vmem:[#allocation2 + $0xd0] sm:$0x3] %vm368_vm4, %v4107_v0  ;;  %396 = vst.msk [vmem:[#allocation2 + $0xe8] sm:$0x3] %vm368_vm4, %v4107_v0 }
  0x95   : > { %399 = vst.msk [vmem:[#allocation2 + $0x100] sm:$0x3] %vm368_vm4, %v4107_v0  ;;  %402 = vst.msk [vmem:[#allocation2 + $0x118] sm:$0x3] %vm368_vm4, %v4107_v0  ;;  %703 = vrot.lane.b32.xlu0 %v519_v57, %s4108_s25  ;;  %705 = vrot.lane.b32.xlu1 %v520_v58, %s4108_s25 }
  0x96   : > { %405 = vst.msk [vmem:[#allocation2 + $0x130] sm:$0x3] %vm368_vm4, %v4107_v0  ;;  %408 = vst.msk [vmem:[#allocation2 + $0x148] sm:$0x3] %vm368_vm4, %v4107_v0 }
  0x97   : > { %411 = vst.msk [vmem:[#allocation2 + $0x160] sm:$0x3] %vm368_vm4, %v4107_v0  ;;  %414 = vst.msk [vmem:[#allocation2 + $0x178] sm:$0x3] %vm368_vm4, %v4107_v0  ;;  %v596_v61 = vpop.permute.xlu1 %595  ;;  %v592_v62 = vpop.permute.xlu0 %591 }
  0x98   : > { %417 = vst.msk [vmem:[#allocation2 + $0x190] sm:$0x3] %vm368_vm4, %v4107_v0  ;;  %420 = vst.msk [vmem:[#allocation2 + $0x1a8] sm:$0x3] %vm368_vm4, %v4107_v0 }
  0x99   : > { %423 = vst.msk [vmem:[#allocation2 + $0x1c0] sm:$0x3] %vm368_vm4, %v4107_v0  ;;  %426 = vst.msk [vmem:[#allocation2 + $0x1d8] sm:$0x3] %vm368_vm4, %v4107_v0  ;;  %707 = vrot.lane.b32.xlu0 %v521_v59, %s4108_s25  ;;  %709 = vrot.lane.b32.xlu1 %v522_v60, %s4108_s25 }
  0x9a   : > { %429 = vst.msk [vmem:[#allocation2 + $0x1f0] sm:$0x3] %vm368_vm4, %v4107_v0  ;;  %432 = vst.msk [vmem:[#allocation2 + $0x208] sm:$0x3] %vm368_vm4, %v4107_v0 }
  0x9b   : > { %435 = vst.msk [vmem:[#allocation2 + $0x220] sm:$0x3] %vm368_vm4, %v4107_v0  ;;  %438 = vst.msk [vmem:[#allocation2 + $0x238] sm:$0x3] %vm368_vm4, %v4107_v0  ;;  %v598_v1 = vpop.permute.xlu1 %597  ;;  %v594_v2 = vpop.permute.xlu0 %593 }
  0x9c   : > { %441 = vst.msk [vmem:[#allocation2 + $0x250] sm:$0x3] %vm368_vm4, %v4107_v0  ;;  %444 = vst.msk [vmem:[#allocation2 + $0x268] sm:$0x3] %vm368_vm4, %v4107_v0 }
  0x9d   : > { %447 = vst.msk [vmem:[#allocation2 + $0x280] sm:$0x3] %vm368_vm4, %v4107_v0  ;;  %450 = vst.msk [vmem:[#allocation2 + $0x298] sm:$0x3] %vm368_vm4, %v4107_v0  ;;  %711 = vrot.lane.b32.xlu0 %v523_v63, %s4108_s25 }
  0x9e   : > { %453 = vst.msk [vmem:[#allocation2 + $0x2b0] sm:$0x3] %vm368_vm4, %v4107_v0  ;;  %456 = vst.msk [vmem:[#allocation2 + $0x2c8] sm:$0x3] %vm368_vm4, %v4107_v0 }
  0x9f   : > { %459 = vst.msk [vmem:[#allocation2 + $0x2e0] sm:$0x3] %vm368_vm4, %v4107_v0  ;;  %462 = vst.msk [vmem:[#allocation2 + $0x2f8] sm:$0x3] %vm368_vm4, %v4107_v0  ;;  %v524_v0 = vld [vmem:[%s4692_s24 + $0x1e8] sm:$0xff]  ;;  %v600_v5 = vpop.permute.xlu0 %599  ;;  %v602_v6 = vpop.permute.xlu1 %601 }
  0xa0   : > { %786 = vst.msk [vmem:[#allocation2 + $0x19] sm:$0xff] %vm783_vm5, %v596_v61  ;;  %784 = vst.msk [vmem:[#allocation2 + $0x1] sm:$0xff] %vm783_vm5, %v592_v62  ;;  %713 = vrot.lane.b32.xlu1 %v524_v0, %s4108_s25 }
  0xa1   : > { %787 = vst.msk [vmem:[#allocation2 + $0x21] sm:$0xff] %vm783_vm5, %v598_v1  ;;  %785 = vst.msk [vmem:[#allocation2 + $0x9] sm:$0xff] %vm783_vm5, %v594_v2  ;;  %715 = vrot.lane.b32.xlu0 %v525_v3, %s4108_s25 }
  0xa2   : > { %788 = vst.msk [vmem:[#allocation2 + $0x31] sm:$0xff] %vm783_vm5, %v600_v5  ;;  %789 = vst.msk [vmem:[#allocation2 + $0x39] sm:$0xff] %vm783_vm5, %v602_v6 }
  0xa3   : > { %v604_v9 = vpop.permute.xlu0 %603  ;;  %v606_v10 = vpop.permute.xlu1 %605 }
  0xa4   : > { %717 = vrot.lane.b32.xlu1 %v526_v4, %s4108_s25  ;;  %790 = vst.msk [vmem:[#allocation2 + $0x49] sm:$0xff] %vm783_vm5, %v604_v9  ;;  %791 = vst.msk [vmem:[#allocation2 + $0x51] sm:$0xff] %vm783_vm5, %v606_v10 }
  0xa7   : > { %v4826_v7 = vld [vmem:[#allocation2] sm:$0xff]  ;;  %v4840_v14 = vld [vmem:[#allocation2 + $0x18] sm:$0xff]  ;;  %v608_v16 = vpop.permute.xlu0 %607  ;;  %v610_v17 = vpop.permute.xlu1 %609 }
  0xa8   : > { %v1044_v11 = vmul.f32 %v4828_v8, %v4826_v7  ;;  %v4834_v12 = vld [vmem:[#allocation2 + $0x8] sm:$0xff]  ;;  %v4843_v15 = vld [vmem:[#allocation2 + $0x20] sm:$0xff]  ;;  %v1046_v18 = vmul.f32 %v4828_v8, %v4840_v14  ;;  %792 = vst.msk [vmem:[#allocation2 + $0x61] sm:$0xff] %vm783_vm5, %v608_v16  ;;  %793 = vst.msk [vmem:[#allocation2 + $0x69] sm:$0xff] %vm783_vm5, %v610_v17 }
  0xa9   : > { %v1045_v13 = vmul.f32 %v4828_v8, %v4834_v12  ;;  %v1047_v19 = vmul.f32 %v4828_v8, %v4843_v15  ;;  %v4852_v20 = vld [vmem:[#allocation2 + $0x30] sm:$0xff]  ;;  %v4855_v21 = vld [vmem:[#allocation2 + $0x38] sm:$0xff] }
  0xaa   : > { %1172 = vrot.lane.b32.xlu0 %v1044_v11, %s4109_s27  ;;  %v1048_v24 = vmul.f32 %v4828_v8, %v4852_v20  ;;  %v1049_v25 = vmul.f32 %v4828_v8, %v4855_v21 }
  0xab   : > { %1174 = vrot.lane.b32.xlu1 %v1045_v13, %s4109_s27  ;;  %v612_v22 = vpop.permute.xlu0 %611  ;;  %v614_v23 = vpop.permute.xlu1 %613  ;;  %v4864_v26 = vld [vmem:[#allocation2 + $0x48] sm:$0xff]  ;;  %v4867_v27 = vld [vmem:[#allocation2 + $0x50] sm:$0xff] }
  0xac   : > { %794 = vst.msk [vmem:[#allocation2 + $0x79] sm:$0xff] %vm783_vm5, %v612_v22  ;;  %795 = vst.msk [vmem:[#allocation2 + $0x81] sm:$0xff] %vm783_vm5, %v614_v23  ;;  %v1050_v30 = vmul.f32 %v4828_v8, %v4864_v26  ;;  %v1051_v31 = vmul.f32 %v4828_v8, %v4867_v27 }
  0xae   : > { %1176 = vrot.lane.b32.xlu0 %v1046_v18, %s4109_s27 }
  0xaf   : > { %1178 = vrot.lane.b32.xlu1 %v1047_v19, %s4109_s27  ;;  %v616_v28 = vpop.permute.xlu0 %615  ;;  %v618_v29 = vpop.permute.xlu1 %617  ;;  %v4876_v32 = vld [vmem:[#allocation2 + $0x60] sm:$0xff]  ;;  %v4879_v33 = vld [vmem:[#allocation2 + $0x68] sm:$0xff] }
  0xb0   : > { %796 = vst.msk [vmem:[#allocation2 + $0x91] sm:$0xff] %vm783_vm5, %v616_v28  ;;  %797 = vst.msk [vmem:[#allocation2 + $0x99] sm:$0xff] %vm783_vm5, %v618_v29  ;;  %v1052_v36 = vmul.f32 %v4828_v8, %v4876_v32  ;;  %v1053_v37 = vmul.f32 %v4828_v8, %v4879_v33 }
  0xb2   : > { %1180 = vrot.lane.b32.xlu0 %v1048_v24, %s4109_s27 }
  0xb3   : > { %1182 = vrot.lane.b32.xlu1 %v1049_v25, %s4109_s27  ;;  %v620_v34 = vpop.permute.xlu0 %619  ;;  %v622_v35 = vpop.permute.xlu1 %621  ;;  %v4888_v38 = vld [vmem:[#allocation2 + $0x78] sm:$0xff]  ;;  %v4891_v39 = vld [vmem:[#allocation2 + $0x80] sm:$0xff] }
  0xb4   : > { %798 = vst.msk [vmem:[#allocation2 + $0xa9] sm:$0xff] %vm783_vm5, %v620_v34  ;;  %799 = vst.msk [vmem:[#allocation2 + $0xb1] sm:$0xff] %vm783_vm5, %v622_v35  ;;  %v1054_v42 = vmul.f32 %v4828_v8, %v4888_v38  ;;  %v1055_v43 = vmul.f32 %v4828_v8, %v4891_v39 }
  0xb6   : > { %1184 = vrot.lane.b32.xlu0 %v1050_v30, %s4109_s27 }
  0xb7   : > { %1186 = vrot.lane.b32.xlu1 %v1051_v31, %s4109_s27  ;;  %v624_v40 = vpop.permute.xlu0 %623  ;;  %v626_v41 = vpop.permute.xlu1 %625  ;;  %v4900_v44 = vld [vmem:[#allocation2 + $0x90] sm:$0xff]  ;;  %v4903_v45 = vld [vmem:[#allocation2 + $0x98] sm:$0xff] }
  0xb8   : > { %800 = vst.msk [vmem:[#allocation2 + $0xc1] sm:$0xff] %vm783_vm5, %v624_v40  ;;  %801 = vst.msk [vmem:[#allocation2 + $0xc9] sm:$0xff] %vm783_vm5, %v626_v41  ;;  %v1056_v48 = vmul.f32 %v4828_v8, %v4900_v44  ;;  %v1057_v49 = vmul.f32 %v4828_v8, %v4903_v45 }
  0xba   : > { %1188 = vrot.lane.b32.xlu0 %v1052_v36, %s4109_s27 }
  0xbb   : > { %1190 = vrot.lane.b32.xlu1 %v1053_v37, %s4109_s27  ;;  %v628_v46 = vpop.permute.xlu0 %627  ;;  %v630_v47 = vpop.permute.xlu1 %629  ;;  %v4912_v50 = vld [vmem:[#allocation2 + $0xa8] sm:$0xff]  ;;  %v4915_v51 = vld [vmem:[#allocation2 + $0xb0] sm:$0xff] }
  0xbc   : > { %802 = vst.msk [vmem:[#allocation2 + $0xd9] sm:$0xff] %vm783_vm5, %v628_v46  ;;  %803 = vst.msk [vmem:[#allocation2 + $0xe1] sm:$0xff] %vm783_vm5, %v630_v47  ;;  %v1058_v54 = vmul.f32 %v4828_v8, %v4912_v50  ;;  %v1059_v55 = vmul.f32 %v4828_v8, %v4915_v51 }
  0xbe   : > { %1192 = vrot.lane.b32.xlu0 %v1054_v42, %s4109_s27 }
  0xbf   : > { %1194 = vrot.lane.b32.xlu1 %v1055_v43, %s4109_s27  ;;  %v632_v52 = vpop.permute.xlu0 %631  ;;  %v634_v53 = vpop.permute.xlu1 %633  ;;  %v4924_v56 = vld [vmem:[#allocation2 + $0xc0] sm:$0xff]  ;;  %v4927_v57 = vld [vmem:[#allocation2 + $0xc8] sm:$0xff] }
  0xc0   : > { %804 = vst.msk [vmem:[#allocation2 + $0xf1] sm:$0xff] %vm783_vm5, %v632_v52  ;;  %805 = vst.msk [vmem:[#allocation2 + $0xf9] sm:$0xff] %vm783_vm5, %v634_v53  ;;  %v1060_v60 = vmul.f32 %v4828_v8, %v4924_v56  ;;  %v1061_v61 = vmul.f32 %v4828_v8, %v4927_v57 }
  0xc2   : > { %1196 = vrot.lane.b32.xlu0 %v1056_v48, %s4109_s27 }
  0xc3   : > { %1198 = vrot.lane.b32.xlu1 %v1057_v49, %s4109_s27  ;;  %v636_v58 = vpop.permute.xlu0 %635  ;;  %v638_v59 = vpop.permute.xlu1 %637  ;;  %v4936_v62 = vld [vmem:[#allocation2 + $0xd8] sm:$0xff]  ;;  %v4939_v63 = vld [vmem:[#allocation2 + $0xe0] sm:$0xff] }
  0xc4   : > { %806 = vst.msk [vmem:[#allocation2 + $0x109] sm:$0xff] %vm783_vm5, %v636_v58  ;;  %807 = vst.msk [vmem:[#allocation2 + $0x111] sm:$0xff] %vm783_vm5, %v638_v59  ;;  %v1062_v2 = vmul.f32 %v4828_v8, %v4936_v62  ;;  %v1063_v3 = vmul.f32 %v4828_v8, %v4939_v63 }
  0xc6   : > { %1200 = vrot.lane.b32.xlu0 %v1058_v54, %s4109_s27 }
  0xc7   : > { %1202 = vrot.lane.b32.xlu1 %v1059_v55, %s4109_s27  ;;  %v640_v0 = vpop.permute.xlu0 %639  ;;  %v642_v1 = vpop.permute.xlu1 %641  ;;  %v4948_v4 = vld [vmem:[#allocation2 + $0xf0] sm:$0xff]  ;;  %v4951_v5 = vld [vmem:[#allocation2 + $0xf8] sm:$0xff] }
  0xc8   : > { %808 = vst.msk [vmem:[#allocation2 + $0x121] sm:$0xff] %vm783_vm5, %v640_v0  ;;  %809 = vst.msk [vmem:[#allocation2 + $0x129] sm:$0xff] %vm783_vm5, %v642_v1  ;;  %v1064_v10 = vmul.f32 %v4828_v8, %v4948_v4  ;;  %v1065_v11 = vmul.f32 %v4828_v8, %v4951_v5 }
  0xca   : > { %1204 = vrot.lane.b32.xlu0 %v1060_v60, %s4109_s27 }
  0xcb   : > { %1206 = vrot.lane.b32.xlu1 %v1061_v61, %s4109_s27  ;;  %v644_v6 = vpop.permute.xlu0 %643  ;;  %v646_v9 = vpop.permute.xlu1 %645  ;;  %v4960_v13 = vld [vmem:[#allocation2 + $0x108] sm:$0xff]  ;;  %v4963_v16 = vld [vmem:[#allocation2 + $0x110] sm:$0xff] }
  0xcc   : > { %810 = vst.msk [vmem:[#allocation2 + $0x139] sm:$0xff] %vm783_vm5, %v644_v6  ;;  %811 = vst.msk [vmem:[#allocation2 + $0x141] sm:$0xff] %vm783_vm5, %v646_v9  ;;  %v1066_v19 = vmul.f32 %v4828_v8, %v4960_v13  ;;  %v1067_v22 = vmul.f32 %v4828_v8, %v4963_v16 }
  0xce   : > { %1208 = vrot.lane.b32.xlu0 %v1062_v2, %s4109_s27 }
  0xcf   : > { %1210 = vrot.lane.b32.xlu1 %v1063_v3, %s4109_s27  ;;  %v648_v17 = vpop.permute.xlu0 %647  ;;  %v650_v18 = vpop.permute.xlu1 %649  ;;  %v4972_v23 = vld [vmem:[#allocation2 + $0x120] sm:$0xff]  ;;  %v4975_v24 = vld [vmem:[#allocation2 + $0x128] sm:$0xff] }
  0xd0   : > { %812 = vst.msk [vmem:[#allocation2 + $0x151] sm:$0xff] %vm783_vm5, %v648_v17  ;;  %813 = vst.msk [vmem:[#allocation2 + $0x159] sm:$0xff] %vm783_vm5, %v650_v18  ;;  %v1068_v29 = vmul.f32 %v4828_v8, %v4972_v23  ;;  %v1069_v30 = vmul.f32 %v4828_v8, %v4975_v24 }
  0xd2   : > { %1212 = vrot.lane.b32.xlu0 %v1064_v10, %s4109_s27 }
  0xd3   : > { %1214 = vrot.lane.b32.xlu1 %v1065_v11, %s4109_s27  ;;  %v652_v25 = vpop.permute.xlu0 %651  ;;  %v654_v28 = vpop.permute.xlu1 %653  ;;  %v4984_v31 = vld [vmem:[#allocation2 + $0x138] sm:$0xff]  ;;  %v4987_v34 = vld [vmem:[#allocation2 + $0x140] sm:$0xff] }
  0xd4   : > { %814 = vst.msk [vmem:[#allocation2 + $0x169] sm:$0xff] %vm783_vm5, %v652_v25  ;;  %815 = vst.msk [vmem:[#allocation2 + $0x171] sm:$0xff] %vm783_vm5, %v654_v28  ;;  %v1070_v37 = vmul.f32 %v4828_v8, %v4984_v31  ;;  %v1071_v40 = vmul.f32 %v4828_v8, %v4987_v34 }
  0xd6   : > { %1216 = vrot.lane.b32.xlu0 %v1066_v19, %s4109_s27 }
  0xd7   : > { %1218 = vrot.lane.b32.xlu1 %v1067_v22, %s4109_s27  ;;  %v656_v35 = vpop.permute.xlu0 %655  ;;  %v658_v36 = vpop.permute.xlu1 %657  ;;  %v4996_v41 = vld [vmem:[#allocation2 + $0x150] sm:$0xff]  ;;  %v4999_v42 = vld [vmem:[#allocation2 + $0x158] sm:$0xff] }
  0xd8   : > { %816 = vst.msk [vmem:[#allocation2 + $0x181] sm:$0xff] %vm783_vm5, %v656_v35  ;;  %817 = vst.msk [vmem:[#allocation2 + $0x189] sm:$0xff] %vm783_vm5, %v658_v36  ;;  %v1072_v47 = vmul.f32 %v4828_v8, %v4996_v41  ;;  %v1073_v48 = vmul.f32 %v4828_v8, %v4999_v42 }
  0xda   : > { %1220 = vrot.lane.b32.xlu0 %v1068_v29, %s4109_s27 }
  0xdb   : > { %1222 = vrot.lane.b32.xlu1 %v1069_v30, %s4109_s27  ;;  %v660_v43 = vpop.permute.xlu0 %659  ;;  %v662_v46 = vpop.permute.xlu1 %661  ;;  %v5008_v49 = vld [vmem:[#allocation2 + $0x168] sm:$0xff]  ;;  %v5011_v52 = vld [vmem:[#allocation2 + $0x170] sm:$0xff] }
  0xdc   : > { %818 = vst.msk [vmem:[#allocation2 + $0x199] sm:$0xff] %vm783_vm5, %v660_v43  ;;  %819 = vst.msk [vmem:[#allocation2 + $0x1a1] sm:$0xff] %vm783_vm5, %v662_v46  ;;  %v1074_v55 = vmul.f32 %v4828_v8, %v5008_v49  ;;  %v1075_v58 = vmul.f32 %v4828_v8, %v5011_v52 }
  0xde   : > { %1224 = vrot.lane.b32.xlu0 %v1070_v37, %s4109_s27 }
  0xdf   : > { %1226 = vrot.lane.b32.xlu1 %v1071_v40, %s4109_s27  ;;  %v664_v53 = vpop.permute.xlu0 %663  ;;  %v666_v54 = vpop.permute.xlu1 %665  ;;  %v5020_v59 = vld [vmem:[#allocation2 + $0x180] sm:$0xff]  ;;  %v5023_v60 = vld [vmem:[#allocation2 + $0x188] sm:$0xff] }
  0xe0   : > { %820 = vst.msk [vmem:[#allocation2 + $0x1b1] sm:$0xff] %vm783_vm5, %v664_v53  ;;  %821 = vst.msk [vmem:[#allocation2 + $0x1b9] sm:$0xff] %vm783_vm5, %v666_v54  ;;  %v1076_v1 = vmul.f32 %v4828_v8, %v5020_v59  ;;  %v1077_v2 = vmul.f32 %v4828_v8, %v5023_v60 }
  0xe2   : > { %1228 = vrot.lane.b32.xlu0 %v1072_v47, %s4109_s27 }
  0xe3   : > { %1230 = vrot.lane.b32.xlu1 %v1073_v48, %s4109_s27  ;;  %v668_v61 = vpop.permute.xlu0 %667  ;;  %v670_v0 = vpop.permute.xlu1 %669  ;;  %v5032_v3 = vld [vmem:[#allocation2 + $0x198] sm:$0xff]  ;;  %v5035_v6 = vld [vmem:[#allocation2 + $0x1a0] sm:$0xff] }
  0xe4   : > { %822 = vst.msk [vmem:[#allocation2 + $0x1c9] sm:$0xff] %vm783_vm5, %v668_v61  ;;  %823 = vst.msk [vmem:[#allocation2 + $0x1d1] sm:$0xff] %vm783_vm5, %v670_v0  ;;  %v1078_v11 = vmul.f32 %v4828_v8, %v5032_v3  ;;  %v1079_v17 = vmul.f32 %v4828_v8, %v5035_v6 }
  0xe6   : > { %1232 = vrot.lane.b32.xlu0 %v1074_v55, %s4109_s27 }
  0xe7   : > { %1234 = vrot.lane.b32.xlu1 %v1075_v58, %s4109_s27  ;;  %v672_v9 = vpop.permute.xlu0 %671  ;;  %v674_v10 = vpop.permute.xlu1 %673  ;;  %v5044_v18 = vld [vmem:[#allocation2 + $0x1b0] sm:$0xff]  ;;  %v5047_v19 = vld [vmem:[#allocation2 + $0x1b8] sm:$0xff] }
  0xe8   : > { %824 = vst.msk [vmem:[#allocation2 + $0x1e1] sm:$0xff] %vm783_vm5, %v672_v9  ;;  %825 = vst.msk [vmem:[#allocation2 + $0x1e9] sm:$0xff] %vm783_vm5, %v674_v10  ;;  %v1080_v28 = vmul.f32 %v4828_v8, %v5044_v18  ;;  %v1081_v29 = vmul.f32 %v4828_v8, %v5047_v19 }
  0xea   : > { %1236 = vrot.lane.b32.xlu0 %v1076_v1, %s4109_s27 }
  0xeb   : > { %1238 = vrot.lane.b32.xlu1 %v1077_v2, %s4109_s27  ;;  %v676_v22 = vpop.permute.xlu0 %675  ;;  %v678_v25 = vpop.permute.xlu1 %677  ;;  %v5056_v30 = vld [vmem:[#allocation2 + $0x1c8] sm:$0xff]  ;;  %v5059_v35 = vld [vmem:[#allocation2 + $0x1d0] sm:$0xff] }
  0xec   : > { %826 = vst.msk [vmem:[#allocation2 + $0x1f9] sm:$0xff] %vm783_vm5, %v676_v22  ;;  %827 = vst.msk [vmem:[#allocation2 + $0x201] sm:$0xff] %vm783_vm5, %v678_v25  ;;  %v1082_v40 = vmul.f32 %v4828_v8, %v5056_v30  ;;  %v1083_v43 = vmul.f32 %v4828_v8, %v5059_v35 }
  0xee   : > { %1240 = vrot.lane.b32.xlu0 %v1078_v11, %s4109_s27 }
  0xef   : > { %1242 = vrot.lane.b32.xlu1 %v1079_v17, %s4109_s27  ;;  %v680_v36 = vpop.permute.xlu0 %679  ;;  %v682_v37 = vpop.permute.xlu1 %681  ;;  %v5068_v46 = vld [vmem:[#allocation2 + $0x1e0] sm:$0xff]  ;;  %v5071_v47 = vld [vmem:[#allocation2 + $0x1e8] sm:$0xff] }
  0xf0   : > { %828 = vst.msk [vmem:[#allocation2 + $0x211] sm:$0xff] %vm783_vm5, %v680_v36  ;;  %829 = vst.msk [vmem:[#allocation2 + $0x219] sm:$0xff] %vm783_vm5, %v682_v37  ;;  %v1084_v54 = vmul.f32 %v4828_v8, %v5068_v46  ;;  %v1085_v55 = vmul.f32 %v4828_v8, %v5071_v47 }
  0xf2   : > { %1244 = vrot.lane.b32.xlu0 %v1080_v28, %s4109_s27 }
  0xf3   : > { %1246 = vrot.lane.b32.xlu1 %v1081_v29, %s4109_s27  ;;  %v684_v48 = vpop.permute.xlu0 %683  ;;  %v686_v53 = vpop.permute.xlu1 %685  ;;  %v5080_v58 = vld [vmem:[#allocation2 + $0x1f8] sm:$0xff]  ;;  %v5083_v61 = vld [vmem:[#allocation2 + $0x200] sm:$0xff] }
  0xf4   : > { %830 = vst.msk [vmem:[#allocation2 + $0x229] sm:$0xff] %vm783_vm5, %v684_v48  ;;  %831 = vst.msk [vmem:[#allocation2 + $0x231] sm:$0xff] %vm783_vm5, %v686_v53  ;;  %v1086_v2 = vmul.f32 %v4828_v8, %v5080_v58  ;;  %v1087_v9 = vmul.f32 %v4828_v8, %v5083_v61 }
  0xf6   : > { %1248 = vrot.lane.b32.xlu0 %v1082_v40, %s4109_s27 }
  0xf7   : > { %1250 = vrot.lane.b32.xlu1 %v1083_v43, %s4109_s27  ;;  %v688_v0 = vpop.permute.xlu0 %687  ;;  %v690_v1 = vpop.permute.xlu1 %689  ;;  %v5092_v10 = vld [vmem:[#allocation2 + $0x210] sm:$0xff]  ;;  %v5095_v11 = vld [vmem:[#allocation2 + $0x218] sm:$0xff] }
  0xf8   : > { %832 = vst.msk [vmem:[#allocation2 + $0x241] sm:$0xff] %vm783_vm5, %v688_v0  ;;  %833 = vst.msk [vmem:[#allocation2 + $0x249] sm:$0xff] %vm783_vm5, %v690_v1  ;;  %v1088_v25 = vmul.f32 %v4828_v8, %v5092_v10  ;;  %v1089_v28 = vmul.f32 %v4828_v8, %v5095_v11 }
  0xfa   : > { %1252 = vrot.lane.b32.xlu0 %v1084_v54, %s4109_s27 }
  0xfb   : > { %1254 = vrot.lane.b32.xlu1 %v1085_v55, %s4109_s27  ;;  %v692_v17 = vpop.permute.xlu0 %691  ;;  %v694_v22 = vpop.permute.xlu1 %693  ;;  %v5104_v29 = vld [vmem:[#allocation2 + $0x228] sm:$0xff]  ;;  %v5107_v36 = vld [vmem:[#allocation2 + $0x230] sm:$0xff] }
  0xfc   : > { %834 = vst.msk [vmem:[#allocation2 + $0x259] sm:$0xff] %vm783_vm5, %v692_v17  ;;  %835 = vst.msk [vmem:[#allocation2 + $0x261] sm:$0xff] %vm783_vm5, %v694_v22  ;;  %v1090_v43 = vmul.f32 %v4828_v8, %v5104_v29  ;;  %v1091_v48 = vmul.f32 %v4828_v8, %v5107_v36 }
  0xfe   : > { %1256 = vrot.lane.b32.xlu0 %v1086_v2, %s4109_s27 }
  0xff   : > { %1258 = vrot.lane.b32.xlu1 %v1087_v9, %s4109_s27  ;;  %v696_v37 = vpop.permute.xlu0 %695  ;;  %v698_v40 = vpop.permute.xlu1 %697  ;;  %v5116_v53 = vld [vmem:[#allocation2 + $0x240] sm:$0xff]  ;;  %v5119_v54 = vld [vmem:[#allocation2 + $0x248] sm:$0xff] }
 0x100   : > { %836 = vst.msk [vmem:[#allocation2 + $0x271] sm:$0xff] %vm783_vm5, %v696_v37  ;;  %837 = vst.msk [vmem:[#allocation2 + $0x279] sm:$0xff] %vm783_vm5, %v698_v40  ;;  %v1092_v1 = vmul.f32 %v4828_v8, %v5116_v53  ;;  %v1093_v2 = vmul.f32 %v4828_v8, %v5119_v54 }
 0x102   : > { %1260 = vrot.lane.b32.xlu0 %v1088_v25, %s4109_s27 }
 0x103   : > { %1262 = vrot.lane.b32.xlu1 %v1089_v28, %s4109_s27  ;;  %v700_v55 = vpop.permute.xlu0 %699  ;;  %v702_v0 = vpop.permute.xlu1 %701  ;;  %v5128_v9 = vld [vmem:[#allocation2 + $0x258] sm:$0xff]  ;;  %v5131_v17 = vld [vmem:[#allocation2 + $0x260] sm:$0xff] }
 0x104   : > { %838 = vst.msk [vmem:[#allocation2 + $0x289] sm:$0xff] %vm783_vm5, %v700_v55  ;;  %839 = vst.msk [vmem:[#allocation2 + $0x291] sm:$0xff] %vm783_vm5, %v702_v0  ;;  %v1094_v28 = vmul.f32 %v4828_v8, %v5128_v9  ;;  %v1095_v37 = vmul.f32 %v4828_v8, %v5131_v17 }
 0x106   : > { %1264 = vrot.lane.b32.xlu0 %v1090_v43, %s4109_s27 }
 0x107   : > { %1266 = vrot.lane.b32.xlu1 %v1091_v48, %s4109_s27  ;;  %v704_v22 = vpop.permute.xlu0 %703  ;;  %v706_v25 = vpop.permute.xlu1 %705  ;;  %v5140_v40 = vld [vmem:[#allocation2 + $0x270] sm:$0xff]  ;;  %v5143_v43 = vld [vmem:[#allocation2 + $0x278] sm:$0xff] }
 0x108   : > { %840 = vst.msk [vmem:[#allocation2 + $0x2a1] sm:$0xff] %vm783_vm5, %v704_v22  ;;  %841 = vst.msk [vmem:[#allocation2 + $0x2a9] sm:$0xff] %vm783_vm5, %v706_v25  ;;  %v1096_v0 = vmul.f32 %v4828_v8, %v5140_v40 }
 0x109   : > { %7915 = vst [vmem:[#allocation6_spill] sm:$0xff] %v5143_v43 }
 0x10a   : > { %1268 = vrot.lane.b32.xlu0 %v1092_v1, %s4109_s27  ;;  %v1097_v1 = vmul.f32 %v4828_v8, %v5143_v43 }
 0x10b   : > { %1270 = vrot.lane.b32.xlu1 %v1093_v2, %s4109_s27  ;;  %v708_v48 = vpop.permute.xlu0 %707  ;;  %v710_v55 = vpop.permute.xlu1 %709  ;;  %v5152_v2 = vld [vmem:[#allocation2 + $0x288] sm:$0xff]  ;;  %v5155_v22 = vld [vmem:[#allocation2 + $0x290] sm:$0xff] }
 0x10c   : > { %842 = vst.msk [vmem:[#allocation2 + $0x2b9] sm:$0xff] %vm783_vm5, %v708_v48  ;;  %843 = vst.msk [vmem:[#allocation2 + $0x2c1] sm:$0xff] %vm783_vm5, %v710_v55  ;;  %v1099_v48 = vmul.f32 %v4828_v8, %v5155_v22 }
 0x10d   : > { %7916 = vst [vmem:[#allocation7_spill] sm:$0xff] %v5152_v2  ;;  %7917 = vst [vmem:[#allocation8_spill] sm:$0xff] %v5155_v22 }
 0x10e   : > { %1272 = vrot.lane.b32.xlu0 %v1094_v28, %s4109_s27 }
 0x10f   : > { %1274 = vrot.lane.b32.xlu1 %v1095_v37, %s4109_s27  ;;  %v712_v25 = vpop.permute.xlu0 %711  ;;  %v1098_v37 = vmul.f32 %v4828_v8, %v5152_v2  ;;  %v5164_v55 = vld [vmem:[#allocation2 + $0x2a0] sm:$0xff] }
 0x110   : > { %844 = vst.msk [vmem:[#allocation2 + $0x2d1] sm:$0xff] %vm783_vm5, %v712_v25  ;;  %7918 = vst [vmem:[#allocation9_spill] sm:$0xff] %v5164_v55  ;;  %v1100_v2 = vmul.f32 %v4828_v8, %v5164_v55 }
 0x112   : > { %1276 = vrot.lane.b32.xlu0 %v1096_v0, %s4109_s27  ;;  %v714_v28 = vpop.permute.xlu1 %713  ;;  %v5167_v0 = vld [vmem:[#allocation2 + $0x2a8] sm:$0xff] }
 0x113   : > { %1278 = vrot.lane.b32.xlu1 %v1097_v1, %s4109_s27  ;;  %845 = vst.msk [vmem:[#allocation2 + $0x2d9] sm:$0xff] %vm783_vm5, %v714_v28  ;;  %7919 = vst [vmem:[#allocation10_spill] sm:$0xff] %v5167_v0  ;;  %v716_v1 = vpop.permute.xlu0 %715  ;;  %v1101_v25 = vmul.f32 %v4828_v8, %v5167_v0  ;;  %v5176_v28 = vld [vmem:[#allocation2 + $0x2b8] sm:$0xff] }
 0x114   : > { %846 = vst.msk [vmem:[#allocation2 + $0x2e9] sm:$0xff] %vm783_vm5, %v716_v1  ;;  %7920 = vst [vmem:[#allocation11_spill] sm:$0xff] %v5176_v28  ;;  %v1102_v55 = vmul.f32 %v4828_v8, %v5176_v28 }
 0x116   : > { %1280 = vrot.lane.b32.xlu0 %v1098_v37, %s4109_s27  ;;  %v718_v43 = vpop.permute.xlu1 %717  ;;  %v5179_v37 = vld [vmem:[#allocation2 + $0x2c0] sm:$0xff] }
 0x117   : > { %1282 = vrot.lane.b32.xlu1 %v1099_v48, %s4109_s27  ;;  %847 = vst.msk [vmem:[#allocation2 + $0x2f1] sm:$0xff] %vm783_vm5, %v718_v43  ;;  %7921 = vst [vmem:[#allocation12_spill] sm:$0xff] %v5179_v37  ;;  %v1103_v43 = vmul.f32 %v4828_v8, %v5179_v37  ;;  %v5190_v1 = vld [vmem:[#allocation2 + $0x2d0] sm:$0xff] }
 0x118   : > { %7924 = vst [vmem:[#allocation15_spill] sm:$0xff] %v5190_v1 }
 0x11a   : > { %1284 = vrot.lane.b32.xlu0 %v1100_v2, %s4109_s27  ;;  %v5193_v2 = vld [vmem:[#allocation2 + $0x2d8] sm:$0xff] }
 0x11b   : > { %1286 = vrot.lane.b32.xlu1 %v1101_v25, %s4109_s27  ;;  %v5204_v37 = vld [vmem:[#allocation2 + $0x2e8] sm:$0xff] }
 0x11c   : > { %v5182_v48 = vpop.permute.xlu0 %1172  ;;  %7927 = vst [vmem:[#allocation18_spill] sm:$0xff] %v5204_v37 }
 0x11d   : > { %7922 = vst [vmem:[#allocation13_spill] sm:$0xff] %v5182_v48  ;;  %v5186_v22 = vpop.permute.xlu1 %1174  ;;  %v1104_v48 = vmul.f32 %v4828_v8, %v5190_v1 }
 0x11e   : > { %7923 = vst [vmem:[#allocation14_spill] sm:$0xff] %v5186_v22  ;;  %1288 = vrot.lane.b32.xlu0 %v1102_v55, %s4109_s27  ;;  %v1105_v22 = vmul.f32 %v4828_v8, %v5193_v2  ;;  %v5207_v0 = vld [vmem:[#allocation2 + $0x2f0] sm:$0xff] }
 0x11f   : > { %1290 = vrot.lane.b32.xlu1 %v1103_v43, %s4109_s27  ;;  %v1106_v43 = vmul.f32 %v4828_v8, %v5204_v37  ;;  %v1107_v1 = vmul.f32 %v4828_v8, %v5207_v0 }
 0x120   : > { %v5196_v25 = vpop.permute.xlu0 %1176 }
 0x121   : > { %7925 = vst [vmem:[#allocation16_spill] sm:$0xff] %v5196_v25  ;;  %v5200_v28 = vpop.permute.xlu1 %1178 }
 0x122   : > { %7926 = vst [vmem:[#allocation17_spill] sm:$0xff] %v5200_v28  ;;  %1292 = vrot.lane.b32.xlu0 %v1104_v48, %s4109_s27  ;;  %v5218_v28 = vstv %s3931_s28 }
 0x123   : > { %1294 = vrot.lane.b32.xlu1 %v1105_v22, %s4109_s27  ;;  %v1430_v22 = vmul.f32 %v5218_v28, %v4826_v7  ;;  %v1431_v37 = vmul.f32 %v5218_v28, %v4834_v12 }
 0x124   : > { %v5210_v55 = vpop.permute.xlu0 %1180 }
 0x125   : > { %7928 = vst [vmem:[#allocation19_spill] sm:$0xff] %v5210_v55  ;;  %v5214_v25 = vpop.permute.xlu1 %1182 }
 0x126   : > { %1296 = vrot.lane.b32.xlu0 %v1106_v43, %s4109_s27 }
 0x127   : > { %1298 = vrot.lane.b32.xlu1 %v1107_v1, %s4109_s27  ;;  %v1432_v1 = vmul.f32 %v5218_v28, %v4840_v14 }
 0x128   : > { %v5222_v48 = vpop.permute.xlu0 %1184 }
 0x129   : > { %7929 = vst [vmem:[#allocation20_spill] sm:$0xff] %v5222_v48  ;;  %v5226_v55 = vpop.permute.xlu1 %1186  ;;  %v1433_v48 = vmul.f32 %v5218_v28, %v4843_v15 }
 0x12a   : > { %7930 = vst [vmem:[#allocation21_spill] sm:$0xff] %v5226_v55  ;;  %1558 = vrot.lane.b32.xlu0 %v1430_v22, %s4110_s29  ;;  %v1434_v22 = vmul.f32 %v5218_v28, %v4852_v20 }
 0x12b   : > { %1560 = vrot.lane.b32.xlu1 %v1431_v37, %s4110_s29 }
 0x12c   : > { %v5232_v8 = vpop.permute.xlu0 %1188 }
 0x12d   : > { %7931 = vst [vmem:[#allocation22_spill] sm:$0xff] %v5232_v8  ;;  %v5236_v43 = vpop.permute.xlu1 %1190  ;;  %v1435_v8 = vmul.f32 %v5218_v28, %v4855_v21 }
 0x12e   : > { %7932 = vst [vmem:[#allocation23_spill] sm:$0xff] %v5236_v43  ;;  %1562 = vrot.lane.b32.xlu0 %v1432_v1, %s4110_s29  ;;  %v1436_v1 = vmul.f32 %v5218_v28, %v4864_v26 }
 0x12f   : > { %1564 = vrot.lane.b32.xlu1 %v1433_v48, %s4110_s29 }
 0x130   : > { %v5242_v55 = vpop.permute.xlu0 %1192 }
 0x131   : > { %7933 = vst [vmem:[#allocation24_spill] sm:$0xff] %v5242_v55  ;;  %v5246_v37 = vpop.permute.xlu1 %1194  ;;  %v1437_v55 = vmul.f32 %v5218_v28, %v4867_v27  ;;  %v1440_v27 = vmul.f32 %v5218_v28, %v4888_v38 }
 0x132   : > { %7934 = vst [vmem:[#allocation25_spill] sm:$0xff] %v5246_v37  ;;  %1566 = vrot.lane.b32.xlu0 %v1434_v22, %s4110_s29  ;;  %v1438_v22 = vmul.f32 %v5218_v28, %v4876_v32 }
 0x133   : > { %1568 = vrot.lane.b32.xlu1 %v1435_v8, %s4110_s29 }
 0x134   : > { %v5252_v43 = vpop.permute.xlu0 %1196 }
 0x135   : > { %7935 = vst [vmem:[#allocation26_spill] sm:$0xff] %v5252_v43  ;;  %v5256_v48 = vpop.permute.xlu1 %1198  ;;  %v1439_v43 = vmul.f32 %v5218_v28, %v4879_v33  ;;  %v1442_v33 = vmul.f32 %v5218_v28, %v4900_v44 }
 0x136   : > { %1570 = vrot.lane.b32.xlu0 %v1436_v1, %s4110_s29  ;;  %v1441_v1 = vmul.f32 %v5218_v28, %v4891_v39  ;;  %v1444_v39 = vmul.f32 %v5218_v28, %v4912_v50 }
 0x137   : > { %1572 = vrot.lane.b32.xlu1 %v1437_v55, %s4110_s29 }
 0x138   : > { %v5262_v37 = vpop.permute.xlu0 %1200 }
 0x139   : > { %v5266_v8 = vpop.permute.xlu1 %1202 }
 0x13a   : > { %1574 = vrot.lane.b32.xlu0 %v1438_v22, %s4110_s29  ;;  %v1443_v22 = vmul.f32 %v5218_v28, %v4903_v45  ;;  %v1446_v45 = vmul.f32 %v5218_v28, %v4924_v56 }
 0x13b   : > { %1576 = vrot.lane.b32.xlu1 %v1439_v43, %s4110_s29 }
 0x13c   : > { %v5272_v26 = vpop.permute.xlu0 %1204 }
 0x13d   : > { %v5276_v55 = vpop.permute.xlu1 %1206 }
 0x13e   : > { %1578 = vrot.lane.b32.xlu0 %v1440_v27, %s4110_s29 }
 0x13f   : > { %1580 = vrot.lane.b32.xlu1 %v1441_v1, %s4110_s29  ;;  %v1445_v1 = vmul.f32 %v5218_v28, %v4915_v51  ;;  %v1448_v51 = vmul.f32 %v5218_v28, %v4936_v62 }
 0x140   : > { %v5282_v32 = vpop.permute.xlu0 %1208 }
 0x141   : > { %v5286_v43 = vpop.permute.xlu1 %1210 }
 0x142   : > { %1582 = vrot.lane.b32.xlu0 %v1442_v33, %s4110_s29 }
 0x143   : > { %1584 = vrot.lane.b32.xlu1 %v1443_v22, %s4110_s29  ;;  %v1447_v22 = vmul.f32 %v5218_v28, %v4927_v57  ;;  %v1450_v57 = vmul.f32 %v5218_v28, %v4948_v4 }
 0x144   : > { %v5292_v38 = vpop.permute.xlu0 %1212 }
 0x145   : > { %v5296_v27 = vpop.permute.xlu1 %1214 }
 0x146   : > { %1586 = vrot.lane.b32.xlu0 %v1444_v39, %s4110_s29 }
 0x147   : > { %1588 = vrot.lane.b32.xlu1 %v1445_v1, %s4110_s29  ;;  %v1449_v1 = vmul.f32 %v5218_v28, %v4939_v63  ;;  %v1452_v63 = vmul.f32 %v5218_v28, %v4960_v13 }
 0x148   : > { %v5302_v44 = vpop.permute.xlu0 %1216 }
 0x149   : > { %v5306_v33 = vpop.permute.xlu1 %1218 }
 0x14a   : > { %1590 = vrot.lane.b32.xlu0 %v1446_v45, %s4110_s29 }
 0x14b   : > { %1592 = vrot.lane.b32.xlu1 %v1447_v22, %s4110_s29  ;;  %v1451_v22 = vmul.f32 %v5218_v28, %v4951_v5  ;;  %v1454_v5 = vmul.f32 %v5218_v28, %v4972_v23 }
 0x14c   : > { %v5312_v50 = vpop.permute.xlu0 %1220 }
 0x14d   : > { %v5316_v39 = vpop.permute.xlu1 %1222 }
 0x14e   : > { %1594 = vrot.lane.b32.xlu0 %v1448_v51, %s4110_s29 }
 0x14f   : > { %1596 = vrot.lane.b32.xlu1 %v1449_v1, %s4110_s29  ;;  %v1453_v1 = vmul.f32 %v5218_v28, %v4963_v16  ;;  %v1456_v16 = vmul.f32 %v5218_v28, %v4984_v31 }
 0x150   : > { %v5322_v56 = vpop.permute.xlu0 %1224 }
 0x151   : > { %v5326_v45 = vpop.permute.xlu1 %1226 }
 0x152   : > { %1598 = vrot.lane.b32.xlu0 %v1450_v57, %s4110_s29 }
 0x153   : > { %1600 = vrot.lane.b32.xlu1 %v1451_v22, %s4110_s29  ;;  %v1455_v22 = vmul.f32 %v5218_v28, %v4975_v24  ;;  %v1458_v24 = vmul.f32 %v5218_v28, %v4996_v41 }
 0x154   : > { %v5332_v62 = vpop.permute.xlu0 %1228 }
 0x155   : > { %v5336_v51 = vpop.permute.xlu1 %1230 }
 0x156   : > { %1602 = vrot.lane.b32.xlu0 %v1452_v63, %s4110_s29 }
 0x157   : > { %1604 = vrot.lane.b32.xlu1 %v1453_v1, %s4110_s29  ;;  %v1457_v1 = vmul.f32 %v5218_v28, %v4987_v34  ;;  %v1460_v34 = vmul.f32 %v5218_v28, %v5008_v49 }
 0x158   : > { %v5342_v4 = vpop.permute.xlu0 %1232 }
 0x159   : > { %v5346_v57 = vpop.permute.xlu1 %1234 }
 0x15a   : > { %1606 = vrot.lane.b32.xlu0 %v1454_v5, %s4110_s29 }
 0x15b   : > { %1608 = vrot.lane.b32.xlu1 %v1455_v22, %s4110_s29  ;;  %v1459_v22 = vmul.f32 %v5218_v28, %v4999_v42  ;;  %v1462_v42 = vmul.f32 %v5218_v28, %v5020_v59 }
 0x15c   : > { %v5352_v13 = vpop.permute.xlu0 %1236 }
 0x15d   : > { %v5356_v63 = vpop.permute.xlu1 %1238 }
 0x15e   : > { %1610 = vrot.lane.b32.xlu0 %v1456_v16, %s4110_s29 }
 0x15f   : > { %1612 = vrot.lane.b32.xlu1 %v1457_v1, %s4110_s29  ;;  %v1461_v1 = vmul.f32 %v5218_v28, %v5011_v52  ;;  %v1464_v52 = vmul.f32 %v5218_v28, %v5032_v3 }
 0x160   : > { %v5362_v23 = vpop.permute.xlu0 %1240 }
 0x161   : > { %v5366_v5 = vpop.permute.xlu1 %1242 }
 0x162   : > { %1614 = vrot.lane.b32.xlu0 %v1458_v24, %s4110_s29 }
 0x163   : > { %1616 = vrot.lane.b32.xlu1 %v1459_v22, %s4110_s29  ;;  %v1463_v22 = vmul.f32 %v5218_v28, %v5023_v60  ;;  %v1466_v60 = vmul.f32 %v5218_v28, %v5044_v18 }
 0x164   : > { %v5372_v31 = vpop.permute.xlu0 %1244 }
 0x165   : > { %v5376_v16 = vpop.permute.xlu1 %1246 }
 0x166   : > { %1618 = vrot.lane.b32.xlu0 %v1460_v34, %s4110_s29 }
 0x167   : > { %1620 = vrot.lane.b32.xlu1 %v1461_v1, %s4110_s29  ;;  %v1465_v1 = vmul.f32 %v5218_v28, %v5035_v6  ;;  %v1468_v6 = vmul.f32 %v5218_v28, %v5056_v30 }
 0x168   : > { %v5382_v41 = vpop.permute.xlu0 %1248 }
 0x169   : > { %v5386_v24 = vpop.permute.xlu1 %1250 }
 0x16a   : > { %1622 = vrot.lane.b32.xlu0 %v1462_v42, %s4110_s29 }
 0x16b   : > { %1624 = vrot.lane.b32.xlu1 %v1463_v22, %s4110_s29  ;;  %v1467_v22 = vmul.f32 %v5218_v28, %v5047_v19  ;;  %v1470_v19 = vmul.f32 %v5218_v28, %v5068_v46 }
 0x16c   : > { %v5392_v49 = vpop.permute.xlu0 %1252 }
 0x16d   : > { %v5396_v34 = vpop.permute.xlu1 %1254 }
 0x16e   : > { %1626 = vrot.lane.b32.xlu0 %v1464_v52, %s4110_s29 }
 0x16f   : > { %1628 = vrot.lane.b32.xlu1 %v1465_v1, %s4110_s29  ;;  %v1469_v1 = vmul.f32 %v5218_v28, %v5059_v35  ;;  %v1472_v35 = vmul.f32 %v5218_v28, %v5080_v58 }
 0x170   : > { %v5402_v59 = vpop.permute.xlu0 %1256 }
 0x171   : > { %v5406_v42 = vpop.permute.xlu1 %1258 }
 0x172   : > { %1630 = vrot.lane.b32.xlu0 %v1466_v60, %s4110_s29 }
 0x173   : > { %1632 = vrot.lane.b32.xlu1 %v1467_v22, %s4110_s29  ;;  %v1471_v22 = vmul.f32 %v5218_v28, %v5071_v47  ;;  %v1474_v47 = vmul.f32 %v5218_v28, %v5092_v10 }
 0x174   : > { %v5412_v3 = vpop.permute.xlu0 %1260 }
 0x175   : > { %v5416_v52 = vpop.permute.xlu1 %1262 }
 0x176   : > { %1634 = vrot.lane.b32.xlu0 %v1468_v6, %s4110_s29 }
 0x177   : > { %1636 = vrot.lane.b32.xlu1 %v1469_v1, %s4110_s29  ;;  %v1473_v1 = vmul.f32 %v5218_v28, %v5083_v61  ;;  %v1476_v61 = vmul.f32 %v5218_v28, %v5104_v29 }
 0x178   : > { %v5422_v18 = vpop.permute.xlu0 %1264 }
 0x179   : > { %v5426_v60 = vpop.permute.xlu1 %1266 }
 0x17a   : > { %7936 = vst [vmem:[#allocation27_spill] sm:$0xff] %v5426_v60  ;;  %1638 = vrot.lane.b32.xlu0 %v1470_v19, %s4110_s29 }
 0x17b   : > { %1640 = vrot.lane.b32.xlu1 %v1471_v22, %s4110_s29  ;;  %v1475_v22 = vmul.f32 %v5218_v28, %v5095_v11  ;;  %v1478_v11 = vmul.f32 %v5218_v28, %v5116_v53 }
 0x17c   : > { %v5432_v30 = vpop.permute.xlu0 %1268 }
 0x17d   : > { %7937 = vst [vmem:[#allocation28_spill] sm:$0xff] %v5432_v30  ;;  %v5436_v6 = vpop.permute.xlu1 %1270 }
 0x17e   : > { %7938 = vst [vmem:[#allocation29_spill] sm:$0xff] %v5436_v6  ;;  %1642 = vrot.lane.b32.xlu0 %v1472_v35, %s4110_s29 }
 0x17f   : > { %1644 = vrot.lane.b32.xlu1 %v1473_v1, %s4110_s29  ;;  %v1477_v1 = vmul.f32 %v5218_v28, %v5107_v36  ;;  %v1480_v36 = vmul.f32 %v5218_v28, %v5128_v9 }
 0x180   : > { %v5442_v46 = vpop.permute.xlu0 %1272 }
 0x181   : > { %7939 = vst [vmem:[#allocation30_spill] sm:$0xff] %v5442_v46  ;;  %v5446_v19 = vpop.permute.xlu1 %1274  ;;  %v7964_v46 = vld [vmem:[#allocation17_spill] sm:$0xff] }
 0x182   : > { %7940 = vst [vmem:[#allocation31_spill] sm:$0xff] %v5446_v19  ;;  %1646 = vrot.lane.b32.xlu0 %v1474_v47, %s4110_s29  ;;  %v7961_v19 = vld [vmem:[#allocation12_spill] sm:$0xff] }
 0x183   : > { %1648 = vrot.lane.b32.xlu1 %v1475_v22, %s4110_s29  ;;  %v1479_v22 = vmul.f32 %v5218_v28, %v5119_v54  ;;  %v1482_v54 = vmul.f32 %v5218_v28, %v5140_v40 }
 0x184   : > { %v5452_v58 = vpop.permute.xlu0 %1276 }
 0x185   : > { %7941 = vst [vmem:[#allocation32_spill] sm:$0xff] %v5452_v58  ;;  %v5456_v35 = vpop.permute.xlu1 %1278 }
 0x186   : > { %7942 = vst [vmem:[#allocation33_spill] sm:$0xff] %v5456_v35  ;;  %1650 = vrot.lane.b32.xlu0 %v1476_v61, %s4110_s29  ;;  %v7960_v35 = vld [vmem:[#allocation11_spill] sm:$0xff] }
 0x187   : > { %1652 = vrot.lane.b32.xlu1 %v1477_v1, %s4110_s29  ;;  %v1481_v1 = vmul.f32 %v5218_v28, %v5131_v17 }
 0x188   : > { %v5462_v10 = vpop.permute.xlu0 %1280 }
 0x189   : > { %7943 = vst [vmem:[#allocation34_spill] sm:$0xff] %v5462_v10  ;;  %v5466_v47 = vpop.permute.xlu1 %1282 }
 0x18a   : > { %7944 = vst [vmem:[#allocation35_spill] sm:$0xff] %v5466_v47  ;;  %1654 = vrot.lane.b32.xlu0 %v1478_v11, %s4110_s29 }
 0x18b   : > { %1656 = vrot.lane.b32.xlu1 %v1479_v22, %s4110_s29  ;;  %v7949_v22 = vld [vmem:[#allocation6_spill] sm:$0xff] }
 0x18c   : > { %v5472_v29 = vpop.permute.xlu0 %1284  ;;  %v1483_v9 = vmul.f32 %v5218_v28, %v7949_v22  ;;  %v7955_v22 = vld [vmem:[#allocation9_spill] sm:$0xff] }
 0x18d   : > { %7945 = vst [vmem:[#allocation36_spill] sm:$0xff] %v5472_v29  ;;  %v5476_v61 = vpop.permute.xlu1 %1286  ;;  %v5500_v29 = vstv %s848_s30 }
 0x18e   : > { %7946 = vst [vmem:[#allocation37_spill] sm:$0xff] %v5476_v61  ;;  %1658 = vrot.lane.b32.xlu0 %v1480_v36, %s4110_s29  ;;  %v7951_v36 = vld [vmem:[#allocation7_spill] sm:$0xff] }
 0x18f   : > { %1660 = vrot.lane.b32.xlu1 %v1481_v1, %s4110_s29  ;;  %v1484_v1 = vmul.f32 %v5218_v28, %v7951_v36 }
 0x190   : > { %v5482_v53 = vpop.permute.xlu0 %1288 }
 0x191   : > { %7947 = vst [vmem:[#allocation38_spill] sm:$0xff] %v5482_v53  ;;  %v5486_v11 = vpop.permute.xlu1 %1290  ;;  %v7953_v53 = vld [vmem:[#allocation8_spill] sm:$0xff] }
 0x192   : > { %7948 = vst [vmem:[#allocation39_spill] sm:$0xff] %v5486_v11  ;;  %1662 = vrot.lane.b32.xlu0 %v1482_v54, %s4110_s29  ;;  %v1485_v40 = vmul.f32 %v5218_v28, %v7953_v53  ;;  %v915_v53 = vmul.f32 %v5500_v29, %v4834_v12  ;;  %v916_v12 = vmul.f32 %v5500_v29, %v4840_v14  ;;  %v7962_v14 = vld [vmem:[#allocation16_spill] sm:$0xff] }
 0x193   : > { %1664 = vrot.lane.b32.xlu1 %v1483_v9, %s4110_s29  ;;  %v1486_v9 = vmul.f32 %v5218_v28, %v7955_v22  ;;  %v5523_v22 = vld [vmem:[#allocation2 + $0x9] sm:$0xff] }
 0x194   : > { %v5492_v17 = vpop.permute.xlu0 %1292 }
 0x195   : > { %7950 = vst [vmem:[#allocation6_spill] sm:$0xff] %v5492_v17  ;;  %v5496_v61 = vpop.permute.xlu1 %1294  ;;  %v914_v17 = vmul.f32 %v5500_v29, %v4826_v7  ;;  %v7959_v7 = vld [vmem:[#allocation14_spill] sm:$0xff] }
 0x196   : > { %7952 = vst [vmem:[#allocation7_spill] sm:$0xff] %v5496_v61  ;;  %1666 = vrot.lane.b32.xlu0 %v1484_v1, %s4110_s29  ;;  %v7957_v61 = vld [vmem:[#allocation10_spill] sm:$0xff] }
 0x197   : > { %1668 = vrot.lane.b32.xlu1 %v1485_v40, %s4110_s29  ;;  %v1487_v11 = vmul.f32 %v5218_v28, %v7957_v61  ;;  %v5517_v1 = vld [vmem:[#allocation2 + $0x1] sm:$0xff]  ;;  %v5519_v40 = vstv %s3932_s3  ;;  %v1488_v61 = vmul.f32 %v5218_v28, %v7960_v35  ;;  %v5539_v35 = vld [vmem:[#allocation2 + $0x19] sm:$0xff] }
 0x198   : > { %v5504_v54 = vpop.permute.xlu0 %1296 }
 0x199   : > { %7954 = vst [vmem:[#allocation8_spill] sm:$0xff] %v5504_v54  ;;  %v5510_v36 = vpop.permute.xlu1 %1298  ;;  %v7958_v54 = vld [vmem:[#allocation13_spill] sm:$0xff] }
 0x19a   : > { %7956 = vst [vmem:[#allocation9_spill] sm:$0xff] %v5510_v36  ;;  %1670 = vrot.lane.b32.xlu0 %v1486_v9, %s4110_s29  ;;  %v1364_v47 = vadd.f32 %v7958_v54, %v914_v17  ;;  %v1365_v36 = vadd.f32 %v7959_v7, %v915_v53  ;;  %v1489_v17 = vmul.f32 %v5218_v28, %v7961_v19 }
 0x19b   : > { %1672 = vrot.lane.b32.xlu1 %v1487_v11, %s4110_s29  ;;  %v1880_v11 = vmul.f32 %v5519_v40, %v5517_v1  ;;  %v917_v54 = vmul.f32 %v5500_v29, %v4843_v15  ;;  %v1881_v7 = vmul.f32 %v5519_v40, %v5523_v22  ;;  %v7965_v15 = vld [vmem:[#allocation15_spill] sm:$0xff] }
 0x19c   : > { %v1559_v10 = vpop.permute.xlu0 %1558 }
 0x19d   : > { %v1750_v9 = vadd.f32 %v1559_v10, %v1364_v47  ;;  %v1561_v58 = vpop.permute.xlu1 %1560  ;;  %v1366_v10 = vadd.f32 %v7962_v14, %v916_v12  ;;  %v5545_v47 = vld [vmem:[#allocation2 + $0x21] sm:$0xff]  ;;  %v1367_v6 = vadd.f32 %v7964_v46, %v917_v54  ;;  %v919_v46 = vmul.f32 %v5500_v29, %v4855_v21  ;;  %v5563_v54 = vld [vmem:[#allocation2 + $0x31] sm:$0xff] }
 0x19e   : > { %v1751_v53 = vadd.f32 %v1561_v58, %v1365_v36  ;;  %1674 = vrot.lane.b32.xlu0 %v1488_v61, %s4110_s29  ;;  %v1490_v58 = vmul.f32 %v5218_v28, %v7965_v15  ;;  %v918_v61 = vmul.f32 %v5500_v29, %v4852_v20  ;;  %v1883_v20 = vmul.f32 %v5519_v40, %v5545_v47  ;;  %v7969_v21 = vld [vmem:[#allocation18_spill] sm:$0xff] }
 0x19f   : > { %1676 = vrot.lane.b32.xlu1 %v1489_v17, %s4110_s29  ;;  %v5547_v19 = vadd.f32 %v1880_v11, %v1750_v9  ;;  %v1491_v17 = vmul.f32 %v5218_v28, %v5193_v2  ;;  %v1882_v9 = vmul.f32 %v5519_v40, %v5539_v35  ;;  %v1369_v14 = vadd.f32 %v5214_v25, %v919_v46  ;;  %v3982_v25 = vld [vmem:[#allocation2 + $0x50] sm:$0xff] }
 0x1a0   : > { %v1563_v30 = vpop.permute.xlu0 %1562  ;;  %v5552_v36 = vadd.f32 %v1881_v7, %v1751_v53  ;;  %v5569_v7 = vld [vmem:[#allocation2 + $0x39] sm:$0xff]  ;;  %v5577_v15 = vstv %s5528_s4 }
 0x1a1   : > { %7963 = vst [vmem:[#allocation10_spill] sm:$0xff] %v5547_v19  ;;  %v1752_v60 = vadd.f32 %v1563_v30, %v1366_v10  ;;  %v1565_v12 = vpop.permute.xlu1 %1564  ;;  %v7967_v30 = vld [vmem:[#allocation19_spill] sm:$0xff] }
 0x1a2   : > { %7966 = vst [vmem:[#allocation13_spill] sm:$0xff] %v5552_v36  ;;  %v1753_v11 = vadd.f32 %v1565_v12, %v1367_v6  ;;  %1678 = vrot.lane.b32.xlu0 %v1490_v58, %s4110_s29  ;;  %v1368_v53 = vadd.f32 %v7967_v30, %v918_v61  ;;  %v1492_v6 = vmul.f32 %v5218_v28, %v7969_v21  ;;  %v3981_v12 = vld [vmem:[#allocation2 + $0x48] sm:$0xff] }
 0x1a3   : > { %1680 = vrot.lane.b32.xlu1 %v1491_v17, %s4110_s29  ;;  %v5571_v2 = vadd.f32 %v1882_v9, %v1752_v60  ;;  %v920_v36 = vmul.f32 %v3981_v12, %v5500_v29  ;;  %v1493_v17 = vmul.f32 %v5218_v28, %v5207_v0  ;;  %v1884_v60 = vmul.f32 %v5519_v40, %v5563_v54  ;;  %v5588_v21 = vld [vmem:[#allocation2 + $0x49] sm:$0xff]  ;;  %v7973_v28 = vld [vmem:[#allocation21_spill] sm:$0xff] }
 0x1a4   : > { %v1567_v10 = vpop.permute.xlu0 %1566  ;;  %v5579_v58 = vadd.f32 %v1883_v20, %v1753_v11  ;;  %v921_v9 = vmul.f32 %v3982_v25, %v5500_v29  ;;  %v1885_v11 = vmul.f32 %v5519_v40, %v5569_v7  ;;  %v7971_v20 = vld [vmem:[#allocation20_spill] sm:$0xff] }
 0x1a5   : > { %7968 = vst [vmem:[#allocation14_spill] sm:$0xff] %v5571_v2  ;;  %v1754_v61 = vadd.f32 %v1567_v10, %v1368_v53  ;;  %v1569_v30 = vpop.permute.xlu1 %1568  ;;  %v1370_v53 = vadd.f32 %v7971_v20, %v920_v36  ;;  %v5594_v10 = vld [vmem:[#allocation2 + $0x51] sm:$0xff]  ;;  %v2011_v36 = vmul.f32 %v5577_v15, %v5523_v22  ;;  %v5616_v20 = vld [vmem:[#allocation2 + $0x69] sm:$0xff] }
 0x1a6   : > { %7970 = vst [vmem:[#allocation11_spill] sm:$0xff] %v5579_v58  ;;  %v1755_v46 = vadd.f32 %v1569_v30, %v1369_v14  ;;  %1682 = vrot.lane.b32.xlu0 %v1492_v6, %s4110_s29  ;;  %v1371_v12 = vadd.f32 %v7973_v28, %v921_v9  ;;  %v2010_v14 = vmul.f32 %v5577_v15, %v5517_v1  ;;  %v3983_v30 = vld [vmem:[#allocation2 + $0x60] sm:$0xff] }
 0x1a7   : > { %1684 = vrot.lane.b32.xlu1 %v1493_v17, %s4110_s29  ;;  %v5596_v0 = vadd.f32 %v1884_v60, %v1754_v61  ;;  %v922_v25 = vmul.f32 %v3983_v30, %v5500_v29  ;;  %v1886_v61 = vmul.f32 %v5519_v40, %v5588_v21  ;;  %v3984_v17 = vld [vmem:[#allocation2 + $0x68] sm:$0xff] }
 0x1a8   : > { %v1571_v58 = vpop.permute.xlu0 %1570  ;;  %v5601_v6 = vadd.f32 %v1885_v11, %v1755_v46  ;;  %v923_v60 = vmul.f32 %v3984_v17, %v5500_v29  ;;  %v5610_v1 = vld [vmem:[#allocation2 + $0x61] sm:$0xff]  ;;  %v1887_v46 = vmul.f32 %v5519_v40, %v5594_v10 }
 0x1a9   : > { %7972 = vst [vmem:[#allocation12_spill] sm:$0xff] %v5596_v0  ;;  %v1756_v2 = vadd.f32 %v1571_v58, %v1370_v53  ;;  %v1573_v19 = vpop.permute.xlu1 %1572  ;;  %v7975_v11 = vld [vmem:[#allocation22_spill] sm:$0xff]  ;;  %v7977_v53 = vld [vmem:[#allocation23_spill] sm:$0xff] }
 0x1aa   : > { %7974 = vst [vmem:[#allocation16_spill] sm:$0xff] %v5601_v6  ;;  %v1757_v9 = vadd.f32 %v1573_v19, %v1371_v12  ;;  %2138 = vrot.lane.b32.xlu0 %v2010_v14, %s4109_s27  ;;  %v1372_v58 = vadd.f32 %v7975_v11, %v922_v25  ;;  %v1373_v28 = vadd.f32 %v7977_v53, %v923_v60  ;;  %v3985_v14 = vld [vmem:[#allocation2 + $0x78] sm:$0xff] }
 0x1ab   : > { %2140 = vrot.lane.b32.xlu1 %v2011_v36, %s4109_s27  ;;  %v5618_v22 = vadd.f32 %v1886_v61, %v1756_v2  ;;  %v2012_v19 = vmul.f32 %v5577_v15, %v5539_v35  ;;  %v924_v17 = vmul.f32 %v3985_v14, %v5500_v29  ;;  %v2013_v25 = vmul.f32 %v5577_v15, %v5545_v47  ;;  %v3986_v36 = vld [vmem:[#allocation2 + $0x80] sm:$0xff]  ;;  %v7981_v53 = vld [vmem:[#allocation25_spill] sm:$0xff] }
 0x1ac   : > { %v1575_v30 = vpop.permute.xlu0 %1574  ;;  %v5623_v12 = vadd.f32 %v1887_v46, %v1757_v9  ;;  %v1888_v2 = vmul.f32 %v5519_v40, %v5610_v1  ;;  %v925_v61 = vmul.f32 %v3986_v36, %v5500_v29  ;;  %v5632_v35 = vld [vmem:[#allocation2 + $0x79] sm:$0xff]  ;;  %v1889_v9 = vmul.f32 %v5519_v40, %v5616_v20  ;;  %v7979_v46 = vld [vmem:[#allocation24_spill] sm:$0xff] }
 0x1ad   : > { %7976 = vst [vmem:[#allocation17_spill] sm:$0xff] %v5618_v22  ;;  %v1758_v6 = vadd.f32 %v1575_v30, %v1372_v58  ;;  %v1577_v0 = vpop.permute.xlu1 %1576  ;;  %v1374_v11 = vadd.f32 %v7979_v46, %v924_v17  ;;  %v5638_v58 = vld [vmem:[#allocation2 + $0x81] sm:$0xff]  ;;  %v2015_v17 = vmul.f32 %v5577_v15, %v5569_v7 }
 0x1ae   : > { %7978 = vst [vmem:[#allocation15_spill] sm:$0xff] %v5623_v12  ;;  %v1759_v60 = vadd.f32 %v1577_v0, %v1373_v28  ;;  %2142 = vrot.lane.b32.xlu0 %v2012_v19, %s4109_s27  ;;  %v1375_v30 = vadd.f32 %v7981_v53, %v925_v61  ;;  %v2014_v0 = vmul.f32 %v5577_v15, %v5563_v54  ;;  %v3987_v19 = vld [vmem:[#allocation2 + $0x90] sm:$0xff] }
 0x1af   : > { %2144 = vrot.lane.b32.xlu1 %v2013_v25, %s4109_s27  ;;  %v5640_v47 = vadd.f32 %v1888_v2, %v1758_v6  ;;  %v926_v36 = vmul.f32 %v3987_v19, %v5500_v29  ;;  %v1890_v6 = vmul.f32 %v5519_v40, %v5632_v35  ;;  %v3988_v25 = vld [vmem:[#allocation2 + $0x98] sm:$0xff] }
 0x1b0   : > { %v1579_v14 = vpop.permute.xlu0 %1578  ;;  %v5645_v28 = vadd.f32 %v1889_v9, %v1759_v60  ;;  %v927_v2 = vmul.f32 %v3988_v25, %v5500_v29  ;;  %v5654_v54 = vld [vmem:[#allocation2 + $0x91] sm:$0xff]  ;;  %v1891_v60 = vmul.f32 %v5519_v40, %v5638_v58  ;;  %v7983_v9 = vld [vmem:[#allocation26_spill] sm:$0xff] }
 0x1b1   : > { %7980 = vst [vmem:[#allocation19_spill] sm:$0xff] %v5640_v47  ;;  %v1760_v12 = vadd.f32 %v1579_v14, %v1374_v11  ;;  %v1581_v22 = vpop.permute.xlu1 %1580  ;;  %v1376_v46 = vadd.f32 %v7983_v9, %v926_v36  ;;  %v5660_v11 = vld [vmem:[#allocation2 + $0x99] sm:$0xff]  ;;  %v2017_v36 = vmul.f32 %v5577_v15, %v5594_v10 }
 0x1b2   : > { %7982 = vst [vmem:[#allocation18_spill] sm:$0xff] %v5645_v28  ;;  %v1761_v61 = vadd.f32 %v1581_v22, %v1375_v30  ;;  %2146 = vrot.lane.b32.xlu0 %v2014_v0, %s4109_s27  ;;  %v1377_v53 = vadd.f32 %v5256_v48, %v927_v2  ;;  %v2016_v22 = vmul.f32 %v5577_v15, %v5588_v21  ;;  %v3989_v0 = vld [vmem:[#allocation2 + $0xa8] sm:$0xff] }
 0x1b3   : > { %2148 = vrot.lane.b32.xlu1 %v2015_v17, %s4109_s27  ;;  %v5662_v7 = vadd.f32 %v1890_v6, %v1760_v12  ;;  %v928_v19 = vmul.f32 %v3989_v0, %v5500_v29  ;;  %v1892_v12 = vmul.f32 %v5519_v40, %v5654_v54  ;;  %v3990_v17 = vld [vmem:[#allocation2 + $0xb0] sm:$0xff]  ;;  %v1893_v2 = vmul.f32 %v5519_v40, %v5660_v11 }
 0x1b4   : > { %v1583_v14 = vpop.permute.xlu0 %1582  ;;  %v5667_v30 = vadd.f32 %v1891_v60, %v1761_v61  ;;  %v929_v48 = vmul.f32 %v3990_v17, %v5500_v29  ;;  %v5676_v21 = vld [vmem:[#allocation2 + $0xa9] sm:$0xff]  ;;  %v5682_v60 = vld [vmem:[#allocation2 + $0xb1] sm:$0xff] }
 0x1b5   : > { %7984 = vst [vmem:[#allocation20_spill] sm:$0xff] %v5662_v7  ;;  %v1762_v25 = vadd.f32 %v1583_v14, %v1376_v46  ;;  %v1585_v28 = vpop.permute.xlu1 %1584  ;;  %v1378_v61 = vadd.f32 %v5262_v37, %v928_v19  ;;  %v3991_v14 = vld [vmem:[#allocation2 + $0xc0] sm:$0xff]  ;;  %v2019_v37 = vmul.f32 %v5577_v15, %v5616_v20  ;;  %v1894_v19 = vmul.f32 %v5519_v40, %v5676_v21 }
 0x1b6   : > { %7985 = vst [vmem:[#allocation21_spill] sm:$0xff] %v5667_v30  ;;  %v1763_v6 = vadd.f32 %v1585_v28, %v1377_v53  ;;  %2150 = vrot.lane.b32.xlu0 %v2016_v22, %s4109_s27  ;;  %v1379_v9 = vadd.f32 %v5266_v8, %v929_v48  ;;  %v2018_v28 = vmul.f32 %v5577_v15, %v5610_v1  ;;  %v5698_v1 = vld [vmem:[#allocation2 + $0xc1] sm:$0xff] }
 0x1b7   : > { %2152 = vrot.lane.b32.xlu1 %v2017_v36, %s4109_s27  ;;  %v5684_v10 = vadd.f32 %v1892_v12, %v1762_v25  ;;  %v930_v22 = vmul.f32 %v3991_v14, %v5500_v29  ;;  %v3992_v25 = vld [vmem:[#allocation2 + $0xc8] sm:$0xff]  ;;  %v1895_v12 = vmul.f32 %v5519_v40, %v5682_v60 }
 0x1b8   : > { %v1587_v46 = vpop.permute.xlu0 %1586  ;;  %v5689_v53 = vadd.f32 %v1893_v2, %v1763_v6  ;;  %v931_v8 = vmul.f32 %v3992_v25, %v5500_v29  ;;  %v5704_v6 = vld [vmem:[#allocation2 + $0xc9] sm:$0xff] }
 0x1b9   : > { %7986 = vst [vmem:[#allocation22_spill] sm:$0xff] %v5684_v10  ;;  %v1764_v0 = vadd.f32 %v1587_v46, %v1378_v61  ;;  %v1589_v17 = vpop.permute.xlu1 %1588  ;;  %v1380_v48 = vadd.f32 %v5272_v26, %v930_v22  ;;  %v2021_v26 = vmul.f32 %v5577_v15, %v5638_v58  ;;  %v1896_v22 = vmul.f32 %v5519_v40, %v5698_v1 }
 0x1ba   : > { %7987 = vst [vmem:[#allocation23_spill] sm:$0xff] %v5689_v53  ;;  %v1765_v36 = vadd.f32 %v1589_v17, %v1379_v9  ;;  %2154 = vrot.lane.b32.xlu0 %v2018_v28, %s4109_s27  ;;  %v1381_v2 = vadd.f32 %v5276_v55, %v931_v8  ;;  %v2020_v9 = vmul.f32 %v5577_v15, %v5632_v35  ;;  %v3993_v28 = vld [vmem:[#allocation2 + $0xd8] sm:$0xff] }
 0x1bb   : > { %2156 = vrot.lane.b32.xlu1 %v2019_v37, %s4109_s27  ;;  %v5706_v20 = vadd.f32 %v1894_v19, %v1764_v0  ;;  %v932_v14 = vmul.f32 %v3993_v28, %v5500_v29  ;;  %v3994_v0 = vld [vmem:[#allocation2 + $0xe0] sm:$0xff]  ;;  %v1897_v19 = vmul.f32 %v5519_v40, %v5704_v6 }
 0x1bc   : > { %v1591_v61 = vpop.permute.xlu0 %1590  ;;  %v5711_v46 = vadd.f32 %v1895_v12, %v1765_v36  ;;  %v933_v55 = vmul.f32 %v3994_v0, %v5500_v29  ;;  %v5720_v35 = vld [vmem:[#allocation2 + $0xd9] sm:$0xff]  ;;  %v5726_v36 = vld [vmem:[#allocation2 + $0xe1] sm:$0xff] }
 0x1bd   : > { %7988 = vst [vmem:[#allocation24_spill] sm:$0xff] %v5706_v20  ;;  %v1766_v17 = vadd.f32 %v1591_v61, %v1380_v48  ;;  %v1593_v25 = vpop.permute.xlu1 %1592  ;;  %v1382_v8 = vadd.f32 %v5282_v32, %v932_v14  ;;  %v2023_v32 = vmul.f32 %v5577_v15, %v5660_v11  ;;  %v1898_v14 = vmul.f32 %v5519_v40, %v5720_v35 }
 0x1be   : > { %7989 = vst [vmem:[#allocation25_spill] sm:$0xff] %v5711_v46  ;;  %v1767_v37 = vadd.f32 %v1593_v25, %v1381_v2  ;;  %2158 = vrot.lane.b32.xlu0 %v2020_v9, %s4109_s27  ;;  %v1383_v12 = vadd.f32 %v5286_v43, %v933_v55  ;;  %v2022_v2 = vmul.f32 %v5577_v15, %v5654_v54  ;;  %v3995_v9 = vld [vmem:[#allocation2 + $0xf0] sm:$0xff] }
 0x1bf   : > { %2160 = vrot.lane.b32.xlu1 %v2021_v26, %s4109_s27  ;;  %v5728_v58 = vadd.f32 %v1896_v22, %v1766_v17  ;;  %v934_v28 = vmul.f32 %v3995_v9, %v5500_v29  ;;  %v3996_v17 = vld [vmem:[#allocation2 + $0xf8] sm:$0xff]  ;;  %v1899_v22 = vmul.f32 %v5519_v40, %v5726_v36 }
 0x1c0   : > { %v1595_v48 = vpop.permute.xlu0 %1594  ;;  %v5733_v61 = vadd.f32 %v1897_v19, %v1767_v37  ;;  %v935_v43 = vmul.f32 %v3996_v17, %v5500_v29  ;;  %v5742_v54 = vld [vmem:[#allocation2 + $0xf1] sm:$0xff]  ;;  %v5748_v37 = vld [vmem:[#allocation2 + $0xf9] sm:$0xff] }
 0x1c1   : > { %7990 = vst [vmem:[#allocation26_spill] sm:$0xff] %v5728_v58  ;;  %v1768_v25 = vadd.f32 %v1595_v48, %v1382_v8  ;;  %v1597_v0 = vpop.permute.xlu1 %1596  ;;  %v1384_v55 = vadd.f32 %v5292_v38, %v934_v28  ;;  %v2025_v38 = vmul.f32 %v5577_v15, %v5682_v60  ;;  %v1900_v28 = vmul.f32 %v5519_v40, %v5742_v54 }
 0x1c2   : > { %7991 = vst [vmem:[#allocation40_spill] sm:$0xff] %v5733_v61  ;;  %v1769_v26 = vadd.f32 %v1597_v0, %v1383_v12  ;;  %2162 = vrot.lane.b32.xlu0 %v2022_v2, %s4109_s27  ;;  %v1385_v19 = vadd.f32 %v5296_v27, %v935_v43  ;;  %v2024_v12 = vmul.f32 %v5577_v15, %v5676_v21  ;;  %v3997_v2 = vld [vmem:[#allocation2 + $0x108] sm:$0xff] }
 0x1c3   : > { %2164 = vrot.lane.b32.xlu1 %v2023_v32, %s4109_s27  ;;  %v5750_v11 = vadd.f32 %v1898_v14, %v1768_v25  ;;  %v936_v9 = vmul.f32 %v3997_v2, %v5500_v29  ;;  %v3998_v25 = vld [vmem:[#allocation2 + $0x110] sm:$0xff]  ;;  %v1901_v14 = vmul.f32 %v5519_v40, %v5748_v37 }
 0x1c4   : > { %v1599_v8 = vpop.permute.xlu0 %1598  ;;  %v5755_v48 = vadd.f32 %v1899_v22, %v1769_v26  ;;  %v937_v27 = vmul.f32 %v3998_v25, %v5500_v29  ;;  %v5764_v21 = vld [vmem:[#allocation2 + $0x109] sm:$0xff]  ;;  %v5770_v26 = vld [vmem:[#allocation2 + $0x111] sm:$0xff] }
 0x1c5   : > { %7992 = vst [vmem:[#allocation41_spill] sm:$0xff] %v5750_v11  ;;  %v1770_v0 = vadd.f32 %v1599_v8, %v1384_v55  ;;  %v1601_v17 = vpop.permute.xlu1 %1600  ;;  %v1386_v43 = vadd.f32 %v5302_v44, %v936_v9  ;;  %v2027_v44 = vmul.f32 %v5577_v15, %v5704_v6  ;;  %v1902_v9 = vmul.f32 %v5519_v40, %v5764_v21 }
 0x1c6   : > { %7993 = vst [vmem:[#allocation42_spill] sm:$0xff] %v5755_v48  ;;  %v1771_v32 = vadd.f32 %v1601_v17, %v1385_v19  ;;  %2166 = vrot.lane.b32.xlu0 %v2024_v12, %s4109_s27  ;;  %v1387_v22 = vadd.f32 %v5306_v33, %v937_v27  ;;  %v2026_v19 = vmul.f32 %v5577_v15, %v5698_v1  ;;  %v3999_v12 = vld [vmem:[#allocation2 + $0x120] sm:$0xff] }
 0x1c7   : > { %2168 = vrot.lane.b32.xlu1 %v2025_v38, %s4109_s27  ;;  %v5772_v60 = vadd.f32 %v1900_v28, %v1770_v0  ;;  %v938_v2 = vmul.f32 %v3999_v12, %v5500_v29  ;;  %v4000_v0 = vld [vmem:[#allocation2 + $0x128] sm:$0xff]  ;;  %v1903_v27 = vmul.f32 %v5519_v40, %v5770_v26 }
 0x1c8   : > { %v1603_v55 = vpop.permute.xlu0 %1602  ;;  %v5777_v8 = vadd.f32 %v1901_v14, %v1771_v32  ;;  %v939_v33 = vmul.f32 %v4000_v0, %v5500_v29  ;;  %v5786_v28 = vld [vmem:[#allocation2 + $0x121] sm:$0xff]  ;;  %v5792_v14 = vld [vmem:[#allocation2 + $0x129] sm:$0xff] }
 0x1c9   : > { %7994 = vst [vmem:[#allocation43_spill] sm:$0xff] %v5772_v60  ;;  %v1772_v17 = vadd.f32 %v1603_v55, %v1386_v43  ;;  %v1605_v25 = vpop.permute.xlu1 %1604  ;;  %v1388_v32 = vadd.f32 %v5312_v50, %v938_v2  ;;  %v2029_v50 = vmul.f32 %v5577_v15, %v5726_v36  ;;  %v1904_v2 = vmul.f32 %v5519_v40, %v5786_v28 }
 0x1ca   : > { %7995 = vst [vmem:[#allocation44_spill] sm:$0xff] %v5777_v8  ;;  %v1773_v38 = vadd.f32 %v1605_v25, %v1387_v22  ;;  %2170 = vrot.lane.b32.xlu0 %v2026_v19, %s4109_s27  ;;  %v1389_v55 = vadd.f32 %v5316_v39, %v939_v33  ;;  %v2028_v22 = vmul.f32 %v5577_v15, %v5720_v35  ;;  %v4001_v25 = vld [vmem:[#allocation2 + $0x138] sm:$0xff] }
 0x1cb   : > { %2172 = vrot.lane.b32.xlu1 %v2027_v44, %s4109_s27  ;;  %v5794_v43 = vadd.f32 %v1902_v9, %v1772_v17  ;;  %v940_v0 = vmul.f32 %v4001_v25, %v5500_v29  ;;  %v4002_v17 = vld [vmem:[#allocation2 + $0x140] sm:$0xff]  ;;  %v1905_v33 = vmul.f32 %v5519_v40, %v5792_v14 }
 0x1cc   : > { %v1607_v12 = vpop.permute.xlu0 %1606  ;;  %v5799_v19 = vadd.f32 %v1903_v27, %v1773_v38  ;;  %v941_v39 = vmul.f32 %v4002_v17, %v5500_v29  ;;  %v5808_v9 = vld [vmem:[#allocation2 + $0x139] sm:$0xff]  ;;  %v5814_v27 = vld [vmem:[#allocation2 + $0x141] sm:$0xff] }
 0x1cd   : > { %7996 = vst [vmem:[#allocation45_spill] sm:$0xff] %v5794_v43  ;;  %v1774_v8 = vadd.f32 %v1607_v12, %v1388_v32  ;;  %v1609_v60 = vpop.permute.xlu1 %1608  ;;  %v1390_v38 = vadd.f32 %v5322_v56, %v940_v0  ;;  %v2031_v56 = vmul.f32 %v5577_v15, %v5748_v37  ;;  %v4004_v0 = vld [vmem:[#allocation2 + $0x158] sm:$0xff] }
 0x1ce   : > { %7997 = vst [vmem:[#allocation46_spill] sm:$0xff] %v5799_v19  ;;  %v1775_v44 = vadd.f32 %v1609_v60, %v1389_v55  ;;  %2174 = vrot.lane.b32.xlu0 %v2028_v22, %s4109_s27  ;;  %v1391_v12 = vadd.f32 %v5326_v45, %v941_v39  ;;  %v2030_v60 = vmul.f32 %v5577_v15, %v5742_v54  ;;  %v4003_v22 = vld [vmem:[#allocation2 + $0x150] sm:$0xff] }
 0x1cf   : > { %2176 = vrot.lane.b32.xlu1 %v2029_v50, %s4109_s27  ;;  %v5816_v32 = vadd.f32 %v1904_v2, %v1774_v8  ;;  %v942_v17 = vmul.f32 %v4003_v22, %v5500_v29  ;;  %v1906_v8 = vmul.f32 %v5519_v40, %v5808_v9  ;;  %v943_v45 = vmul.f32 %v4004_v0, %v5500_v29  ;;  %v5830_v2 = vld [vmem:[#allocation2 + $0x151] sm:$0xff] }
 0x1d0   : > { %v1611_v25 = vpop.permute.xlu0 %1610  ;;  %v5821_v55 = vadd.f32 %v1905_v33, %v1775_v44  ;;  %v1907_v39 = vmul.f32 %v5519_v40, %v5814_v27  ;;  %v5836_v33 = vld [vmem:[#allocation2 + $0x159] sm:$0xff] }
 0x1d1   : > { %7998 = vst [vmem:[#allocation47_spill] sm:$0xff] %v5816_v32  ;;  %v1776_v19 = vadd.f32 %v1611_v25, %v1390_v38  ;;  %v1613_v43 = vpop.permute.xlu1 %1612  ;;  %v1392_v44 = vadd.f32 %v5332_v62, %v942_v17  ;;  %v1393_v25 = vadd.f32 %v5336_v51, %v943_v45  ;;  %v2033_v62 = vmul.f32 %v5577_v15, %v5770_v26  ;;  %v4006_v17 = vld [vmem:[#allocation2 + $0x170] sm:$0xff] }
 0x1d2   : > { %7999 = vst [vmem:[#allocation48_spill] sm:$0xff] %v5821_v55  ;;  %v1777_v50 = vadd.f32 %v1613_v43, %v1391_v12  ;;  %2178 = vrot.lane.b32.xlu0 %v2030_v60, %s4109_s27  ;;  %v2032_v43 = vmul.f32 %v5577_v15, %v5764_v21  ;;  %v4005_v60 = vld [vmem:[#allocation2 + $0x168] sm:$0xff]  ;;  %v945_v51 = vmul.f32 %v4006_v17, %v5500_v29 }
 0x1d3   : > { %2180 = vrot.lane.b32.xlu1 %v2031_v56, %s4109_s27  ;;  %v5838_v38 = vadd.f32 %v1906_v8, %v1776_v19  ;;  %v944_v0 = vmul.f32 %v4005_v60, %v5500_v29  ;;  %v1908_v19 = vmul.f32 %v5519_v40, %v5830_v2  ;;  %v5852_v8 = vld [vmem:[#allocation2 + $0x169] sm:$0xff]  ;;  %v1909_v45 = vmul.f32 %v5519_v40, %v5836_v33 }
 0x1d4   : > { %v1615_v22 = vpop.permute.xlu0 %1614  ;;  %v5843_v12 = vadd.f32 %v1907_v39, %v1777_v50  ;;  %v5858_v39 = vld [vmem:[#allocation2 + $0x171] sm:$0xff] }
 0x1d5   : > { %8000 = vst [vmem:[#allocation49_spill] sm:$0xff] %v5838_v38  ;;  %v1778_v55 = vadd.f32 %v1615_v22, %v1392_v44  ;;  %v1617_v32 = vpop.permute.xlu1 %1616  ;;  %v1394_v50 = vadd.f32 %v5342_v4, %v944_v0  ;;  %v1395_v22 = vadd.f32 %v5346_v57, %v945_v51  ;;  %v2035_v4 = vmul.f32 %v5577_v15, %v5792_v14  ;;  %v4008_v0 = vld [vmem:[#allocation2 + $0x188] sm:$0xff] }
 0x1d6   : > { %8001 = vst [vmem:[#allocation50_spill] sm:$0xff] %v5843_v12  ;;  %v1779_v56 = vadd.f32 %v1617_v32, %v1393_v25  ;;  %2182 = vrot.lane.b32.xlu0 %v2032_v43, %s4109_s27  ;;  %v2034_v32 = vmul.f32 %v5577_v15, %v5786_v28  ;;  %v4007_v43 = vld [vmem:[#allocation2 + $0x180] sm:$0xff]  ;;  %v947_v57 = vmul.f32 %v4008_v0, %v5500_v29 }
 0x1d7   : > { %2184 = vrot.lane.b32.xlu1 %v2033_v62, %s4109_s27  ;;  %v5860_v44 = vadd.f32 %v1908_v19, %v1778_v55  ;;  %v946_v17 = vmul.f32 %v4007_v43, %v5500_v29  ;;  %v1910_v55 = vmul.f32 %v5519_v40, %v5852_v8  ;;  %v5874_v19 = vld [vmem:[#allocation2 + $0x181] sm:$0xff]  ;;  %v1911_v51 = vmul.f32 %v5519_v40, %v5858_v39 }
 0x1d8   : > { %v1619_v60 = vpop.permute.xlu0 %1618  ;;  %v5865_v25 = vadd.f32 %v1909_v45, %v1779_v56  ;;  %v5880_v45 = vld [vmem:[#allocation2 + $0x189] sm:$0xff] }
 0x1d9   : > { %8002 = vst [vmem:[#allocation51_spill] sm:$0xff] %v5860_v44  ;;  %v1780_v12 = vadd.f32 %v1619_v60, %v1394_v50  ;;  %v1621_v38 = vpop.permute.xlu1 %1620  ;;  %v1396_v56 = vadd.f32 %v5352_v13, %v946_v17  ;;  %v1397_v60 = vadd.f32 %v5356_v63, %v947_v57  ;;  %v2037_v13 = vmul.f32 %v5577_v15, %v5814_v27  ;;  %v4010_v17 = vld [vmem:[#allocation2 + $0x1a0] sm:$0xff] }
 0x1da   : > { %8003 = vst [vmem:[#allocation52_spill] sm:$0xff] %v5865_v25  ;;  %v1781_v62 = vadd.f32 %v1621_v38, %v1395_v22  ;;  %2186 = vrot.lane.b32.xlu0 %v2034_v32, %s4109_s27  ;;  %v2036_v38 = vmul.f32 %v5577_v15, %v5808_v9  ;;  %v4009_v32 = vld [vmem:[#allocation2 + $0x198] sm:$0xff]  ;;  %v949_v63 = vmul.f32 %v4010_v17, %v5500_v29 }
 0x1db   : > { %2188 = vrot.lane.b32.xlu1 %v2035_v4, %s4109_s27  ;;  %v5882_v50 = vadd.f32 %v1910_v55, %v1780_v12  ;;  %v948_v0 = vmul.f32 %v4009_v32, %v5500_v29  ;;  %v1912_v12 = vmul.f32 %v5519_v40, %v5874_v19  ;;  %v5896_v55 = vld [vmem:[#allocation2 + $0x199] sm:$0xff]  ;;  %v1913_v57 = vmul.f32 %v5519_v40, %v5880_v45 }
 0x1dc   : > { %v1623_v43 = vpop.permute.xlu0 %1622  ;;  %v5887_v22 = vadd.f32 %v1911_v51, %v1781_v62  ;;  %v5902_v51 = vld [vmem:[#allocation2 + $0x1a1] sm:$0xff] }
 0x1dd   : > { %8004 = vst [vmem:[#allocation53_spill] sm:$0xff] %v5882_v50  ;;  %v1782_v25 = vadd.f32 %v1623_v43, %v1396_v56  ;;  %v1625_v44 = vpop.permute.xlu1 %1624  ;;  %v1398_v62 = vadd.f32 %v5362_v23, %v948_v0  ;;  %v1399_v43 = vadd.f32 %v5366_v5, %v949_v63  ;;  %v2039_v23 = vmul.f32 %v5577_v15, %v5836_v33  ;;  %v4012_v0 = vld [vmem:[#allocation2 + $0x1b8] sm:$0xff] }
 0x1de   : > { %8005 = vst [vmem:[#allocation54_spill] sm:$0xff] %v5887_v22  ;;  %v1783_v4 = vadd.f32 %v1625_v44, %v1397_v60  ;;  %2190 = vrot.lane.b32.xlu0 %v2036_v38, %s4109_s27  ;;  %v2038_v44 = vmul.f32 %v5577_v15, %v5830_v2  ;;  %v4011_v38 = vld [vmem:[#allocation2 + $0x1b0] sm:$0xff]  ;;  %v951_v5 = vmul.f32 %v4012_v0, %v5500_v29 }
 0x1df   : > { %2192 = vrot.lane.b32.xlu1 %v2037_v13, %s4109_s27  ;;  %v5904_v56 = vadd.f32 %v1912_v12, %v1782_v25  ;;  %v950_v17 = vmul.f32 %v4011_v38, %v5500_v29  ;;  %v1914_v25 = vmul.f32 %v5519_v40, %v5896_v55  ;;  %v5918_v12 = vld [vmem:[#allocation2 + $0x1b1] sm:$0xff]  ;;  %v1915_v63 = vmul.f32 %v5519_v40, %v5902_v51 }
 0x1e0   : > { %v1627_v32 = vpop.permute.xlu0 %1626  ;;  %v5909_v60 = vadd.f32 %v1913_v57, %v1783_v4  ;;  %v5924_v57 = vld [vmem:[#allocation2 + $0x1b9] sm:$0xff] }
 0x1e1   : > { %8006 = vst [vmem:[#allocation55_spill] sm:$0xff] %v5904_v56  ;;  %v1784_v22 = vadd.f32 %v1627_v32, %v1398_v62  ;;  %v1629_v50 = vpop.permute.xlu1 %1628  ;;  %v1400_v4 = vadd.f32 %v5372_v31, %v950_v17  ;;  %v1401_v32 = vadd.f32 %v5376_v16, %v951_v5  ;;  %v2041_v31 = vmul.f32 %v5577_v15, %v5858_v39  ;;  %v4014_v17 = vld [vmem:[#allocation2 + $0x1d0] sm:$0xff] }
 0x1e2   : > { %8007 = vst [vmem:[#allocation56_spill] sm:$0xff] %v5909_v60  ;;  %v1785_v13 = vadd.f32 %v1629_v50, %v1399_v43  ;;  %2194 = vrot.lane.b32.xlu0 %v2038_v44, %s4109_s27  ;;  %v2040_v50 = vmul.f32 %v5577_v15, %v5852_v8  ;;  %v4013_v44 = vld [vmem:[#allocation2 + $0x1c8] sm:$0xff]  ;;  %v953_v16 = vmul.f32 %v4014_v17, %v5500_v29 }
 0x1e3   : > { %2196 = vrot.lane.b32.xlu1 %v2039_v23, %s4109_s27  ;;  %v5926_v62 = vadd.f32 %v1914_v25, %v1784_v22  ;;  %v952_v0 = vmul.f32 %v4013_v44, %v5500_v29  ;;  %v1916_v22 = vmul.f32 %v5519_v40, %v5918_v12  ;;  %v5940_v25 = vld [vmem:[#allocation2 + $0x1c9] sm:$0xff]  ;;  %v1917_v5 = vmul.f32 %v5519_v40, %v5924_v57 }
 0x1e4   : > { %v1631_v38 = vpop.permute.xlu0 %1630  ;;  %v5931_v43 = vadd.f32 %v1915_v63, %v1785_v13  ;;  %v5946_v63 = vld [vmem:[#allocation2 + $0x1d1] sm:$0xff] }
 0x1e5   : > { %8008 = vst [vmem:[#allocation57_spill] sm:$0xff] %v5926_v62  ;;  %v1786_v60 = vadd.f32 %v1631_v38, %v1400_v4  ;;  %v1633_v56 = vpop.permute.xlu1 %1632  ;;  %v1402_v13 = vadd.f32 %v5382_v41, %v952_v0  ;;  %v1403_v38 = vadd.f32 %v5386_v24, %v953_v16  ;;  %v2043_v41 = vmul.f32 %v5577_v15, %v5880_v45  ;;  %v4016_v0 = vld [vmem:[#allocation2 + $0x1e8] sm:$0xff] }
 0x1e6   : > { %8009 = vst [vmem:[#allocation58_spill] sm:$0xff] %v5931_v43  ;;  %v1787_v23 = vadd.f32 %v1633_v56, %v1401_v32  ;;  %2198 = vrot.lane.b32.xlu0 %v2040_v50, %s4109_s27  ;;  %v2042_v56 = vmul.f32 %v5577_v15, %v5874_v19  ;;  %v4015_v50 = vld [vmem:[#allocation2 + $0x1e0] sm:$0xff]  ;;  %v955_v24 = vmul.f32 %v4016_v0, %v5500_v29 }
 0x1e7   : > { %2200 = vrot.lane.b32.xlu1 %v2041_v31, %s4109_s27  ;;  %v5948_v4 = vadd.f32 %v1916_v22, %v1786_v60  ;;  %v954_v17 = vmul.f32 %v4015_v50, %v5500_v29  ;;  %v1918_v60 = vmul.f32 %v5519_v40, %v5940_v25  ;;  %v5962_v22 = vld [vmem:[#allocation2 + $0x1e1] sm:$0xff]  ;;  %v1919_v16 = vmul.f32 %v5519_v40, %v5946_v63 }
 0x1e8   : > { %v1635_v44 = vpop.permute.xlu0 %1634  ;;  %v5953_v32 = vadd.f32 %v1917_v5, %v1787_v23  ;;  %v5968_v5 = vld [vmem:[#allocation2 + $0x1e9] sm:$0xff] }
 0x1e9   : > { %8010 = vst [vmem:[#allocation59_spill] sm:$0xff] %v5948_v4  ;;  %v1788_v43 = vadd.f32 %v1635_v44, %v1402_v13  ;;  %v1637_v62 = vpop.permute.xlu1 %1636  ;;  %v1404_v23 = vadd.f32 %v5392_v49, %v954_v17  ;;  %v1405_v44 = vadd.f32 %v5396_v34, %v955_v24  ;;  %v2045_v49 = vmul.f32 %v5577_v15, %v5902_v51  ;;  %v4018_v17 = vld [vmem:[#allocation2 + $0x200] sm:$0xff] }
 0x1ea   : > { %8011 = vst [vmem:[#allocation60_spill] sm:$0xff] %v5953_v32  ;;  %v1789_v31 = vadd.f32 %v1637_v62, %v1403_v38  ;;  %2202 = vrot.lane.b32.xlu0 %v2042_v56, %s4109_s27  ;;  %v2044_v62 = vmul.f32 %v5577_v15, %v5896_v55  ;;  %v4017_v56 = vld [vmem:[#allocation2 + $0x1f8] sm:$0xff]  ;;  %v957_v34 = vmul.f32 %v4018_v17, %v5500_v29 }
 0x1eb   : > { %2204 = vrot.lane.b32.xlu1 %v2043_v41, %s4109_s27  ;;  %v5970_v13 = vadd.f32 %v1918_v60, %v1788_v43  ;;  %v956_v0 = vmul.f32 %v4017_v56, %v5500_v29  ;;  %v1920_v43 = vmul.f32 %v5519_v40, %v5962_v22  ;;  %v5984_v60 = vld [vmem:[#allocation2 + $0x1f9] sm:$0xff]  ;;  %v1921_v24 = vmul.f32 %v5519_v40, %v5968_v5 }
 0x1ec   : > { %v1639_v50 = vpop.permute.xlu0 %1638  ;;  %v5975_v38 = vadd.f32 %v1919_v16, %v1789_v31  ;;  %v5990_v16 = vld [vmem:[#allocation2 + $0x201] sm:$0xff] }
 0x1ed   : > { %8012 = vst [vmem:[#allocation61_spill] sm:$0xff] %v5970_v13  ;;  %v1790_v32 = vadd.f32 %v1639_v50, %v1404_v23  ;;  %v1641_v4 = vpop.permute.xlu1 %1640  ;;  %v1406_v31 = vadd.f32 %v5402_v59, %v956_v0  ;;  %v1407_v50 = vadd.f32 %v5406_v42, %v957_v34  ;;  %v2047_v59 = vmul.f32 %v5577_v15, %v5924_v57  ;;  %v4020_v0 = vld [vmem:[#allocation2 + $0x218] sm:$0xff] }
 0x1ee   : > { %8013 = vst [vmem:[#allocation62_spill] sm:$0xff] %v5975_v38  ;;  %v1791_v41 = vadd.f32 %v1641_v4, %v1405_v44  ;;  %2206 = vrot.lane.b32.xlu0 %v2044_v62, %s4109_s27  ;;  %v2046_v4 = vmul.f32 %v5577_v15, %v5918_v12  ;;  %v4019_v62 = vld [vmem:[#allocation2 + $0x210] sm:$0xff]  ;;  %v959_v42 = vmul.f32 %v4020_v0, %v5500_v29 }
 0x1ef   : > { %2208 = vrot.lane.b32.xlu1 %v2045_v49, %s4109_s27  ;;  %v5992_v23 = vadd.f32 %v1920_v43, %v1790_v32  ;;  %v958_v17 = vmul.f32 %v4019_v62, %v5500_v29  ;;  %v1922_v32 = vmul.f32 %v5519_v40, %v5984_v60  ;;  %v6006_v43 = vld [vmem:[#allocation2 + $0x211] sm:$0xff]  ;;  %v1923_v34 = vmul.f32 %v5519_v40, %v5990_v16 }
 0x1f0   : > { %v1643_v56 = vpop.permute.xlu0 %1642  ;;  %v5997_v44 = vadd.f32 %v1921_v24, %v1791_v41  ;;  %v6012_v24 = vld [vmem:[#allocation2 + $0x219] sm:$0xff] }
 0x1f1   : > { %8014 = vst [vmem:[#allocation63_spill] sm:$0xff] %v5992_v23  ;;  %v1792_v38 = vadd.f32 %v1643_v56, %v1406_v31  ;;  %v1645_v13 = vpop.permute.xlu1 %1644  ;;  %v1408_v41 = vadd.f32 %v5412_v3, %v958_v17  ;;  %v1409_v56 = vadd.f32 %v5416_v52, %v959_v42  ;;  %v2049_v3 = vmul.f32 %v5577_v15, %v5946_v63  ;;  %v4022_v17 = vld [vmem:[#allocation2 + $0x230] sm:$0xff] }
 0x1f2   : > { %8015 = vst [vmem:[#allocation64_spill] sm:$0xff] %v5997_v44  ;;  %v1793_v49 = vadd.f32 %v1645_v13, %v1407_v50  ;;  %2210 = vrot.lane.b32.xlu0 %v2046_v4, %s4109_s27  ;;  %v2048_v13 = vmul.f32 %v5577_v15, %v5940_v25  ;;  %v4021_v4 = vld [vmem:[#allocation2 + $0x228] sm:$0xff]  ;;  %v961_v52 = vmul.f32 %v4022_v17, %v5500_v29 }
 0x1f3   : > { %2212 = vrot.lane.b32.xlu1 %v2047_v59, %s4109_s27  ;;  %v6014_v31 = vadd.f32 %v1922_v32, %v1792_v38  ;;  %v960_v0 = vmul.f32 %v4021_v4, %v5500_v29  ;;  %v1924_v38 = vmul.f32 %v5519_v40, %v6006_v43  ;;  %v6028_v32 = vld [vmem:[#allocation2 + $0x229] sm:$0xff]  ;;  %v1925_v42 = vmul.f32 %v5519_v40, %v6012_v24 }
 0x1f4   : > { %v1647_v62 = vpop.permute.xlu0 %1646  ;;  %v6019_v50 = vadd.f32 %v1923_v34, %v1793_v49  ;;  %v6034_v34 = vld [vmem:[#allocation2 + $0x231] sm:$0xff] }
 0x1f5   : > { %8016 = vst [vmem:[#allocation65_spill] sm:$0xff] %v6014_v31  ;;  %v1794_v44 = vadd.f32 %v1647_v62, %v1408_v41  ;;  %v1649_v23 = vpop.permute.xlu1 %1648  ;;  %v1410_v49 = vadd.f32 %v5422_v18, %v960_v0  ;;  %v8019_v62 = vld [vmem:[#allocation27_spill] sm:$0xff]  ;;  %v2051_v18 = vmul.f32 %v5577_v15, %v5968_v5 }
 0x1f6   : > { %8017 = vst [vmem:[#allocation66_spill] sm:$0xff] %v6019_v50  ;;  %v1795_v59 = vadd.f32 %v1649_v23, %v1409_v56  ;;  %2214 = vrot.lane.b32.xlu0 %v2048_v13, %s4109_s27  ;;  %v1411_v4 = vadd.f32 %v8019_v62, %v961_v52  ;;  %v2050_v23 = vmul.f32 %v5577_v15, %v5962_v22  ;;  %v4023_v13 = vld [vmem:[#allocation2 + $0x240] sm:$0xff]  ;;  %v4024_v0 = vld [vmem:[#allocation2 + $0x248] sm:$0xff] }
 0x1f7   : > { %2216 = vrot.lane.b32.xlu1 %v2049_v3, %s4109_s27  ;;  %v6036_v41 = vadd.f32 %v1924_v38, %v1794_v44  ;;  %v962_v17 = vmul.f32 %v4023_v13, %v5500_v29  ;;  %v1926_v44 = vmul.f32 %v5519_v40, %v6028_v32  ;;  %v963_v3 = vmul.f32 %v4024_v0, %v5500_v29  ;;  %v6050_v52 = vld [vmem:[#allocation2 + $0x241] sm:$0xff]  ;;  %v8023_v13 = vld [vmem:[#allocation29_spill] sm:$0xff] }
 0x1f8   : > { %v1651_v50 = vpop.permute.xlu0 %1650  ;;  %v6041_v56 = vadd.f32 %v1925_v42, %v1795_v59  ;;  %v1927_v59 = vmul.f32 %v5519_v40, %v6034_v34  ;;  %v8021_v42 = vld [vmem:[#allocation28_spill] sm:$0xff] }
 0x1f9   : > { %8018 = vst [vmem:[#allocation67_spill] sm:$0xff] %v6036_v41  ;;  %v1796_v31 = vadd.f32 %v1651_v50, %v1410_v49  ;;  %v1653_v48 = vpop.permute.xlu1 %1652  ;;  %v1412_v50 = vadd.f32 %v8021_v42, %v962_v17  ;;  %v6056_v49 = vld [vmem:[#allocation2 + $0x249] sm:$0xff]  ;;  %v2053_v17 = vmul.f32 %v5577_v15, %v5990_v16  ;;  %v6072_v42 = vld [vmem:[#allocation2 + $0x259] sm:$0xff] }
 0x1fa   : > { %8020 = vst [vmem:[#allocation27_spill] sm:$0xff] %v6041_v56  ;;  %v1797_v38 = vadd.f32 %v1653_v48, %v1411_v4  ;;  %2218 = vrot.lane.b32.xlu0 %v2050_v23, %s4109_s27  ;;  %v1413_v56 = vadd.f32 %v8023_v13, %v963_v3  ;;  %v2052_v48 = vmul.f32 %v5577_v15, %v5984_v60  ;;  %v4025_v23 = vld [vmem:[#allocation2 + $0x258] sm:$0xff]  ;;  %8025 = vst [vmem:[#allocation68_spill] sm:$0xff] %v6072_v42 }
 0x1fb   : > { %2220 = vrot.lane.b32.xlu1 %v2051_v18, %s4109_s27  ;;  %v6058_v62 = vadd.f32 %v1926_v44, %v1796_v31  ;;  %v964_v0 = vmul.f32 %v4025_v23, %v5500_v29  ;;  %v1928_v31 = vmul.f32 %v5519_v40, %v6050_v52  ;;  %v4026_v18 = vld [vmem:[#allocation2 + $0x260] sm:$0xff]  ;;  %v8029_v23 = vld [vmem:[#allocation31_spill] sm:$0xff] }
 0x1fc   : > { %v1655_v41 = vpop.permute.xlu0 %1654  ;;  %v6063_v4 = vadd.f32 %v1927_v59, %v1797_v38  ;;  %v965_v44 = vmul.f32 %v4026_v18, %v5500_v29  ;;  %v1929_v38 = vmul.f32 %v5519_v40, %v6056_v49  ;;  %v8026_v59 = vld [vmem:[#allocation30_spill] sm:$0xff] }
 0x1fd   : > { %8022 = vst [vmem:[#allocation28_spill] sm:$0xff] %v6058_v62  ;;  %v1798_v11 = vadd.f32 %v1655_v41, %v1412_v50  ;;  %v1657_v61 = vpop.permute.xlu1 %1656  ;;  %v1414_v41 = vadd.f32 %v8026_v59, %v964_v0  ;;  %v6078_v50 = vld [vmem:[#allocation2 + $0x261] sm:$0xff]  ;;  %v2055_v0 = vmul.f32 %v5577_v15, %v6012_v24  ;;  %v6094_v59 = vld [vmem:[#allocation2 + $0x271] sm:$0xff] }
 0x1fe   : > { %8024 = vst [vmem:[#allocation29_spill] sm:$0xff] %v6063_v4  ;;  %v1799_v3 = vadd.f32 %v1657_v61, %v1413_v56  ;;  %2222 = vrot.lane.b32.xlu0 %v2052_v48, %s4109_s27  ;;  %8027 = vst [vmem:[#allocation30_spill] sm:$0xff] %v6078_v50  ;;  %v1415_v4 = vadd.f32 %v8029_v23, %v965_v44  ;;  %v2054_v61 = vmul.f32 %v5577_v15, %v6006_v43  ;;  %v4027_v48 = vld [vmem:[#allocation2 + $0x270] sm:$0xff] }
 0x1ff   : > { %2224 = vrot.lane.b32.xlu1 %v2053_v17, %s4109_s27  ;;  %v6080_v13 = vadd.f32 %v1928_v31, %v1798_v11  ;;  %v966_v18 = vmul.f32 %v4027_v48, %v5500_v29  ;;  %v1930_v11 = vmul.f32 %v5519_v40, %v6072_v42  ;;  %v4028_v17 = vld [vmem:[#allocation2 + $0x278] sm:$0xff]  ;;  %8031 = vst [vmem:[#allocation70_spill] sm:$0xff] %v6094_v59 }
 0x200   : > { %v1659_v62 = vpop.permute.xlu0 %1658  ;;  %v6085_v56 = vadd.f32 %v1929_v38, %v1799_v3  ;;  %v967_v31 = vmul.f32 %v4028_v17, %v5500_v29  ;;  %v1931_v3 = vmul.f32 %v5519_v40, %v6078_v50  ;;  %v8032_v38 = vld [vmem:[#allocation32_spill] sm:$0xff]  ;;  %v8035_v48 = vld [vmem:[#allocation33_spill] sm:$0xff] }
 0x201   : > { %8028 = vst [vmem:[#allocation69_spill] sm:$0xff] %v6080_v13  ;;  %v1800_v58 = vadd.f32 %v1659_v62, %v1414_v41  ;;  %v1661_v46 = vpop.permute.xlu1 %1660  ;;  %v1416_v62 = vadd.f32 %v8032_v38, %v966_v18  ;;  %v6100_v41 = vld [vmem:[#allocation2 + $0x279] sm:$0xff]  ;;  %v2057_v18 = vmul.f32 %v5577_v15, %v6034_v34  ;;  %v6116_v38 = vld [vmem:[#allocation2 + $0x289] sm:$0xff] }
 0x202   : > { %8030 = vst [vmem:[#allocation31_spill] sm:$0xff] %v6085_v56  ;;  %v1801_v44 = vadd.f32 %v1661_v46, %v1415_v4  ;;  %2226 = vrot.lane.b32.xlu0 %v2054_v61, %s4109_s27  ;;  %8033 = vst [vmem:[#allocation32_spill] sm:$0xff] %v6100_v41  ;;  %v1417_v56 = vadd.f32 %v8035_v48, %v967_v31  ;;  %v2056_v46 = vmul.f32 %v5577_v15, %v6028_v32  ;;  %v4029_v61 = vld [vmem:[#allocation2 + $0x288] sm:$0xff] }
 0x203   : > { %2228 = vrot.lane.b32.xlu1 %v2055_v0, %s4109_s27  ;;  %v6102_v23 = vadd.f32 %v1930_v11, %v1800_v58  ;;  %v968_v17 = vmul.f32 %v4029_v61, %v5500_v29  ;;  %v1932_v58 = vmul.f32 %v5519_v40, %v6094_v59  ;;  %v4030_v0 = vld [vmem:[#allocation2 + $0x290] sm:$0xff]  ;;  %v8039_v61 = vld [vmem:[#allocation35_spill] sm:$0xff] }
 0x204   : > { %v1663_v13 = vpop.permute.xlu0 %1662  ;;  %v6107_v4 = vadd.f32 %v1931_v3, %v1801_v44  ;;  %v969_v11 = vmul.f32 %v4030_v0, %v5500_v29  ;;  %v1933_v44 = vmul.f32 %v5519_v40, %v6100_v41  ;;  %v8037_v3 = vld [vmem:[#allocation34_spill] sm:$0xff] }
 0x205   : > { %8034 = vst [vmem:[#allocation71_spill] sm:$0xff] %v6102_v23  ;;  %v1802_v20 = vadd.f32 %v1663_v13, %v1416_v62  ;;  %v1665_v53 = vpop.permute.xlu1 %1664  ;;  %v1418_v13 = vadd.f32 %v8037_v3, %v968_v17  ;;  %v6122_v62 = vld [vmem:[#allocation2 + $0x291] sm:$0xff]  ;;  %v2059_v17 = vmul.f32 %v5577_v15, %v6056_v49  ;;  %v6138_v3 = vld [vmem:[#allocation2 + $0x2a1] sm:$0xff] }
 0x206   : > { %8036 = vst [vmem:[#allocation33_spill] sm:$0xff] %v6107_v4  ;;  %v1803_v31 = vadd.f32 %v1665_v53, %v1417_v56  ;;  %2230 = vrot.lane.b32.xlu0 %v2056_v46, %s4109_s27  ;;  %v1419_v4 = vadd.f32 %v8039_v61, %v969_v11  ;;  %v2058_v53 = vmul.f32 %v5577_v15, %v6050_v52  ;;  %v4031_v46 = vld [vmem:[#allocation2 + $0x2a0] sm:$0xff] }
 0x207   : > { %2232 = vrot.lane.b32.xlu1 %v2057_v18, %s4109_s27  ;;  %v6124_v48 = vadd.f32 %v1932_v58, %v1802_v20  ;;  %v970_v0 = vmul.f32 %v4031_v46, %v5500_v29  ;;  %v1934_v20 = vmul.f32 %v5519_v40, %v6116_v38  ;;  %v4032_v18 = vld [vmem:[#allocation2 + $0x2a8] sm:$0xff]  ;;  %v8043_v46 = vld [vmem:[#allocation37_spill] sm:$0xff] }
 0x208   : > { %v1667_v23 = vpop.permute.xlu0 %1666  ;;  %v6129_v56 = vadd.f32 %v1933_v44, %v1803_v31  ;;  %v971_v58 = vmul.f32 %v4032_v18, %v5500_v29  ;;  %v1935_v31 = vmul.f32 %v5519_v40, %v6122_v62  ;;  %v8041_v44 = vld [vmem:[#allocation36_spill] sm:$0xff] }
 0x209   : > { %8038 = vst [vmem:[#allocation34_spill] sm:$0xff] %v6124_v48  ;;  %v1804_v10 = vadd.f32 %v1667_v23, %v1418_v13  ;;  %v1669_v30 = vpop.permute.xlu1 %1668  ;;  %v1420_v23 = vadd.f32 %v8041_v44, %v970_v0  ;;  %v6144_v13 = vld [vmem:[#allocation2 + $0x2a9] sm:$0xff]  ;;  %v2061_v0 = vmul.f32 %v5577_v15, %v6078_v50  ;;  %v6160_v44 = vld [vmem:[#allocation2 + $0x2b9] sm:$0xff] }
 0x20a   : > { %8040 = vst [vmem:[#allocation35_spill] sm:$0xff] %v6129_v56  ;;  %v1805_v11 = vadd.f32 %v1669_v30, %v1419_v4  ;;  %2234 = vrot.lane.b32.xlu0 %v2058_v53, %s4109_s27  ;;  %v1421_v56 = vadd.f32 %v8043_v46, %v971_v58  ;;  %v2060_v30 = vmul.f32 %v5577_v15, %v6072_v42  ;;  %v4033_v53 = vld [vmem:[#allocation2 + $0x2b8] sm:$0xff] }
 0x20b   : > { %2236 = vrot.lane.b32.xlu1 %v2059_v17, %s4109_s27  ;;  %v6146_v61 = vadd.f32 %v1934_v20, %v1804_v10  ;;  %v972_v18 = vmul.f32 %v4033_v53, %v5500_v29  ;;  %v1936_v10 = vmul.f32 %v5519_v40, %v6138_v3  ;;  %v4034_v17 = vld [vmem:[#allocation2 + $0x2c0] sm:$0xff]  ;;  %v8047_v53 = vld [vmem:[#allocation39_spill] sm:$0xff] }
 0x20c   : > { %v1671_v48 = vpop.permute.xlu0 %1670  ;;  %v6151_v4 = vadd.f32 %v1935_v31, %v1805_v11  ;;  %v973_v20 = vmul.f32 %v4034_v17, %v5500_v29  ;;  %v1937_v11 = vmul.f32 %v5519_v40, %v6144_v13  ;;  %v8045_v31 = vld [vmem:[#allocation38_spill] sm:$0xff] }
 0x20d   : > { %8042 = vst [vmem:[#allocation36_spill] sm:$0xff] %v6146_v61  ;;  %v1806_v7 = vadd.f32 %v1671_v48, %v1420_v23  ;;  %v1673_v47 = vpop.permute.xlu1 %1672  ;;  %v1422_v48 = vadd.f32 %v8045_v31, %v972_v18  ;;  %v6166_v23 = vld [vmem:[#allocation2 + $0x2c1] sm:$0xff]  ;;  %v2063_v18 = vmul.f32 %v5577_v15, %v6100_v41  ;;  %v6182_v31 = vld [vmem:[#allocation2 + $0x2d1] sm:$0xff] }
 0x20e   : > { %8044 = vst [vmem:[#allocation37_spill] sm:$0xff] %v6151_v4  ;;  %v1807_v58 = vadd.f32 %v1673_v47, %v1421_v56  ;;  %2238 = vrot.lane.b32.xlu0 %v2060_v30, %s4109_s27  ;;  %v1423_v4 = vadd.f32 %v8047_v53, %v973_v20  ;;  %v2062_v47 = vmul.f32 %v5577_v15, %v6094_v59  ;;  %v4035_v30 = vld [vmem:[#allocation2 + $0x2d0] sm:$0xff] }
 0x20f   : > { %2240 = vrot.lane.b32.xlu1 %v2061_v0, %s4109_s27  ;;  %v6168_v46 = vadd.f32 %v1936_v10, %v1806_v7  ;;  %v974_v17 = vmul.f32 %v4035_v30, %v5500_v29  ;;  %v1938_v7 = vmul.f32 %v5519_v40, %v6160_v44  ;;  %v4036_v0 = vld [vmem:[#allocation2 + $0x2d8] sm:$0xff]  ;;  %v8051_v30 = vld [vmem:[#allocation7_spill] sm:$0xff] }
 0x210   : > { %v1675_v61 = vpop.permute.xlu0 %1674  ;;  %v6173_v56 = vadd.f32 %v1937_v11, %v1807_v58  ;;  %v975_v10 = vmul.f32 %v4036_v0, %v5500_v29  ;;  %v1939_v58 = vmul.f32 %v5519_v40, %v6166_v23  ;;  %v8049_v11 = vld [vmem:[#allocation6_spill] sm:$0xff] }
 0x211   : > { %8046 = vst [vmem:[#allocation38_spill] sm:$0xff] %v6168_v46  ;;  %v1808_v50 = vadd.f32 %v1675_v61, %v1422_v48  ;;  %v1677_v42 = vpop.permute.xlu1 %1676  ;;  %v1424_v61 = vadd.f32 %v8049_v11, %v974_v17  ;;  %v6188_v48 = vld [vmem:[#allocation2 + $0x2d9] sm:$0xff]  ;;  %v2065_v17 = vmul.f32 %v5577_v15, %v6122_v62  ;;  %v6204_v11 = vld [vmem:[#allocation2 + $0x2e9] sm:$0xff] }
 0x212   : > { %8048 = vst [vmem:[#allocation39_spill] sm:$0xff] %v6173_v56  ;;  %v1809_v20 = vadd.f32 %v1677_v42, %v1423_v4  ;;  %2242 = vrot.lane.b32.xlu0 %v2062_v47, %s4109_s27  ;;  %v1425_v56 = vadd.f32 %v8051_v30, %v975_v10  ;;  %v2064_v42 = vmul.f32 %v5577_v15, %v6116_v38  ;;  %v4037_v47 = vld [vmem:[#allocation2 + $0x2e8] sm:$0xff] }
 0x213   : > { %2244 = vrot.lane.b32.xlu1 %v2063_v18, %s4109_s27  ;;  %v6190_v53 = vadd.f32 %v1938_v7, %v1808_v50  ;;  %v976_v0 = vmul.f32 %v4037_v47, %v5500_v29  ;;  %v1940_v50 = vmul.f32 %v5519_v40, %v6182_v31  ;;  %v4038_v18 = vld [vmem:[#allocation2 + $0x2f0] sm:$0xff]  ;;  %v8055_v47 = vld [vmem:[#allocation9_spill] sm:$0xff] }
 0x214   : > { %v1679_v46 = vpop.permute.xlu0 %1678  ;;  %v6195_v4 = vadd.f32 %v1939_v58, %v1809_v20  ;;  %v977_v7 = vmul.f32 %v4038_v18, %v5500_v29  ;;  %v1941_v20 = vmul.f32 %v5519_v40, %v6188_v48  ;;  %v8053_v58 = vld [vmem:[#allocation8_spill] sm:$0xff]  ;;  %v2066_v29 = vmul.f32 %v5577_v15, %v6138_v3 }
 0x215   : > { %8050 = vst [vmem:[#allocation6_spill] sm:$0xff] %v6190_v53  ;;  %v1810_v41 = vadd.f32 %v1679_v46, %v1424_v61  ;;  %v1681_v59 = vpop.permute.xlu1 %1680  ;;  %v1426_v46 = vadd.f32 %v8053_v58, %v976_v0  ;;  %v6210_v61 = vld [vmem:[#allocation2 + $0x2f1] sm:$0xff]  ;;  %v2067_v18 = vmul.f32 %v5577_v15, %v6144_v13  ;;  %v1942_v0 = vmul.f32 %v5519_v40, %v6204_v11 }
 0x216   : > { %8052 = vst [vmem:[#allocation7_spill] sm:$0xff] %v6195_v4  ;;  %v1811_v10 = vadd.f32 %v1681_v59, %v1425_v56  ;;  %2246 = vrot.lane.b32.xlu0 %v2064_v42, %s4109_s27  ;;  %v1427_v4 = vadd.f32 %v8055_v47, %v977_v7  ;;  %v2070_v58 = vmul.f32 %v5577_v15, %v6182_v31 }
 0x217   : > { %2248 = vrot.lane.b32.xlu1 %v2065_v17, %s4109_s27  ;;  %v6212_v30 = vadd.f32 %v1940_v50, %v1810_v41  ;;  %v1943_v41 = vmul.f32 %v5519_v40, %v6210_v61  ;;  %v2071_v47 = vmul.f32 %v5577_v15, %v6188_v48 }
 0x218   : > { %v1683_v53 = vpop.permute.xlu0 %1682  ;;  %v6217_v59 = vadd.f32 %v1941_v20, %v1811_v10 }
 0x219   : > { %8054 = vst [vmem:[#allocation8_spill] sm:$0xff] %v6212_v30  ;;  %v1812_v56 = vadd.f32 %v1683_v53, %v1426_v46  ;;  %v1685_v42 = vpop.permute.xlu1 %1684  ;;  %v2068_v53 = vmul.f32 %v5577_v15, %v6160_v44  ;;  %v4044_v30 = vld [vmem:[#allocation2 + $0x39] sm:$0xff] }
 0x21a   : > { %8056 = vst [vmem:[#allocation9_spill] sm:$0xff] %v6217_v59  ;;  %v1813_v17 = vadd.f32 %v1685_v42, %v1427_v4  ;;  %2250 = vrot.lane.b32.xlu0 %v2066_v29, %s4109_s27  ;;  %v2069_v4 = vmul.f32 %v5577_v15, %v6166_v23 }
 0x21b   : > { %2252 = vrot.lane.b32.xlu1 %v2067_v18, %s4109_s27  ;;  %v6227_v50 = vadd.f32 %v1942_v0, %v1812_v56  ;;  %v2072_v56 = vmul.f32 %v5577_v15, %v6204_v11  ;;  %v2073_v18 = vmul.f32 %v5577_v15, %v6210_v61  ;;  %v6259_v0 = vstv %s3934_s5 }
 0x21c   : > { %v6229_v7 = vpop.permute.xlu0 %2138  ;;  %v6233_v10 = vadd.f32 %v1943_v41, %v1813_v17  ;;  %v4039_v41 = vld [vmem:[#allocation2 + $0x1] sm:$0xff] }
 0x21d   : > { %8057 = vst [vmem:[#allocation72_spill] sm:$0xff] %v6227_v50  ;;  %v6235_v20 = vpop.permute.xlu1 %2140  ;;  %v4042_v50 = vld [vmem:[#allocation2 + $0x21] sm:$0xff] }
 0x21e   : > { %8058 = vst [vmem:[#allocation73_spill] sm:$0xff] %v6233_v10  ;;  %2254 = vrot.lane.b32.xlu0 %v2068_v53, %s4109_s27  ;;  %v2396_v53 = vmul.f32 %v4039_v41, %v6259_v0  ;;  %v4041_v10 = vld [vmem:[#allocation2 + $0x19] sm:$0xff]  ;;  %v2399_v59 = vmul.f32 %v4042_v50, %v6259_v0  ;;  %v4045_v50 = vld [vmem:[#allocation2 + $0x49] sm:$0xff] }
 0x21f   : > { %2256 = vrot.lane.b32.xlu1 %v2069_v4, %s4109_s27 }
 0x220   : > { %v6241_v40 = vpop.permute.xlu0 %2142 }
 0x221   : > { %v6245_v46 = vpop.permute.xlu1 %2144 }
 0x222   : > { %2258 = vrot.lane.b32.xlu0 %v2070_v58, %s4109_s27  ;;  %v4040_v58 = vld [vmem:[#allocation2 + $0x9] sm:$0xff] }
 0x223   : > { %2260 = vrot.lane.b32.xlu1 %v2071_v47, %s4109_s27  ;;  %v2397_v47 = vmul.f32 %v4040_v58, %v6259_v0  ;;  %v4043_v58 = vld [vmem:[#allocation2 + $0x31] sm:$0xff] }
 0x224   : > { %v6251_v29 = vpop.permute.xlu0 %2146 }
 0x225   : > { %v6255_v42 = vpop.permute.xlu1 %2148 }
 0x226   : > { %2262 = vrot.lane.b32.xlu0 %v2072_v56, %s4109_s27  ;;  %v2398_v56 = vmul.f32 %v4041_v10, %v6259_v0 }
 0x227   : > { %2264 = vrot.lane.b32.xlu1 %v2073_v18, %s4109_s27 }
 0x228   : > { %v6263_v17 = vpop.permute.xlu0 %2150 }
 0x229   : > { %v6266_v4 = vpop.permute.xlu1 %2152 }
 0x22a   : > { %2524 = vrot.lane.b32.xlu0 %v2396_v53, %s4110_s29  ;;  %v2400_v53 = vmul.f32 %v4043_v58, %v6259_v0 }
 0x22b   : > { %2526 = vrot.lane.b32.xlu1 %v2397_v47, %s4110_s29 }
 0x22c   : > { %v6271_v15 = vpop.permute.xlu0 %2154 }
 0x22d   : > { %8059 = vst [vmem:[#allocation74_spill] sm:$0xff] %v6271_v15  ;;  %v6274_v18 = vpop.permute.xlu1 %2156  ;;  %v2401_v15 = vmul.f32 %v4044_v30, %v6259_v0  ;;  %v4047_v30 = vld [vmem:[#allocation2 + $0x61] sm:$0xff] }
 0x22e   : > { %8060 = vst [vmem:[#allocation75_spill] sm:$0xff] %v6274_v18  ;;  %2528 = vrot.lane.b32.xlu0 %v2398_v56, %s4110_s29  ;;  %v2402_v56 = vmul.f32 %v4045_v50, %v6259_v0 }
 0x22f   : > { %2530 = vrot.lane.b32.xlu1 %v2399_v59, %s4110_s29 }
 0x230   : > { %v6279_v41 = vpop.permute.xlu0 %2158 }
 0x231   : > { %8061 = vst [vmem:[#allocation76_spill] sm:$0xff] %v6279_v41  ;;  %v6282_v47 = vpop.permute.xlu1 %2160  ;;  %v4046_v41 = vld [vmem:[#allocation2 + $0x51] sm:$0xff] }
 0x232   : > { %8062 = vst [vmem:[#allocation77_spill] sm:$0xff] %v6282_v47  ;;  %2532 = vrot.lane.b32.xlu0 %v2400_v53, %s4110_s29  ;;  %v2403_v18 = vmul.f32 %v4046_v41, %v6259_v0  ;;  %v2404_v53 = vmul.f32 %v4047_v30, %v6259_v0  ;;  %v4049_v41 = vld [vmem:[#allocation2 + $0x79] sm:$0xff] }
 0x233   : > { %2534 = vrot.lane.b32.xlu1 %v2401_v15, %s4110_s29 }
 0x234   : > { %v6287_v10 = vpop.permute.xlu0 %2162 }
 0x235   : > { %8063 = vst [vmem:[#allocation78_spill] sm:$0xff] %v6287_v10  ;;  %v6290_v59 = vpop.permute.xlu1 %2164  ;;  %v4048_v10 = vld [vmem:[#allocation2 + $0x69] sm:$0xff] }
 0x236   : > { %8064 = vst [vmem:[#allocation79_spill] sm:$0xff] %v6290_v59  ;;  %2536 = vrot.lane.b32.xlu0 %v2402_v56, %s4110_s29  ;;  %v2405_v47 = vmul.f32 %v4048_v10, %v6259_v0  ;;  %v2406_v56 = vmul.f32 %v4049_v41, %v6259_v0  ;;  %v4051_v10 = vld [vmem:[#allocation2 + $0x91] sm:$0xff] }
 0x237   : > { %2538 = vrot.lane.b32.xlu1 %v2403_v18, %s4110_s29 }
 0x238   : > { %v6295_v58 = vpop.permute.xlu0 %2166 }
 0x239   : > { %8065 = vst [vmem:[#allocation80_spill] sm:$0xff] %v6295_v58  ;;  %v6298_v15 = vpop.permute.xlu1 %2168  ;;  %v4050_v58 = vld [vmem:[#allocation2 + $0x81] sm:$0xff] }
 0x23a   : > { %8066 = vst [vmem:[#allocation81_spill] sm:$0xff] %v6298_v15  ;;  %2540 = vrot.lane.b32.xlu0 %v2404_v53, %s4110_s29  ;;  %v2407_v59 = vmul.f32 %v4050_v58, %v6259_v0  ;;  %v2408_v53 = vmul.f32 %v4051_v10, %v6259_v0  ;;  %v4053_v58 = vld [vmem:[#allocation2 + $0xa9] sm:$0xff] }
 0x23b   : > { %2542 = vrot.lane.b32.xlu1 %v2405_v47, %s4110_s29 }
 0x23c   : > { %v6303_v50 = vpop.permute.xlu0 %2170 }
 0x23d   : > { %8067 = vst [vmem:[#allocation82_spill] sm:$0xff] %v6303_v50  ;;  %v6306_v18 = vpop.permute.xlu1 %2172  ;;  %v4052_v50 = vld [vmem:[#allocation2 + $0x99] sm:$0xff] }
 0x23e   : > { %8068 = vst [vmem:[#allocation83_spill] sm:$0xff] %v6306_v18  ;;  %2544 = vrot.lane.b32.xlu0 %v2406_v56, %s4110_s29  ;;  %v2409_v15 = vmul.f32 %v4052_v50, %v6259_v0  ;;  %v2410_v56 = vmul.f32 %v4053_v58, %v6259_v0  ;;  %v2412_v50 = vmul.f32 %v6259_v0, %v5698_v1 }
 0x23f   : > { %2546 = vrot.lane.b32.xlu1 %v2407_v59, %s4110_s29 }
 0x240   : > { %v6311_v30 = vpop.permute.xlu0 %2174 }
 0x241   : > { %8069 = vst [vmem:[#allocation84_spill] sm:$0xff] %v6311_v30  ;;  %v6314_v47 = vpop.permute.xlu1 %2176  ;;  %v4054_v30 = vld [vmem:[#allocation2 + $0xb1] sm:$0xff] }
 0x242   : > { %2548 = vrot.lane.b32.xlu0 %v2408_v53, %s4110_s29  ;;  %v2411_v18 = vmul.f32 %v4054_v30, %v6259_v0  ;;  %v2413_v53 = vmul.f32 %v6259_v0, %v5704_v6  ;;  %v2414_v30 = vmul.f32 %v6259_v0, %v5720_v35  ;;  %v2416_v6 = vmul.f32 %v6259_v0, %v5742_v54 }
 0x243   : > { %2550 = vrot.lane.b32.xlu1 %v2409_v15, %s4110_s29 }
 0x244   : > { %v6319_v41 = vpop.permute.xlu0 %2178 }
 0x245   : > { %v6322_v59 = vpop.permute.xlu1 %2180 }
 0x246   : > { %2552 = vrot.lane.b32.xlu0 %v2410_v56, %s4110_s29  ;;  %v2415_v56 = vmul.f32 %v6259_v0, %v5726_v36  ;;  %v2418_v36 = vmul.f32 %v6259_v0, %v5764_v21 }
 0x247   : > { %2554 = vrot.lane.b32.xlu1 %v2411_v18, %s4110_s29 }
 0x248   : > { %v6327_v10 = vpop.permute.xlu0 %2182 }
 0x249   : > { %8070 = vst [vmem:[#allocation85_spill] sm:$0xff] %v6327_v10  ;;  %v6331_v15 = vpop.permute.xlu1 %2184 }
 0x24a   : > { %8071 = vst [vmem:[#allocation86_spill] sm:$0xff] %v6331_v15  ;;  %2556 = vrot.lane.b32.xlu0 %v2412_v50, %s4110_s29 }
 0x24b   : > { %2558 = vrot.lane.b32.xlu1 %v2413_v53, %s4110_s29  ;;  %v2417_v53 = vmul.f32 %v6259_v0, %v5748_v37  ;;  %v2420_v37 = vmul.f32 %v6259_v0, %v5786_v28 }
 0x24c   : > { %v6337_v58 = vpop.permute.xlu0 %2186 }
 0x24d   : > { %8072 = vst [vmem:[#allocation87_spill] sm:$0xff] %v6337_v58  ;;  %v6341_v18 = vpop.permute.xlu1 %2188  ;;  %v8087_v58 = vld [vmem:[#allocation13_spill] sm:$0xff] }
 0x24e   : > { %8073 = vst [vmem:[#allocation88_spill] sm:$0xff] %v6341_v18  ;;  %2560 = vrot.lane.b32.xlu0 %v2414_v30, %s4110_s29  ;;  %v6538_v18 = vstv %s3935_s6 }
 0x24f   : > { %2562 = vrot.lane.b32.xlu1 %v2415_v56, %s4110_s29  ;;  %v2419_v56 = vmul.f32 %v6259_v0, %v5770_v26  ;;  %v2422_v26 = vmul.f32 %v6259_v0, %v5808_v9 }
 0x250   : > { %v6347_v1 = vpop.permute.xlu0 %2190 }
 0x251   : > { %8074 = vst [vmem:[#allocation89_spill] sm:$0xff] %v6347_v1  ;;  %v6351_v50 = vpop.permute.xlu1 %2192 }
 0x252   : > { %8075 = vst [vmem:[#allocation90_spill] sm:$0xff] %v6351_v50  ;;  %2564 = vrot.lane.b32.xlu0 %v2416_v6, %s4110_s29  ;;  %v8085_v50 = vld [vmem:[#allocation32_spill] sm:$0xff] }
 0x253   : > { %2566 = vrot.lane.b32.xlu1 %v2417_v53, %s4110_s29  ;;  %v2421_v53 = vmul.f32 %v6259_v0, %v5792_v14  ;;  %v2424_v14 = vmul.f32 %v6259_v0, %v5830_v2  ;;  %v2449_v1 = vmul.f32 %v6259_v0, %v8085_v50 }
 0x254   : > { %v6357_v35 = vpop.permute.xlu0 %2194 }
 0x255   : > { %8076 = vst [vmem:[#allocation91_spill] sm:$0xff] %v6357_v35  ;;  %v6361_v30 = vpop.permute.xlu1 %2196 }
 0x256   : > { %8077 = vst [vmem:[#allocation92_spill] sm:$0xff] %v6361_v30  ;;  %2568 = vrot.lane.b32.xlu0 %v2418_v36, %s4110_s29  ;;  %v8083_v30 = vld [vmem:[#allocation30_spill] sm:$0xff] }
 0x257   : > { %2570 = vrot.lane.b32.xlu1 %v2419_v56, %s4110_s29  ;;  %v2423_v56 = vmul.f32 %v6259_v0, %v5814_v27  ;;  %v2426_v27 = vmul.f32 %v6259_v0, %v5852_v8  ;;  %v2447_v35 = vmul.f32 %v6259_v0, %v8083_v30 }
 0x258   : > { %v6367_v54 = vpop.permute.xlu0 %2198 }
 0x259   : > { %8078 = vst [vmem:[#allocation93_spill] sm:$0xff] %v6367_v54  ;;  %v6371_v6 = vpop.permute.xlu1 %2200 }
 0x25a   : > { %8079 = vst [vmem:[#allocation94_spill] sm:$0xff] %v6371_v6  ;;  %2572 = vrot.lane.b32.xlu0 %v2420_v37, %s4110_s29 }
 0x25b   : > { %2574 = vrot.lane.b32.xlu1 %v2421_v53, %s4110_s29  ;;  %v2425_v53 = vmul.f32 %v6259_v0, %v5836_v33  ;;  %v2428_v33 = vmul.f32 %v6259_v0, %v5874_v19 }
 0x25c   : > { %v6377_v21 = vpop.permute.xlu0 %2202 }
 0x25d   : > { %8080 = vst [vmem:[#allocation95_spill] sm:$0xff] %v6377_v21  ;;  %v6381_v36 = vpop.permute.xlu1 %2204 }
 0x25e   : > { %8081 = vst [vmem:[#allocation96_spill] sm:$0xff] %v6381_v36  ;;  %2576 = vrot.lane.b32.xlu0 %v2422_v26, %s4110_s29  ;;  %v2455_v36 = vmul.f32 %v6259_v0, %v6166_v23 }
 0x25f   : > { %2578 = vrot.lane.b32.xlu1 %v2423_v56, %s4110_s29  ;;  %v2427_v56 = vmul.f32 %v6259_v0, %v5858_v39  ;;  %v2430_v39 = vmul.f32 %v6259_v0, %v5896_v55 }
 0x260   : > { %v6387_v28 = vpop.permute.xlu0 %2206 }
 0x261   : > { %v6391_v37 = vpop.permute.xlu1 %2208 }
 0x262   : > { %2580 = vrot.lane.b32.xlu0 %v2424_v14, %s4110_s29 }
 0x263   : > { %2582 = vrot.lane.b32.xlu1 %v2425_v53, %s4110_s29  ;;  %v2429_v53 = vmul.f32 %v6259_v0, %v5880_v45  ;;  %v2432_v45 = vmul.f32 %v6259_v0, %v5918_v12 }
 0x264   : > { %v6397_v9 = vpop.permute.xlu0 %2210 }
 0x265   : > { %v6401_v26 = vpop.permute.xlu1 %2212 }
 0x266   : > { %2584 = vrot.lane.b32.xlu0 %v2426_v27, %s4110_s29 }
 0x267   : > { %2586 = vrot.lane.b32.xlu1 %v2427_v56, %s4110_s29  ;;  %v2431_v56 = vmul.f32 %v6259_v0, %v5902_v51  ;;  %v2434_v51 = vmul.f32 %v6259_v0, %v5940_v25 }
 0x268   : > { %v6407_v2 = vpop.permute.xlu0 %2214 }
 0x269   : > { %v6411_v14 = vpop.permute.xlu1 %2216 }
 0x26a   : > { %2588 = vrot.lane.b32.xlu0 %v2428_v33, %s4110_s29 }
 0x26b   : > { %2590 = vrot.lane.b32.xlu1 %v2429_v53, %s4110_s29  ;;  %v2433_v53 = vmul.f32 %v6259_v0, %v5924_v57  ;;  %v2436_v57 = vmul.f32 %v6259_v0, %v5962_v22 }
 0x26c   : > { %v6417_v8 = vpop.permute.xlu0 %2218 }
 0x26d   : > { %v6421_v27 = vpop.permute.xlu1 %2220 }
 0x26e   : > { %2592 = vrot.lane.b32.xlu0 %v2430_v39, %s4110_s29 }
 0x26f   : > { %2594 = vrot.lane.b32.xlu1 %v2431_v56, %s4110_s29  ;;  %v2435_v56 = vmul.f32 %v6259_v0, %v5946_v63  ;;  %v2438_v63 = vmul.f32 %v6259_v0, %v5984_v60 }
 0x270   : > { %v6427_v19 = vpop.permute.xlu0 %2222 }
 0x271   : > { %v6431_v33 = vpop.permute.xlu1 %2224 }
 0x272   : > { %2596 = vrot.lane.b32.xlu0 %v2432_v45, %s4110_s29 }
 0x273   : > { %2598 = vrot.lane.b32.xlu1 %v2433_v53, %s4110_s29  ;;  %v2437_v53 = vmul.f32 %v6259_v0, %v5968_v5  ;;  %v2440_v5 = vmul.f32 %v6259_v0, %v6006_v43 }
 0x274   : > { %v6437_v55 = vpop.permute.xlu0 %2226 }
 0x275   : > { %v6441_v39 = vpop.permute.xlu1 %2228 }
 0x276   : > { %2600 = vrot.lane.b32.xlu0 %v2434_v51, %s4110_s29 }
 0x277   : > { %2602 = vrot.lane.b32.xlu1 %v2435_v56, %s4110_s29  ;;  %v2439_v56 = vmul.f32 %v6259_v0, %v5990_v16  ;;  %v2442_v16 = vmul.f32 %v6259_v0, %v6028_v32 }
 0x278   : > { %v6447_v12 = vpop.permute.xlu0 %2230 }
 0x279   : > { %v6451_v45 = vpop.permute.xlu1 %2232 }
 0x27a   : > { %2604 = vrot.lane.b32.xlu0 %v2436_v57, %s4110_s29 }
 0x27b   : > { %2606 = vrot.lane.b32.xlu1 %v2437_v53, %s4110_s29  ;;  %v2441_v53 = vmul.f32 %v6259_v0, %v6012_v24  ;;  %v2444_v24 = vmul.f32 %v6259_v0, %v6050_v52 }
 0x27c   : > { %v6457_v25 = vpop.permute.xlu0 %2234 }
 0x27d   : > { %v6461_v51 = vpop.permute.xlu1 %2236 }
 0x27e   : > { %2608 = vrot.lane.b32.xlu0 %v2438_v63, %s4110_s29 }
 0x27f   : > { %2610 = vrot.lane.b32.xlu1 %v2439_v56, %s4110_s29  ;;  %v2443_v56 = vmul.f32 %v6259_v0, %v6034_v34  ;;  %v8082_v34 = vld [vmem:[#allocation68_spill] sm:$0xff] }
 0x280   : > { %v6467_v22 = vpop.permute.xlu0 %2238 }
 0x281   : > { %v6471_v57 = vpop.permute.xlu1 %2240 }
 0x282   : > { %2612 = vrot.lane.b32.xlu0 %v2440_v5, %s4110_s29 }
 0x283   : > { %2614 = vrot.lane.b32.xlu1 %v2441_v53, %s4110_s29  ;;  %v2445_v53 = vmul.f32 %v6259_v0, %v6056_v49  ;;  %v8084_v49 = vld [vmem:[#allocation70_spill] sm:$0xff] }
 0x284   : > { %v6477_v60 = vpop.permute.xlu0 %2242 }
 0x285   : > { %v6481_v63 = vpop.permute.xlu1 %2244 }
 0x286   : > { %2616 = vrot.lane.b32.xlu0 %v2442_v16, %s4110_s29  ;;  %v2446_v16 = vmul.f32 %v6259_v0, %v8082_v34 }
 0x287   : > { %2618 = vrot.lane.b32.xlu1 %v2443_v56, %s4110_s29 }
 0x288   : > { %v6487_v43 = vpop.permute.xlu0 %2246 }
 0x289   : > { %v6491_v5 = vpop.permute.xlu1 %2248 }
 0x28a   : > { %2620 = vrot.lane.b32.xlu0 %v2444_v24, %s4110_s29  ;;  %v2448_v24 = vmul.f32 %v6259_v0, %v8084_v49  ;;  %v2452_v49 = vmul.f32 %v6259_v0, %v6138_v3  ;;  %v2331_v3 = vadd.f32 %v6235_v20, %v8087_v58  ;;  %v8088_v58 = vld [vmem:[#allocation14_spill] sm:$0xff] }
 0x28b   : > { %2622 = vrot.lane.b32.xlu1 %v2445_v53, %s4110_s29 }
 0x28c   : > { %v6497_v32 = vpop.permute.xlu0 %2250 }
 0x28d   : > { %v6501_v56 = vpop.permute.xlu1 %2252 }
 0x28e   : > { %2624 = vrot.lane.b32.xlu0 %v2446_v16, %s4110_s29  ;;  %v2451_v16 = vmul.f32 %v6259_v0, %v6122_v62  ;;  %v8086_v62 = vld [vmem:[#allocation10_spill] sm:$0xff] }
 0x28f   : > { %2626 = vrot.lane.b32.xlu1 %v2447_v35, %s4110_s29  ;;  %v2450_v35 = vmul.f32 %v6259_v0, %v6116_v38  ;;  %v6536_v38 = vld [vmem:[#allocation2 + $0x2] sm:$0xff] }
 0x290   : > { %v6507_v52 = vpop.permute.xlu0 %2254 }
 0x291   : > { %v6511_v53 = vpop.permute.xlu1 %2256 }
 0x292   : > { %2628 = vrot.lane.b32.xlu0 %v2448_v24, %s4110_s29  ;;  %v2453_v24 = vmul.f32 %v6259_v0, %v6144_v13  ;;  %v2454_v13 = vmul.f32 %v6259_v0, %v6160_v44  ;;  %v2332_v44 = vadd.f32 %v6241_v40, %v8088_v58  ;;  %v2457_v40 = vmul.f32 %v6259_v0, %v6188_v48  ;;  %v8096_v58 = vld [vmem:[#allocation16_spill] sm:$0xff] }
 0x293   : > { %2630 = vrot.lane.b32.xlu1 %v2449_v1, %s4110_s29 }
 0x294   : > { %v6517_v30 = vpop.permute.xlu0 %2258 }
 0x295   : > { %v6521_v34 = vpop.permute.xlu1 %2260 }
 0x296   : > { %2632 = vrot.lane.b32.xlu0 %v2450_v35, %s4110_s29  ;;  %v2330_v35 = vadd.f32 %v6229_v7, %v8086_v62  ;;  %v2846_v7 = vmul.f32 %v6538_v18, %v6536_v38  ;;  %v6556_v62 = vld [vmem:[#allocation2 + $0x1a] sm:$0xff] }
 0x297   : > { %2634 = vrot.lane.b32.xlu1 %v2451_v16, %s4110_s29  ;;  %v6543_v16 = vld [vmem:[#allocation2 + $0xa] sm:$0xff] }
 0x298   : > { %v6527_v50 = vpop.permute.xlu0 %2262  ;;  %v2847_v20 = vmul.f32 %v6538_v18, %v6543_v16 }
 0x299   : > { %v6531_v1 = vpop.permute.xlu1 %2264 }
 0x29a   : > { %2636 = vrot.lane.b32.xlu0 %v2452_v49, %s4110_s29 }
 0x29b   : > { %2638 = vrot.lane.b32.xlu1 %v2453_v24, %s4110_s29 }
 0x29c   : > { %v2525_v15 = vpop.permute.xlu0 %2524 }
 0x29d   : > { %v2716_v10 = vadd.f32 %v2525_v15, %v2330_v35  ;;  %v2527_v49 = vpop.permute.xlu1 %2526  ;;  %v6563_v15 = vld [vmem:[#allocation2 + $0x22] sm:$0xff] }
 0x29e   : > { %v2717_v24 = vadd.f32 %v2527_v49, %v2331_v3  ;;  %2640 = vrot.lane.b32.xlu0 %v2454_v13, %s4110_s29  ;;  %v8090_v35 = vld [vmem:[#allocation11_spill] sm:$0xff]  ;;  %v2456_v13 = vmul.f32 %v6259_v0, %v6182_v31  ;;  %v8093_v31 = vld [vmem:[#allocation12_spill] sm:$0xff] }
 0x29f   : > { %2642 = vrot.lane.b32.xlu1 %v2455_v36, %s4110_s29  ;;  %v6565_v23 = vadd.f32 %v2846_v7, %v2716_v10  ;;  %v2333_v21 = vadd.f32 %v6245_v46, %v8090_v35  ;;  %v2848_v36 = vmul.f32 %v6538_v18, %v6556_v62  ;;  %v6578_v7 = vld [vmem:[#allocation2 + $0x32] sm:$0xff]  ;;  %v2849_v46 = vmul.f32 %v6538_v18, %v6563_v15 }
 0x2a0   : > { %v2529_v3 = vpop.permute.xlu0 %2528  ;;  %v6571_v49 = vadd.f32 %v2847_v20, %v2717_v24  ;;  %8092 = vst [vmem:[#allocation70_spill] sm:$0xff] %v6578_v7  ;;  %v2334_v24 = vadd.f32 %v6251_v29, %v8093_v31  ;;  %v6585_v20 = vld [vmem:[#allocation2 + $0x3a] sm:$0xff]  ;;  %v2459_v29 = vmul.f32 %v6259_v0, %v6210_v61  ;;  %v6598_v31 = vstv %s6551_s7 }
 0x2a1   : > { %8089 = vst [vmem:[#allocation68_spill] sm:$0xff] %v6565_v23  ;;  %v2718_v6 = vadd.f32 %v2529_v3, %v2332_v44  ;;  %v2531_v54 = vpop.permute.xlu1 %2530  ;;  %8094 = vst [vmem:[#allocation32_spill] sm:$0xff] %v6585_v20  ;;  %v2335_v44 = vadd.f32 %v6255_v42, %v8096_v58  ;;  %v6603_v42 = vld [vmem:[#allocation2 + $0x4a] sm:$0xff] }
 0x2a2   : > { %8091 = vst [vmem:[#allocation30_spill] sm:$0xff] %v6571_v49  ;;  %v2719_v10 = vadd.f32 %v2531_v54, %v2333_v21  ;;  %2644 = vrot.lane.b32.xlu0 %v2456_v13, %s4110_s29  ;;  %v2458_v21 = vmul.f32 %v6259_v0, %v6204_v11  ;;  %8098 = vst [vmem:[#allocation14_spill] sm:$0xff] %v6603_v42  ;;  %v2851_v11 = vmul.f32 %v6538_v18, %v6585_v20  ;;  %v8102_v0 = vld [vmem:[#allocation15_spill] sm:$0xff] }
 0x2a3   : > { %2646 = vrot.lane.b32.xlu1 %v2457_v40, %s4110_s29  ;;  %v6587_v48 = vadd.f32 %v2848_v36, %v2718_v6  ;;  %v2850_v6 = vmul.f32 %v6538_v18, %v6578_v7  ;;  %v8099_v36 = vld [vmem:[#allocation17_spill] sm:$0xff] }
 0x2a4   : > { %v2533_v54 = vpop.permute.xlu0 %2532  ;;  %v6593_v35 = vadd.f32 %v2849_v46, %v2719_v10  ;;  %v2336_v10 = vadd.f32 %v6263_v17, %v8099_v36  ;;  %v6610_v46 = vld [vmem:[#allocation2 + $0x52] sm:$0xff]  ;;  %v2977_v17 = vmul.f32 %v6598_v31, %v6543_v16 }
 0x2a5   : > { %8095 = vst [vmem:[#allocation10_spill] sm:$0xff] %v6587_v48  ;;  %v2720_v3 = vadd.f32 %v2533_v54, %v2334_v24  ;;  %v2535_v13 = vpop.permute.xlu1 %2534  ;;  %8100 = vst [vmem:[#allocation11_spill] sm:$0xff] %v6610_v46  ;;  %v2337_v24 = vadd.f32 %v6266_v4, %v8102_v0  ;;  %v2853_v4 = vmul.f32 %v6538_v18, %v6610_v46  ;;  %v8106_v0 = vld [vmem:[#allocation74_spill] sm:$0xff] }
 0x2a6   : > { %8097 = vst [vmem:[#allocation13_spill] sm:$0xff] %v6593_v35  ;;  %v2721_v40 = vadd.f32 %v2535_v13, %v2335_v44  ;;  %2648 = vrot.lane.b32.xlu0 %v2458_v21, %s4110_s29  ;;  %v2976_v44 = vmul.f32 %v6598_v31, %v6536_v38 }
 0x2a7   : > { %2650 = vrot.lane.b32.xlu1 %v2459_v29, %s4110_s29  ;;  %v6612_v61 = vadd.f32 %v2850_v6, %v2720_v3  ;;  %v2852_v29 = vmul.f32 %v6538_v18, %v6603_v42  ;;  %v6625_v3 = vld [vmem:[#allocation2 + $0x62] sm:$0xff] }
 0x2a8   : > { %v2537_v58 = vpop.permute.xlu0 %2536  ;;  %v6618_v54 = vadd.f32 %v2851_v11, %v2721_v40  ;;  %8104 = vst [vmem:[#allocation17_spill] sm:$0xff] %v6625_v3  ;;  %v8105_v6 = vld [vmem:[#allocation19_spill] sm:$0xff] }
 0x2a9   : > { %8101 = vst [vmem:[#allocation12_spill] sm:$0xff] %v6612_v61  ;;  %v2722_v21 = vadd.f32 %v2537_v58, %v2336_v10  ;;  %v2539_v13 = vpop.permute.xlu1 %2538  ;;  %v2338_v40 = vadd.f32 %v8106_v0, %v8105_v6  ;;  %v6632_v11 = vld [vmem:[#allocation2 + $0x6a] sm:$0xff]  ;;  %v8109_v58 = vld [vmem:[#allocation18_spill] sm:$0xff]  ;;  %v2979_v6 = vmul.f32 %v6598_v31, %v6563_v15 }
 0x2aa   : > { %8103 = vst [vmem:[#allocation16_spill] sm:$0xff] %v6618_v54  ;;  %v2723_v36 = vadd.f32 %v2539_v13, %v2337_v24  ;;  %3104 = vrot.lane.b32.xlu0 %v2976_v44, %s4109_s27  ;;  %8107 = vst [vmem:[#allocation15_spill] sm:$0xff] %v6632_v11  ;;  %v8110_v54 = vld [vmem:[#allocation75_spill] sm:$0xff]  ;;  %v2978_v44 = vmul.f32 %v6598_v31, %v6556_v62 }
 0x2ab   : > { %3106 = vrot.lane.b32.xlu1 %v2977_v17, %s4109_s27  ;;  %v6634_v10 = vadd.f32 %v2852_v29, %v2722_v21  ;;  %v2339_v61 = vadd.f32 %v8110_v54, %v8109_v58  ;;  %v2854_v17 = vmul.f32 %v6538_v18, %v6625_v3  ;;  %v6647_v21 = vld [vmem:[#allocation2 + $0x7a] sm:$0xff]  ;;  %v2855_v54 = vmul.f32 %v6538_v18, %v6632_v11  ;;  %v8112_v29 = vld [vmem:[#allocation20_spill] sm:$0xff] }
 0x2ac   : > { %v2541_v24 = vpop.permute.xlu0 %2540  ;;  %v6640_v13 = vadd.f32 %v2853_v4, %v2723_v36  ;;  %v8113_v58 = vld [vmem:[#allocation76_spill] sm:$0xff]  ;;  %v6654_v4 = vld [vmem:[#allocation2 + $0x82] sm:$0xff] }
 0x2ad   : > { %8108 = vst [vmem:[#allocation19_spill] sm:$0xff] %v6634_v10  ;;  %v2724_v35 = vadd.f32 %v2541_v24, %v2338_v40  ;;  %v2543_v48 = vpop.permute.xlu1 %2542  ;;  %v2340_v36 = vadd.f32 %v8113_v58, %v8112_v29  ;;  %8114 = vst [vmem:[#allocation18_spill] sm:$0xff] %v6654_v4  ;;  %v8116_v24 = vld [vmem:[#allocation21_spill] sm:$0xff]  ;;  %v2981_v29 = vmul.f32 %v6598_v31, %v6585_v20 }
 0x2ae   : > { %8111 = vst [vmem:[#allocation74_spill] sm:$0xff] %v6640_v13  ;;  %v2725_v0 = vadd.f32 %v2543_v48, %v2339_v61  ;;  %3108 = vrot.lane.b32.xlu0 %v2978_v44, %s4109_s27  ;;  %v8117_v13 = vld [vmem:[#allocation77_spill] sm:$0xff]  ;;  %v2980_v61 = vmul.f32 %v6598_v31, %v6578_v7 }
 0x2af   : > { %3110 = vrot.lane.b32.xlu1 %v2979_v6, %s4109_s27  ;;  %v6656_v40 = vadd.f32 %v2854_v17, %v2724_v35  ;;  %v2341_v10 = vadd.f32 %v8117_v13, %v8116_v24  ;;  %v2856_v6 = vmul.f32 %v6538_v18, %v6647_v21  ;;  %v6669_v35 = vld [vmem:[#allocation2 + $0x92] sm:$0xff]  ;;  %v2857_v13 = vmul.f32 %v6538_v18, %v6654_v4  ;;  %v8119_v17 = vld [vmem:[#allocation22_spill] sm:$0xff] }
 0x2b0   : > { %v2545_v48 = vpop.permute.xlu0 %2544  ;;  %v6662_v44 = vadd.f32 %v2855_v54, %v2725_v0  ;;  %v8120_v24 = vld [vmem:[#allocation78_spill] sm:$0xff] }
 0x2b1   : > { %8115 = vst [vmem:[#allocation75_spill] sm:$0xff] %v6656_v40  ;;  %v2726_v49 = vadd.f32 %v2545_v48, %v2340_v36  ;;  %v2547_v23 = vpop.permute.xlu1 %2546  ;;  %v2342_v0 = vadd.f32 %v8120_v24, %v8119_v17  ;;  %v6676_v54 = vld [vmem:[#allocation2 + $0x9a] sm:$0xff]  ;;  %v8122_v48 = vld [vmem:[#allocation23_spill] sm:$0xff]  ;;  %v2983_v17 = vmul.f32 %v6598_v31, %v6610_v46 }
 0x2b2   : > { %8118 = vst [vmem:[#allocation20_spill] sm:$0xff] %v6662_v44  ;;  %v2727_v58 = vadd.f32 %v2547_v23, %v2341_v10  ;;  %3112 = vrot.lane.b32.xlu0 %v2980_v61, %s4109_s27  ;;  %v8123_v44 = vld [vmem:[#allocation79_spill] sm:$0xff]  ;;  %v2982_v10 = vmul.f32 %v6598_v31, %v6603_v42 }
 0x2b3   : > { %3114 = vrot.lane.b32.xlu1 %v2981_v29, %s4109_s27  ;;  %v6678_v36 = vadd.f32 %v2856_v6, %v2726_v49  ;;  %v2343_v40 = vadd.f32 %v8123_v44, %v8122_v48  ;;  %v2858_v29 = vmul.f32 %v6538_v18, %v6669_v35  ;;  %v6691_v49 = vld [vmem:[#allocation2 + $0xaa] sm:$0xff]  ;;  %v2859_v44 = vmul.f32 %v6538_v18, %v6676_v54 }
 0x2b4   : > { %v2549_v23 = vpop.permute.xlu0 %2548  ;;  %v6684_v61 = vadd.f32 %v2857_v13, %v2727_v58  ;;  %v8125_v6 = vld [vmem:[#allocation24_spill] sm:$0xff] }
 0x2b5   : > { %8121 = vst [vmem:[#allocation76_spill] sm:$0xff] %v6678_v36  ;;  %v2728_v20 = vadd.f32 %v2549_v23, %v2342_v0  ;;  %v2551_v7 = vpop.permute.xlu1 %2550  ;;  %v8126_v48 = vld [vmem:[#allocation80_spill] sm:$0xff]  ;;  %v8128_v23 = vld [vmem:[#allocation25_spill] sm:$0xff] }
 0x2b6   : > { %8124 = vst [vmem:[#allocation21_spill] sm:$0xff] %v6684_v61  ;;  %v2729_v24 = vadd.f32 %v2551_v7, %v2343_v40  ;;  %3116 = vrot.lane.b32.xlu0 %v2982_v10, %s4109_s27  ;;  %v2344_v58 = vadd.f32 %v8126_v48, %v8125_v6  ;;  %v6698_v13 = vld [vmem:[#allocation2 + $0xb2] sm:$0xff]  ;;  %v2984_v40 = vmul.f32 %v6598_v31, %v6625_v3 }
 0x2b7   : > { %3118 = vrot.lane.b32.xlu1 %v2983_v17, %s4109_s27  ;;  %v6700_v0 = vadd.f32 %v2858_v29, %v2728_v20  ;;  %v8129_v61 = vld [vmem:[#allocation81_spill] sm:$0xff]  ;;  %v2985_v6 = vmul.f32 %v6598_v31, %v6632_v11  ;;  %v2860_v17 = vmul.f32 %v6538_v18, %v6691_v49  ;;  %v6713_v20 = vld [vmem:[#allocation2 + $0xc2] sm:$0xff] }
 0x2b8   : > { %v2345_v36 = vadd.f32 %v8129_v61, %v8128_v23  ;;  %v2553_v7 = vpop.permute.xlu0 %2552  ;;  %v6706_v10 = vadd.f32 %v2859_v44, %v2729_v24  ;;  %v2861_v61 = vmul.f32 %v6538_v18, %v6698_v13  ;;  %v8131_v29 = vld [vmem:[#allocation26_spill] sm:$0xff]  ;;  %v6720_v44 = vld [vmem:[#allocation2 + $0xca] sm:$0xff] }
 0x2b9   : > { %8127 = vst [vmem:[#allocation77_spill] sm:$0xff] %v6700_v0  ;;  %v2730_v46 = vadd.f32 %v2553_v7, %v2344_v58  ;;  %v2555_v42 = vpop.permute.xlu1 %2554  ;;  %v8132_v23 = vld [vmem:[#allocation82_spill] sm:$0xff]  ;;  %v8134_v7 = vld [vmem:[#allocation40_spill] sm:$0xff] }
 0x2ba   : > { %8130 = vst [vmem:[#allocation22_spill] sm:$0xff] %v6706_v10  ;;  %v2731_v48 = vadd.f32 %v2555_v42, %v2345_v36  ;;  %3120 = vrot.lane.b32.xlu0 %v2984_v40, %s4109_s27  ;;  %v2346_v24 = vadd.f32 %v8132_v23, %v8131_v29  ;;  %v8135_v10 = vld [vmem:[#allocation83_spill] sm:$0xff]  ;;  %v2986_v36 = vmul.f32 %v6598_v31, %v6647_v21 }
 0x2bb   : > { %3122 = vrot.lane.b32.xlu1 %v2985_v6, %s4109_s27  ;;  %v6722_v58 = vadd.f32 %v2860_v17, %v2730_v46  ;;  %v2347_v0 = vadd.f32 %v8135_v10, %v8134_v7  ;;  %v2987_v29 = vmul.f32 %v6598_v31, %v6654_v4  ;;  %v2862_v6 = vmul.f32 %v6538_v18, %v6713_v20  ;;  %v6735_v46 = vld [vmem:[#allocation2 + $0xda] sm:$0xff]  ;;  %v8138_v7 = vld [vmem:[#allocation84_spill] sm:$0xff] }
 0x2bc   : > { %v2557_v42 = vpop.permute.xlu0 %2556  ;;  %v6728_v40 = vadd.f32 %v2861_v61, %v2731_v48  ;;  %v2863_v10 = vmul.f32 %v6538_v18, %v6720_v44  ;;  %v8137_v17 = vld [vmem:[#allocation41_spill] sm:$0xff]  ;;  %v6742_v61 = vld [vmem:[#allocation2 + $0xe2] sm:$0xff] }
 0x2bd   : > { %8133 = vst [vmem:[#allocation78_spill] sm:$0xff] %v6722_v58  ;;  %v2732_v11 = vadd.f32 %v2557_v42, %v2346_v24  ;;  %v2559_v3 = vpop.permute.xlu1 %2558  ;;  %v2348_v48 = vadd.f32 %v8138_v7, %v8137_v17  ;;  %v8140_v42 = vld [vmem:[#allocation42_spill] sm:$0xff]  ;;  %v2989_v17 = vmul.f32 %v6598_v31, %v6676_v54 }
 0x2be   : > { %8136 = vst [vmem:[#allocation23_spill] sm:$0xff] %v6728_v40  ;;  %v2733_v23 = vadd.f32 %v2559_v3, %v2347_v0  ;;  %3124 = vrot.lane.b32.xlu0 %v2986_v36, %s4109_s27  ;;  %v2349_v40 = vadd.f32 %v6314_v47, %v8140_v42  ;;  %v2988_v0 = vmul.f32 %v6598_v31, %v6669_v35  ;;  %v8146_v42 = vld [vmem:[#allocation44_spill] sm:$0xff] }
 0x2bf   : > { %3126 = vrot.lane.b32.xlu1 %v2987_v29, %s4109_s27  ;;  %v6744_v24 = vadd.f32 %v2862_v6, %v2732_v11  ;;  %v2864_v29 = vmul.f32 %v6538_v18, %v6735_v46  ;;  %v6757_v11 = vld [vmem:[#allocation2 + $0xf2] sm:$0xff]  ;;  %v2865_v47 = vmul.f32 %v6538_v18, %v6742_v61  ;;  %v8143_v6 = vld [vmem:[#allocation43_spill] sm:$0xff] }
 0x2c0   : > { %v2561_v3 = vpop.permute.xlu0 %2560  ;;  %v6750_v36 = vadd.f32 %v2863_v10, %v2733_v23  ;;  %8142 = vst [vmem:[#allocation80_spill] sm:$0xff] %v6757_v11  ;;  %v2350_v23 = vadd.f32 %v6319_v41, %v8143_v6  ;;  %v6764_v10 = vld [vmem:[#allocation2 + $0xfa] sm:$0xff]  ;;  %v2991_v41 = vmul.f32 %v6598_v31, %v6698_v13 }
 0x2c1   : > { %8139 = vst [vmem:[#allocation79_spill] sm:$0xff] %v6744_v24  ;;  %v2734_v58 = vadd.f32 %v2561_v3, %v2348_v48  ;;  %v2563_v4 = vpop.permute.xlu1 %2562  ;;  %8144 = vst [vmem:[#allocation25_spill] sm:$0xff] %v6764_v10  ;;  %v2351_v3 = vadd.f32 %v6322_v59, %v8146_v42  ;;  %v2867_v59 = vmul.f32 %v6538_v18, %v6764_v10 }
 0x2c2   : > { %8141 = vst [vmem:[#allocation24_spill] sm:$0xff] %v6750_v36  ;;  %v2735_v7 = vadd.f32 %v2563_v4, %v2349_v40  ;;  %3128 = vrot.lane.b32.xlu0 %v2988_v0, %s4109_s27  ;;  %v2990_v40 = vmul.f32 %v6598_v31, %v6691_v49 }
 0x2c3   : > { %3130 = vrot.lane.b32.xlu1 %v2989_v17, %s4109_s27  ;;  %v6766_v48 = vadd.f32 %v2864_v29, %v2734_v58  ;;  %v2866_v17 = vmul.f32 %v6538_v18, %v6757_v11 }
 0x2c4   : > { %v2565_v4 = vpop.permute.xlu0 %2564  ;;  %v6772_v0 = vadd.f32 %v2865_v47, %v2735_v7  ;;  %v2992_v7 = vmul.f32 %v6598_v31, %v6713_v20 }
 0x2c5   : > { %8145 = vst [vmem:[#allocation81_spill] sm:$0xff] %v6766_v48  ;;  %v2736_v36 = vadd.f32 %v2565_v4, %v2350_v23  ;;  %v2567_v24 = vpop.permute.xlu1 %2566  ;;  %v2995_v4 = vmul.f32 %v6598_v31, %v6742_v61  ;;  %v8171_v48 = vld [vmem:[#allocation57_spill] sm:$0xff] }
 0x2c6   : > { %8147 = vst [vmem:[#allocation26_spill] sm:$0xff] %v6772_v0  ;;  %v2737_v6 = vadd.f32 %v2567_v24, %v2351_v3  ;;  %3132 = vrot.lane.b32.xlu0 %v2990_v40, %s4109_s27  ;;  %v2993_v24 = vmul.f32 %v6598_v31, %v6720_v44  ;;  %v6859_v0 = vld [vmem:[#allocation2 + $0x15a] sm:$0xff] }
 0x2c7   : > { %3134 = vrot.lane.b32.xlu1 %v2991_v41, %s4109_s27  ;;  %v6782_v58 = vadd.f32 %v2866_v17, %v2736_v36  ;;  %v2994_v36 = vmul.f32 %v6598_v31, %v6735_v46  ;;  %v2996_v41 = vmul.f32 %v6598_v31, %v6757_v11  ;;  %8169 = vst [vmem:[#allocation110_spill] sm:$0xff] %v6859_v0 }
 0x2c8   : > { %v6784_v29 = vpop.permute.xlu0 %2568  ;;  %v6788_v47 = vadd.f32 %v2867_v59, %v2737_v6  ;;  %v2997_v6 = vmul.f32 %v6598_v31, %v6764_v10  ;;  %v6814_v59 = vld [vmem:[#allocation2 + $0x10a] sm:$0xff] }
 0x2c9   : > { %8148 = vst [vmem:[#allocation82_spill] sm:$0xff] %v6782_v58  ;;  %8149 = vst [vmem:[#allocation40_spill] sm:$0xff] %v6784_v29  ;;  %v6790_v23 = vpop.permute.xlu1 %2570  ;;  %v6856_v29 = vld [vmem:[#allocation2 + $0x152] sm:$0xff] }
 0x2ca   : > { %8150 = vst [vmem:[#allocation83_spill] sm:$0xff] %v6788_v47  ;;  %8151 = vst [vmem:[#allocation41_spill] sm:$0xff] %v6790_v23  ;;  %3136 = vrot.lane.b32.xlu0 %v2992_v7, %s4109_s27  ;;  %v6817_v7 = vld [vmem:[#allocation2 + $0x112] sm:$0xff]  ;;  %v6845_v47 = vld [vmem:[#allocation2 + $0x142] sm:$0xff] }
 0x2cb   : > { %3138 = vrot.lane.b32.xlu1 %v2993_v24, %s4109_s27  ;;  %8156 = vst [vmem:[#allocation97_spill] sm:$0xff] %v6814_v59  ;;  %8157 = vst [vmem:[#allocation98_spill] sm:$0xff] %v6817_v7  ;;  %v3003_v23 = vmul.f32 %v6598_v31, %v6845_v47 }
 0x2cc   : > { %v6796_v42 = vpop.permute.xlu0 %2572  ;;  %8165 = vst [vmem:[#allocation106_spill] sm:$0xff] %v6845_v47  ;;  %8168 = vst [vmem:[#allocation109_spill] sm:$0xff] %v6856_v29  ;;  %v3004_v47 = vmul.f32 %v6598_v31, %v6856_v29 }
 0x2cd   : > { %8152 = vst [vmem:[#allocation84_spill] sm:$0xff] %v6796_v42  ;;  %v6800_v3 = vpop.permute.xlu1 %2574  ;;  %v6842_v42 = vld [vmem:[#allocation2 + $0x13a] sm:$0xff] }
 0x2ce   : > { %8153 = vst [vmem:[#allocation42_spill] sm:$0xff] %v6800_v3  ;;  %3140 = vrot.lane.b32.xlu0 %v2994_v36, %s4109_s27  ;;  %v2998_v36 = vmul.f32 %v6598_v31, %v6814_v59  ;;  %v6831_v3 = vld [vmem:[#allocation2 + $0x12a] sm:$0xff]  ;;  %8164 = vst [vmem:[#allocation105_spill] sm:$0xff] %v6842_v42 }
 0x2cf   : > { %3142 = vrot.lane.b32.xlu1 %v2995_v4, %s4109_s27  ;;  %8161 = vst [vmem:[#allocation102_spill] sm:$0xff] %v6831_v3  ;;  %v6874_v59 = vld [vmem:[#allocation2 + $0x16a] sm:$0xff] }
 0x2d0   : > { %v6806_v40 = vpop.permute.xlu0 %2576 }
 0x2d1   : > { %8154 = vst [vmem:[#allocation43_spill] sm:$0xff] %v6806_v40  ;;  %v6810_v17 = vpop.permute.xlu1 %2578  ;;  %v6828_v40 = vld [vmem:[#allocation2 + $0x122] sm:$0xff] }
 0x2d2   : > { %8155 = vst [vmem:[#allocation44_spill] sm:$0xff] %v6810_v17  ;;  %3144 = vrot.lane.b32.xlu0 %v2996_v41, %s4109_s27  ;;  %v2999_v17 = vmul.f32 %v6598_v31, %v6817_v7  ;;  %8160 = vst [vmem:[#allocation101_spill] sm:$0xff] %v6828_v40  ;;  %v3005_v7 = vmul.f32 %v6598_v31, %v6859_v0  ;;  %v6888_v0 = vld [vmem:[#allocation2 + $0x1ba] sm:$0xff] }
 0x2d3   : > { %3146 = vrot.lane.b32.xlu1 %v2997_v6, %s4109_s27  ;;  %v3000_v6 = vmul.f32 %v6598_v31, %v6828_v40 }
 0x2d4   : > { %v6820_v24 = vpop.permute.xlu0 %2580 }
 0x2d5   : > { %8158 = vst [vmem:[#allocation99_spill] sm:$0xff] %v6820_v24  ;;  %v6824_v4 = vpop.permute.xlu1 %2582 }
 0x2d6   : > { %8159 = vst [vmem:[#allocation100_spill] sm:$0xff] %v6824_v4  ;;  %3148 = vrot.lane.b32.xlu0 %v2998_v36, %s4109_s27  ;;  %v3001_v4 = vmul.f32 %v6598_v31, %v6831_v3  ;;  %v6866_v3 = vld [vmem:[#allocation2 + $0x1a2] sm:$0xff] }
 0x2d7   : > { %3150 = vrot.lane.b32.xlu1 %v2999_v17, %s4109_s27  ;;  %v3002_v17 = vmul.f32 %v6598_v31, %v6842_v42  ;;  %8172 = vst [vmem:[#allocation57_spill] sm:$0xff] %v6866_v3  ;;  %v8173_v42 = vld [vmem:[#allocation58_spill] sm:$0xff] }
 0x2d8   : > { %v6834_v41 = vpop.permute.xlu0 %2584  ;;  %v2365_v40 = vadd.f32 %v6391_v37, %v8173_v42  ;;  %8174 = vst [vmem:[#allocation58_spill] sm:$0xff] %v6874_v59  ;;  %v6881_v37 = vld [vmem:[#allocation2 + $0x1b2] sm:$0xff]  ;;  %v2881_v42 = vmul.f32 %v6538_v18, %v6866_v3 }
 0x2d9   : > { %8162 = vst [vmem:[#allocation103_spill] sm:$0xff] %v6834_v41  ;;  %v6838_v24 = vpop.permute.xlu1 %2586  ;;  %8176 = vst [vmem:[#allocation113_spill] sm:$0xff] %v6881_v37 }
 0x2da   : > { %8163 = vst [vmem:[#allocation104_spill] sm:$0xff] %v6838_v24  ;;  %3152 = vrot.lane.b32.xlu0 %v3000_v6, %s4109_s27  ;;  %v6861_v6 = vld [vmem:[#allocation2 + $0x19a] sm:$0xff]  ;;  %v8180_v24 = vld [vmem:[#allocation60_spill] sm:$0xff] }
 0x2db   : > { %3154 = vrot.lane.b32.xlu1 %v3001_v4, %s4109_s27  ;;  %8170 = vst [vmem:[#allocation111_spill] sm:$0xff] %v6861_v6  ;;  %v2364_v4 = vadd.f32 %v6387_v28, %v8171_v48  ;;  %v2880_v28 = vmul.f32 %v6538_v18, %v6861_v6 }
 0x2dc   : > { %v6848_v36 = vpop.permute.xlu0 %2588 }
 0x2dd   : > { %8166 = vst [vmem:[#allocation107_spill] sm:$0xff] %v6848_v36  ;;  %v6852_v58 = vpop.permute.xlu1 %2590 }
 0x2de   : > { %8167 = vst [vmem:[#allocation108_spill] sm:$0xff] %v6852_v58  ;;  %3156 = vrot.lane.b32.xlu0 %v3002_v17, %s4109_s27 }
 0x2df   : > { %3158 = vrot.lane.b32.xlu1 %v3003_v23, %s4109_s27  ;;  %v6879_v23 = vld [vmem:[#allocation2 + $0x172] sm:$0xff] }
 0x2e0   : > { %v2593_v58 = vpop.permute.xlu0 %2592  ;;  %8175 = vst [vmem:[#allocation112_spill] sm:$0xff] %v6879_v23 }
 0x2e1   : > { %v2750_v36 = vadd.f32 %v2593_v58, %v2364_v4  ;;  %v2595_v17 = vpop.permute.xlu1 %2594  ;;  %v8177_v58 = vld [vmem:[#allocation59_spill] sm:$0xff] }
 0x2e2   : > { %v2751_v48 = vadd.f32 %v2595_v17, %v2365_v40  ;;  %3160 = vrot.lane.b32.xlu0 %v3004_v47, %s4109_s27  ;;  %v2366_v4 = vadd.f32 %v6397_v9, %v8177_v58  ;;  %8178 = vst [vmem:[#allocation59_spill] sm:$0xff] %v6888_v0  ;;  %v2367_v40 = vadd.f32 %v6401_v26, %v8180_v24  ;;  %v6900_v58 = vld [vmem:[#allocation2 + $0x182] sm:$0xff]  ;;  %v6905_v26 = vld [vmem:[#allocation2 + $0x18a] sm:$0xff] }
 0x2e3   : > { %3162 = vrot.lane.b32.xlu1 %v3005_v7, %s4109_s27  ;;  %v6890_v29 = vadd.f32 %v2880_v28, %v2750_v36  ;;  %v3006_v17 = vmul.f32 %v6598_v31, %v6874_v59  ;;  %v3007_v9 = vmul.f32 %v6598_v31, %v6879_v23  ;;  %v2882_v7 = vmul.f32 %v6538_v18, %v6881_v37  ;;  %v6907_v24 = vld [vmem:[#allocation2 + $0x1ca] sm:$0xff] }
 0x2e4   : > { %v2597_v47 = vpop.permute.xlu0 %2596  ;;  %v6896_v41 = vadd.f32 %v2881_v42, %v2751_v48  ;;  %8182 = vst [vmem:[#allocation115_spill] sm:$0xff] %v6907_v24  ;;  %v2883_v28 = vmul.f32 %v6538_v18, %v6888_v0  ;;  %v8183_v48 = vld [vmem:[#allocation61_spill] sm:$0xff] }
 0x2e5   : > { %8179 = vst [vmem:[#allocation114_spill] sm:$0xff] %v6890_v29  ;;  %v2752_v10 = vadd.f32 %v2597_v47, %v2366_v4  ;;  %v2599_v11 = vpop.permute.xlu1 %2598  ;;  %v2368_v42 = vadd.f32 %v6407_v2, %v8183_v48  ;;  %v6914_v4 = vld [vmem:[#allocation2 + $0x1d2] sm:$0xff]  ;;  %v3009_v2 = vmul.f32 %v6598_v31, %v6905_v26 }
 0x2e6   : > { %8181 = vst [vmem:[#allocation60_spill] sm:$0xff] %v6896_v41  ;;  %v2753_v36 = vadd.f32 %v2599_v11, %v2367_v40  ;;  %3164 = vrot.lane.b32.xlu0 %v3006_v17, %s4109_s27  ;;  %8184 = vst [vmem:[#allocation61_spill] sm:$0xff] %v6914_v4  ;;  %v8186_v41 = vld [vmem:[#allocation62_spill] sm:$0xff]  ;;  %v3008_v17 = vmul.f32 %v6598_v31, %v6900_v58 }
 0x2e7   : > { %3166 = vrot.lane.b32.xlu1 %v3007_v9, %s4109_s27  ;;  %v6916_v47 = vadd.f32 %v2882_v7, %v2752_v10  ;;  %v2369_v11 = vadd.f32 %v6411_v14, %v8186_v41  ;;  %v2884_v9 = vmul.f32 %v6538_v18, %v6907_v24  ;;  %v6929_v10 = vld [vmem:[#allocation2 + $0x1e2] sm:$0xff]  ;;  %v2885_v14 = vmul.f32 %v6538_v18, %v6914_v4 }
 0x2e8   : > { %v2601_v40 = vpop.permute.xlu0 %2600  ;;  %v6922_v29 = vadd.f32 %v2883_v28, %v2753_v36  ;;  %8188 = vst [vmem:[#allocation117_spill] sm:$0xff] %v6929_v10  ;;  %v8189_v41 = vld [vmem:[#allocation63_spill] sm:$0xff] }
 0x2e9   : > { %8185 = vst [vmem:[#allocation116_spill] sm:$0xff] %v6916_v47  ;;  %v2754_v23 = vadd.f32 %v2601_v40, %v2368_v42  ;;  %v2603_v59 = vpop.permute.xlu1 %2602  ;;  %v2370_v7 = vadd.f32 %v6417_v8, %v8189_v41  ;;  %v6936_v36 = vld [vmem:[#allocation2 + $0x1ea] sm:$0xff]  ;;  %v3011_v8 = vmul.f32 %v6598_v31, %v6866_v3 }
 0x2ea   : > { %8187 = vst [vmem:[#allocation62_spill] sm:$0xff] %v6922_v29  ;;  %v2755_v48 = vadd.f32 %v2603_v59, %v2369_v11  ;;  %3168 = vrot.lane.b32.xlu0 %v3008_v17, %s4109_s27  ;;  %8190 = vst [vmem:[#allocation63_spill] sm:$0xff] %v6936_v36  ;;  %v8191_v42 = vld [vmem:[#allocation64_spill] sm:$0xff]  ;;  %v3010_v11 = vmul.f32 %v6598_v31, %v6861_v6 }
 0x2eb   : > { %3170 = vrot.lane.b32.xlu1 %v3009_v2, %s4109_s27  ;;  %v6938_v28 = vadd.f32 %v2884_v9, %v2754_v23  ;;  %v2371_v40 = vadd.f32 %v6421_v27, %v8191_v42  ;;  %v2886_v2 = vmul.f32 %v6538_v18, %v6929_v10  ;;  %v6951_v23 = vld [vmem:[#allocation2 + $0x1fa] sm:$0xff]  ;;  %v2887_v27 = vmul.f32 %v6538_v18, %v6936_v36 }
 0x2ec   : > { %v2605_v59 = vpop.permute.xlu0 %2604  ;;  %v6944_v17 = vadd.f32 %v2885_v14, %v2755_v48  ;;  %8192 = vst [vmem:[#allocation64_spill] sm:$0xff] %v6951_v23  ;;  %v8193_v9 = vld [vmem:[#allocation65_spill] sm:$0xff]  ;;  %v6958_v14 = vld [vmem:[#allocation2 + $0x202] sm:$0xff] }
 0x2ed   : > { %v2756_v29 = vadd.f32 %v2605_v59, %v2370_v7  ;;  %v2607_v47 = vpop.permute.xlu1 %2606  ;;  %v2372_v48 = vadd.f32 %v6427_v19, %v8193_v9  ;;  %8194 = vst [vmem:[#allocation65_spill] sm:$0xff] %v6958_v14  ;;  %v8195_v42 = vld [vmem:[#allocation66_spill] sm:$0xff]  ;;  %v3013_v19 = vmul.f32 %v6598_v31, %v6888_v0 }
 0x2ee   : > { %v2757_v41 = vadd.f32 %v2607_v47, %v2371_v40  ;;  %3172 = vrot.lane.b32.xlu0 %v3010_v11, %s4109_s27  ;;  %v2373_v59 = vadd.f32 %v6431_v33, %v8195_v42  ;;  %v3012_v40 = vmul.f32 %v6598_v31, %v6881_v37  ;;  %v2889_v33 = vmul.f32 %v6538_v18, %v6958_v14  ;;  %v8199_v42 = vld [vmem:[#allocation27_spill] sm:$0xff] }
 0x2ef   : > { %3174 = vrot.lane.b32.xlu1 %v3011_v8, %s4109_s27  ;;  %v6960_v7 = vadd.f32 %v2886_v2, %v2756_v29  ;;  %v2888_v8 = vmul.f32 %v6538_v18, %v6951_v23  ;;  %v6973_v29 = vld [vmem:[#allocation2 + $0x212] sm:$0xff]  ;;  %v8197_v2 = vld [vmem:[#allocation67_spill] sm:$0xff] }
 0x2f0   : > { %v2609_v47 = vpop.permute.xlu0 %2608  ;;  %v6966_v11 = vadd.f32 %v2887_v27, %v2757_v41  ;;  %8196 = vst [vmem:[#allocation66_spill] sm:$0xff] %v6973_v29  ;;  %v2374_v41 = vadd.f32 %v6437_v55, %v8197_v2  ;;  %v6980_v27 = vld [vmem:[#allocation2 + $0x21a] sm:$0xff]  ;;  %v3015_v55 = vmul.f32 %v6598_v31, %v6914_v4 }
 0x2f1   : > { %v2758_v3 = vadd.f32 %v2609_v47, %v2372_v48  ;;  %v2611_v6 = vpop.permute.xlu1 %2610  ;;  %8198 = vst [vmem:[#allocation67_spill] sm:$0xff] %v6980_v27  ;;  %v2375_v47 = vadd.f32 %v6441_v39, %v8199_v42  ;;  %v2891_v39 = vmul.f32 %v6538_v18, %v6980_v27  ;;  %v8203_v42 = vld [vmem:[#allocation29_spill] sm:$0xff] }
 0x2f2   : > { %v2759_v9 = vadd.f32 %v2611_v6, %v2373_v59  ;;  %3176 = vrot.lane.b32.xlu0 %v3012_v40, %s4109_s27  ;;  %v3014_v59 = vmul.f32 %v6598_v31, %v6907_v24 }
 0x2f3   : > { %3178 = vrot.lane.b32.xlu1 %v3013_v19, %s4109_s27  ;;  %v6982_v48 = vadd.f32 %v2888_v8, %v2758_v3  ;;  %v2890_v19 = vmul.f32 %v6538_v18, %v6973_v29  ;;  %v6995_v3 = vld [vmem:[#allocation2 + $0x22a] sm:$0xff] }
 0x2f4   : > { %v2613_v6 = vpop.permute.xlu0 %2612  ;;  %v6988_v40 = vadd.f32 %v2889_v33, %v2759_v9  ;;  %8200 = vst [vmem:[#allocation27_spill] sm:$0xff] %v6995_v3  ;;  %v8201_v8 = vld [vmem:[#allocation28_spill] sm:$0xff] }
 0x2f5   : > { %v2760_v0 = vadd.f32 %v2613_v6, %v2374_v41  ;;  %v2615_v37 = vpop.permute.xlu1 %2614  ;;  %v2376_v9 = vadd.f32 %v6447_v12, %v8201_v8  ;;  %v7002_v33 = vld [vmem:[#allocation2 + $0x232] sm:$0xff]  ;;  %v2377_v6 = vadd.f32 %v6451_v45, %v8203_v42  ;;  %v3017_v12 = vmul.f32 %v6598_v31, %v6936_v36  ;;  %v8207_v42 = vld [vmem:[#allocation31_spill] sm:$0xff] }
 0x2f6   : > { %v2761_v2 = vadd.f32 %v2615_v37, %v2375_v47  ;;  %3180 = vrot.lane.b32.xlu0 %v3014_v59, %s4109_s27  ;;  %8202 = vst [vmem:[#allocation28_spill] sm:$0xff] %v7002_v33  ;;  %v3016_v47 = vmul.f32 %v6598_v31, %v6929_v10  ;;  %v2893_v45 = vmul.f32 %v6538_v18, %v7002_v33 }
 0x2f7   : > { %3182 = vrot.lane.b32.xlu1 %v3015_v55, %s4109_s27  ;;  %v7004_v41 = vadd.f32 %v2890_v19, %v2760_v0  ;;  %v2892_v55 = vmul.f32 %v6538_v18, %v6995_v3  ;;  %v7017_v0 = vld [vmem:[#allocation2 + $0x242] sm:$0xff]  ;;  %v8205_v19 = vld [vmem:[#allocation69_spill] sm:$0xff] }
 0x2f8   : > { %v2617_v37 = vpop.permute.xlu0 %2616  ;;  %v7010_v59 = vadd.f32 %v2891_v39, %v2761_v2  ;;  %8204 = vst [vmem:[#allocation29_spill] sm:$0xff] %v7017_v0  ;;  %v2378_v2 = vadd.f32 %v6457_v25, %v8205_v19  ;;  %v7024_v39 = vld [vmem:[#allocation2 + $0x24a] sm:$0xff]  ;;  %v3019_v25 = vmul.f32 %v6598_v31, %v6958_v14 }
 0x2f9   : > { %v2762_v4 = vadd.f32 %v2617_v37, %v2376_v9  ;;  %v2619_v24 = vpop.permute.xlu1 %2618  ;;  %8206 = vst [vmem:[#allocation69_spill] sm:$0xff] %v7024_v39  ;;  %v2379_v37 = vadd.f32 %v6461_v51, %v8207_v42  ;;  %v2895_v51 = vmul.f32 %v6538_v18, %v7024_v39  ;;  %v8211_v42 = vld [vmem:[#allocation33_spill] sm:$0xff] }
 0x2fa   : > { %v2763_v8 = vadd.f32 %v2619_v24, %v2377_v6  ;;  %3184 = vrot.lane.b32.xlu0 %v3016_v47, %s4109_s27  ;;  %v3018_v6 = vmul.f32 %v6598_v31, %v6951_v23 }
 0x2fb   : > { %3186 = vrot.lane.b32.xlu1 %v3017_v12, %s4109_s27  ;;  %v7026_v9 = vadd.f32 %v2892_v55, %v2762_v4  ;;  %v2894_v12 = vmul.f32 %v6538_v18, %v7017_v0  ;;  %v7039_v4 = vld [vmem:[#allocation2 + $0x25a] sm:$0xff]  ;;  %v8209_v55 = vld [vmem:[#allocation71_spill] sm:$0xff] }
 0x2fc   : > { %v2621_v24 = vpop.permute.xlu0 %2620  ;;  %v7032_v47 = vadd.f32 %v2893_v45, %v2763_v8  ;;  %8208 = vst [vmem:[#allocation31_spill] sm:$0xff] %v7039_v4  ;;  %v2380_v8 = vadd.f32 %v6467_v22, %v8209_v55  ;;  %v7046_v45 = vld [vmem:[#allocation2 + $0x262] sm:$0xff]  ;;  %v3021_v22 = vmul.f32 %v6598_v31, %v6980_v27 }
 0x2fd   : > { %v2764_v36 = vadd.f32 %v2621_v24, %v2378_v2  ;;  %v2623_v10 = vpop.permute.xlu1 %2622  ;;  %8210 = vst [vmem:[#allocation71_spill] sm:$0xff] %v7046_v45  ;;  %v2381_v24 = vadd.f32 %v6471_v57, %v8211_v42  ;;  %v2897_v57 = vmul.f32 %v6538_v18, %v7046_v45  ;;  %v8215_v42 = vld [vmem:[#allocation35_spill] sm:$0xff] }
 0x2fe   : > { %v2765_v19 = vadd.f32 %v2623_v10, %v2379_v37  ;;  %3188 = vrot.lane.b32.xlu0 %v3018_v6, %s4109_s27  ;;  %v3020_v37 = vmul.f32 %v6598_v31, %v6973_v29 }
 0x2ff   : > { %3190 = vrot.lane.b32.xlu1 %v3019_v25, %s4109_s27  ;;  %v7048_v2 = vadd.f32 %v2894_v12, %v2764_v36  ;;  %v2896_v25 = vmul.f32 %v6538_v18, %v7039_v4  ;;  %v7061_v36 = vld [vmem:[#allocation2 + $0x272] sm:$0xff]  ;;  %v8213_v12 = vld [vmem:[#allocation34_spill] sm:$0xff] }
 0x300   : > { %v2625_v10 = vpop.permute.xlu0 %2624  ;;  %v7054_v6 = vadd.f32 %v2895_v51, %v2765_v19  ;;  %8212 = vst [vmem:[#allocation33_spill] sm:$0xff] %v7061_v36  ;;  %v2382_v19 = vadd.f32 %v6477_v60, %v8213_v12  ;;  %v7068_v51 = vld [vmem:[#allocation2 + $0x27a] sm:$0xff]  ;;  %v3023_v60 = vmul.f32 %v6598_v31, %v7002_v33 }
 0x301   : > { %v2766_v14 = vadd.f32 %v2625_v10, %v2380_v8  ;;  %v2627_v23 = vpop.permute.xlu1 %2626  ;;  %8214 = vst [vmem:[#allocation34_spill] sm:$0xff] %v7068_v51  ;;  %v2383_v10 = vadd.f32 %v6481_v63, %v8215_v42  ;;  %v2899_v63 = vmul.f32 %v6538_v18, %v7068_v51  ;;  %v8219_v42 = vld [vmem:[#allocation37_spill] sm:$0xff] }
 0x302   : > { %v2767_v55 = vadd.f32 %v2627_v23, %v2381_v24  ;;  %3192 = vrot.lane.b32.xlu0 %v3020_v37, %s4109_s27  ;;  %v3022_v24 = vmul.f32 %v6598_v31, %v6995_v3 }
 0x303   : > { %3194 = vrot.lane.b32.xlu1 %v3021_v22, %s4109_s27  ;;  %v7070_v8 = vadd.f32 %v2896_v25, %v2766_v14  ;;  %v2898_v22 = vmul.f32 %v6538_v18, %v7061_v36  ;;  %v7083_v14 = vld [vmem:[#allocation2 + $0x28a] sm:$0xff] }
 0x304   : > { %v2629_v23 = vpop.permute.xlu0 %2628  ;;  %v7076_v37 = vadd.f32 %v2897_v57, %v2767_v55  ;;  %8216 = vst [vmem:[#allocation35_spill] sm:$0xff] %v7083_v14  ;;  %v8217_v25 = vld [vmem:[#allocation36_spill] sm:$0xff] }
 0x305   : > { %v2768_v27 = vadd.f32 %v2629_v23, %v2382_v19  ;;  %v2631_v29 = vpop.permute.xlu1 %2630  ;;  %v2384_v55 = vadd.f32 %v6487_v43, %v8217_v25  ;;  %v7090_v57 = vld [vmem:[#allocation2 + $0x292] sm:$0xff]  ;;  %v2385_v23 = vadd.f32 %v6491_v5, %v8219_v42  ;;  %v3025_v43 = vmul.f32 %v6598_v31, %v7024_v39  ;;  %v8221_v42 = vld [vmem:[#allocation39_spill] sm:$0xff] }
 0x306   : > { %v2769_v12 = vadd.f32 %v2631_v29, %v2383_v10  ;;  %3196 = vrot.lane.b32.xlu0 %v3022_v24, %s4109_s27  ;;  %8218 = vst [vmem:[#allocation36_spill] sm:$0xff] %v7090_v57  ;;  %v3024_v10 = vmul.f32 %v6598_v31, %v7017_v0  ;;  %v2901_v5 = vmul.f32 %v6538_v18, %v7090_v57 }
 0x307   : > { %3198 = vrot.lane.b32.xlu1 %v3023_v60, %s4109_s27  ;;  %v7092_v19 = vadd.f32 %v2898_v22, %v2768_v27  ;;  %v2900_v60 = vmul.f32 %v6538_v18, %v7083_v14  ;;  %v7105_v27 = vld [vmem:[#allocation2 + $0x2a2] sm:$0xff] }
 0x308   : > { %v2633_v29 = vpop.permute.xlu0 %2632  ;;  %v7098_v24 = vadd.f32 %v2899_v63, %v2769_v12  ;;  %v8220_v22 = vld [vmem:[#allocation38_spill] sm:$0xff]  ;;  %v7112_v63 = vld [vmem:[#allocation2 + $0x2aa] sm:$0xff] }
 0x309   : > { %v2770_v33 = vadd.f32 %v2633_v29, %v2384_v55  ;;  %v2635_v3 = vpop.permute.xlu1 %2634  ;;  %v2386_v12 = vadd.f32 %v6497_v32, %v8220_v22  ;;  %v2387_v29 = vadd.f32 %v6501_v56, %v8221_v42  ;;  %v3027_v32 = vmul.f32 %v6598_v31, %v7046_v45  ;;  %v8223_v42 = vld [vmem:[#allocation7_spill] sm:$0xff] }
 0x30a   : > { %v2771_v25 = vadd.f32 %v2635_v3, %v2385_v23  ;;  %3200 = vrot.lane.b32.xlu0 %v3024_v10, %s4109_s27  ;;  %v3026_v23 = vmul.f32 %v6598_v31, %v7039_v4  ;;  %v2903_v56 = vmul.f32 %v6538_v18, %v7112_v63 }
 0x30b   : > { %3202 = vrot.lane.b32.xlu1 %v3025_v43, %s4109_s27  ;;  %v7114_v55 = vadd.f32 %v2900_v60, %v2770_v33  ;;  %v2902_v43 = vmul.f32 %v6538_v18, %v7105_v27  ;;  %v7127_v33 = vld [vmem:[#allocation2 + $0x2ba] sm:$0xff] }
 0x30c   : > { %v2637_v3 = vpop.permute.xlu0 %2636  ;;  %v7120_v10 = vadd.f32 %v2901_v5, %v2771_v25  ;;  %v8222_v60 = vld [vmem:[#allocation6_spill] sm:$0xff] }
 0x30d   : > { %v2772_v39 = vadd.f32 %v2637_v3, %v2386_v12  ;;  %v2639_v0 = vpop.permute.xlu1 %2638  ;;  %v2388_v25 = vadd.f32 %v6507_v52, %v8222_v60  ;;  %v7134_v5 = vld [vmem:[#allocation2 + $0x2c2] sm:$0xff]  ;;  %v2389_v3 = vadd.f32 %v6511_v53, %v8223_v42  ;;  %v3029_v52 = vmul.f32 %v6598_v31, %v7068_v51  ;;  %v8225_v42 = vld [vmem:[#allocation9_spill] sm:$0xff] }
 0x30e   : > { %v2773_v22 = vadd.f32 %v2639_v0, %v2387_v29  ;;  %3204 = vrot.lane.b32.xlu0 %v3026_v23, %s4109_s27  ;;  %v3028_v29 = vmul.f32 %v6598_v31, %v7061_v36  ;;  %v2905_v53 = vmul.f32 %v6538_v18, %v7134_v5 }
 0x30f   : > { %3206 = vrot.lane.b32.xlu1 %v3027_v32, %s4109_s27  ;;  %v7136_v12 = vadd.f32 %v2902_v43, %v2772_v39  ;;  %v2904_v32 = vmul.f32 %v6538_v18, %v7127_v33  ;;  %v7149_v39 = vld [vmem:[#allocation2 + $0x2d2] sm:$0xff] }
 0x310   : > { %v2641_v0 = vpop.permute.xlu0 %2640  ;;  %v7142_v23 = vadd.f32 %v2903_v56, %v2773_v22  ;;  %v8224_v43 = vld [vmem:[#allocation8_spill] sm:$0xff]  ;;  %v7156_v56 = vld [vmem:[#allocation2 + $0x2da] sm:$0xff] }
 0x311   : > { %v2774_v45 = vadd.f32 %v2641_v0, %v2388_v25  ;;  %v2643_v4 = vpop.permute.xlu1 %2642  ;;  %v2390_v22 = vadd.f32 %v6517_v30, %v8224_v43  ;;  %v2391_v0 = vadd.f32 %v6521_v34, %v8225_v42  ;;  %v3031_v30 = vmul.f32 %v6598_v31, %v7090_v57  ;;  %v8229_v42 = vld [vmem:[#allocation73_spill] sm:$0xff] }
 0x312   : > { %v2775_v60 = vadd.f32 %v2643_v4, %v2389_v3  ;;  %3208 = vrot.lane.b32.xlu0 %v3028_v29, %s4109_s27  ;;  %v3030_v3 = vmul.f32 %v6598_v31, %v7083_v14  ;;  %v2907_v34 = vmul.f32 %v6538_v18, %v7156_v56 }
 0x313   : > { %3210 = vrot.lane.b32.xlu1 %v3029_v52, %s4109_s27  ;;  %v7158_v25 = vadd.f32 %v2904_v32, %v2774_v45  ;;  %v2906_v52 = vmul.f32 %v6538_v18, %v7149_v39  ;;  %v7171_v45 = vld [vmem:[#allocation2 + $0x2ea] sm:$0xff] }
 0x314   : > { %v2645_v4 = vpop.permute.xlu0 %2644  ;;  %v7164_v29 = vadd.f32 %v2905_v53, %v2775_v60  ;;  %8226 = vst [vmem:[#allocation37_spill] sm:$0xff] %v7171_v45  ;;  %v8227_v32 = vld [vmem:[#allocation72_spill] sm:$0xff] }
 0x315   : > { %v2776_v51 = vadd.f32 %v2645_v4, %v2390_v22  ;;  %v2647_v36 = vpop.permute.xlu1 %2646  ;;  %v2392_v60 = vadd.f32 %v6527_v50, %v8227_v32  ;;  %v7178_v53 = vld [vmem:[#allocation2 + $0x2f2] sm:$0xff]  ;;  %v2393_v4 = vadd.f32 %v6531_v1, %v8229_v42  ;;  %v3033_v50 = vmul.f32 %v6598_v31, %v7112_v63 }
 0x316   : > { %v2777_v43 = vadd.f32 %v2647_v36, %v2391_v0  ;;  %3212 = vrot.lane.b32.xlu0 %v3030_v3, %s4109_s27  ;;  %8228 = vst [vmem:[#allocation38_spill] sm:$0xff] %v7178_v53  ;;  %v3032_v0 = vmul.f32 %v6598_v31, %v7105_v27  ;;  %v2909_v1 = vmul.f32 %v6538_v18, %v7178_v53 }
 0x317   : > { %3214 = vrot.lane.b32.xlu1 %v3031_v30, %s4109_s27  ;;  %v7180_v22 = vadd.f32 %v2906_v52, %v2776_v51  ;;  %v2908_v30 = vmul.f32 %v6538_v18, %v7171_v45 }
 0x318   : > { %v2649_v36 = vpop.permute.xlu0 %2648  ;;  %v7186_v3 = vadd.f32 %v2907_v34, %v2777_v43  ;;  %v3034_v43 = vmul.f32 %v6598_v31, %v7127_v33 }
 0x319   : > { %v2778_v57 = vadd.f32 %v2649_v36, %v2392_v60  ;;  %v2651_v14 = vpop.permute.xlu1 %2650  ;;  %v3037_v36 = vmul.f32 %v6598_v31, %v7156_v56 }
 0x31a   : > { %v2779_v32 = vadd.f32 %v2651_v14, %v2393_v4  ;;  %3216 = vrot.lane.b32.xlu0 %v3032_v0, %s4109_s27  ;;  %v3035_v14 = vmul.f32 %v6598_v31, %v7134_v5 }
 0x31b   : > { %3218 = vrot.lane.b32.xlu1 %v3033_v50, %s4109_s27  ;;  %v7196_v51 = vadd.f32 %v2908_v30, %v2778_v57  ;;  %v3036_v57 = vmul.f32 %v6598_v31, %v7149_v39  ;;  %v3038_v50 = vmul.f32 %v6598_v31, %v7171_v45 }
 0x31c   : > { %v7198_v52 = vpop.permute.xlu0 %3104  ;;  %v7202_v34 = vadd.f32 %v2909_v1, %v2779_v32  ;;  %v3039_v32 = vmul.f32 %v6598_v31, %v7178_v53  ;;  %v7228_v1 = vstv %s3937_s8 }
 0x31d   : > { %v7204_v60 = vpop.permute.xlu1 %3106 }
 0x31e   : > { %3220 = vrot.lane.b32.xlu0 %v3034_v43, %s4109_s27 }
 0x31f   : > { %3222 = vrot.lane.b32.xlu1 %v3035_v14, %s4109_s27  ;;  %v3362_v14 = vmul.f32 %v7228_v1, %v6536_v38 }
 0x320   : > { %v7210_v42 = vpop.permute.xlu0 %3108 }
 0x321   : > { %v7214_v4 = vpop.permute.xlu1 %3110 }
 0x322   : > { %3224 = vrot.lane.b32.xlu0 %v3036_v57, %s4109_s27 }
 0x323   : > { %3226 = vrot.lane.b32.xlu1 %v3037_v36, %s4109_s27  ;;  %v3363_v36 = vmul.f32 %v7228_v1, %v6543_v16  ;;  %v8236_v16 = vld [vmem:[#allocation70_spill] sm:$0xff] }
 0x324   : > { %v7220_v0 = vpop.permute.xlu0 %3112 }
 0x325   : > { %v7224_v30 = vpop.permute.xlu1 %3114 }
 0x326   : > { %8230 = vst [vmem:[#allocation39_spill] sm:$0xff] %v7224_v30  ;;  %3228 = vrot.lane.b32.xlu0 %v3038_v50, %s4109_s27  ;;  %v3364_v50 = vmul.f32 %v7228_v1, %v6556_v62  ;;  %v2878_v30 = vmul.f32 %v6538_v18, %v6900_v58 }
 0x327   : > { %3230 = vrot.lane.b32.xlu1 %v3039_v32, %s4109_s27 }
 0x328   : > { %v7232_v43 = vpop.permute.xlu0 %3116 }
 0x329   : > { %8231 = vst [vmem:[#allocation6_spill] sm:$0xff] %v7232_v43  ;;  %v7236_v57 = vpop.permute.xlu1 %3118  ;;  %v3365_v43 = vmul.f32 %v7228_v1, %v6563_v15  ;;  %v8240_v15 = vld [vmem:[#allocation14_spill] sm:$0xff] }
 0x32a   : > { %8232 = vst [vmem:[#allocation7_spill] sm:$0xff] %v7236_v57  ;;  %3490 = vrot.lane.b32.xlu0 %v3362_v14, %s4110_s29  ;;  %v3366_v14 = vmul.f32 %v7228_v1, %v8236_v16 }
 0x32b   : > { %3492 = vrot.lane.b32.xlu1 %v3363_v36, %s4110_s29 }
 0x32c   : > { %v7242_v31 = vpop.permute.xlu0 %3120 }
 0x32d   : > { %8233 = vst [vmem:[#allocation8_spill] sm:$0xff] %v7242_v31  ;;  %v7246_v32 = vpop.permute.xlu1 %3122  ;;  %v8238_v31 = vld [vmem:[#allocation32_spill] sm:$0xff] }
 0x32e   : > { %8234 = vst [vmem:[#allocation9_spill] sm:$0xff] %v7246_v32  ;;  %3494 = vrot.lane.b32.xlu0 %v3364_v50, %s4110_s29  ;;  %v3367_v57 = vmul.f32 %v7228_v1, %v8238_v31  ;;  %v3368_v50 = vmul.f32 %v7228_v1, %v8240_v15  ;;  %v8244_v31 = vld [vmem:[#allocation17_spill] sm:$0xff] }
 0x32f   : > { %3496 = vrot.lane.b32.xlu1 %v3365_v43, %s4110_s29 }
 0x330   : > { %v7252_v38 = vpop.permute.xlu0 %3124 }
 0x331   : > { %8235 = vst [vmem:[#allocation72_spill] sm:$0xff] %v7252_v38  ;;  %v7256_v36 = vpop.permute.xlu1 %3126  ;;  %v8242_v38 = vld [vmem:[#allocation11_spill] sm:$0xff] }
 0x332   : > { %8237 = vst [vmem:[#allocation73_spill] sm:$0xff] %v7256_v36  ;;  %3498 = vrot.lane.b32.xlu0 %v3366_v14, %s4110_s29  ;;  %v3369_v32 = vmul.f32 %v7228_v1, %v8242_v38  ;;  %v3370_v14 = vmul.f32 %v7228_v1, %v8244_v31  ;;  %v3372_v38 = vmul.f32 %v7228_v1, %v6647_v21 }
 0x333   : > { %3500 = vrot.lane.b32.xlu1 %v3367_v57, %s4110_s29 }
 0x334   : > { %v7262_v62 = vpop.permute.xlu0 %3128 }
 0x335   : > { %8239 = vst [vmem:[#allocation70_spill] sm:$0xff] %v7262_v62  ;;  %v7266_v43 = vpop.permute.xlu1 %3130  ;;  %v8246_v62 = vld [vmem:[#allocation15_spill] sm:$0xff] }
 0x336   : > { %8241 = vst [vmem:[#allocation32_spill] sm:$0xff] %v7266_v43  ;;  %3502 = vrot.lane.b32.xlu0 %v3368_v50, %s4110_s29  ;;  %v3371_v36 = vmul.f32 %v7228_v1, %v8246_v62  ;;  %v8249_v50 = vld [vmem:[#allocation18_spill] sm:$0xff]  ;;  %v3374_v62 = vmul.f32 %v7228_v1, %v6669_v35  ;;  %v8280_v43 = vld [vmem:[#allocation101_spill] sm:$0xff] }
 0x337   : > { %3504 = vrot.lane.b32.xlu1 %v3369_v32, %s4110_s29  ;;  %v3386_v53 = vmul.f32 %v7228_v1, %v8280_v43 }
 0x338   : > { %v7272_v16 = vpop.permute.xlu0 %3132 }
 0x339   : > { %8243 = vst [vmem:[#allocation14_spill] sm:$0xff] %v7272_v16  ;;  %v7276_v57 = vpop.permute.xlu1 %3134  ;;  %v3373_v16 = vmul.f32 %v7228_v1, %v8249_v50  ;;  %v3377_v50 = vmul.f32 %v7228_v1, %v6698_v13  ;;  %v3380_v13 = vmul.f32 %v7228_v1, %v6735_v46  ;;  %v8263_v46 = vld [vmem:[#allocation25_spill] sm:$0xff] }
 0x33a   : > { %8245 = vst [vmem:[#allocation11_spill] sm:$0xff] %v7276_v57  ;;  %3506 = vrot.lane.b32.xlu0 %v3370_v14, %s4110_s29  ;;  %v3375_v14 = vmul.f32 %v7228_v1, %v6676_v54  ;;  %v3378_v54 = vmul.f32 %v7228_v1, %v6713_v20 }
 0x33b   : > { %3508 = vrot.lane.b32.xlu1 %v3371_v36, %s4110_s29 }
 0x33c   : > { %v7282_v15 = vpop.permute.xlu0 %3136 }
 0x33d   : > { %8247 = vst [vmem:[#allocation17_spill] sm:$0xff] %v7282_v15  ;;  %v7286_v32 = vpop.permute.xlu1 %3138  ;;  %v8273_v15 = vld [vmem:[#allocation98_spill] sm:$0xff] }
 0x33e   : > { %8248 = vst [vmem:[#allocation15_spill] sm:$0xff] %v7286_v32  ;;  %3510 = vrot.lane.b32.xlu0 %v3372_v38, %s4110_s29  ;;  %v3376_v38 = vmul.f32 %v7228_v1, %v6691_v49 }
 0x33f   : > { %3512 = vrot.lane.b32.xlu1 %v3373_v16, %s4110_s29 }
 0x340   : > { %v7292_v31 = vpop.permute.xlu0 %3140 }
 0x341   : > { %8250 = vst [vmem:[#allocation18_spill] sm:$0xff] %v7292_v31  ;;  %v7296_v36 = vpop.permute.xlu1 %3142  ;;  %v8269_v31 = vld [vmem:[#allocation97_spill] sm:$0xff] }
 0x342   : > { %8251 = vst [vmem:[#allocation118_spill] sm:$0xff] %v7296_v36  ;;  %3514 = vrot.lane.b32.xlu0 %v3374_v62, %s4110_s29 }
 0x343   : > { %3516 = vrot.lane.b32.xlu1 %v3375_v14, %s4110_s29  ;;  %v3379_v14 = vmul.f32 %v7228_v1, %v6720_v44  ;;  %v8259_v44 = vld [vmem:[#allocation80_spill] sm:$0xff] }
 0x344   : > { %v7302_v21 = vpop.permute.xlu0 %3144 }
 0x345   : > { %8252 = vst [vmem:[#allocation119_spill] sm:$0xff] %v7302_v21  ;;  %v7306_v16 = vpop.permute.xlu1 %3146  ;;  %v8265_v21 = vld [vmem:[#allocation94_spill] sm:$0xff] }
 0x346   : > { %8253 = vst [vmem:[#allocation120_spill] sm:$0xff] %v7306_v16  ;;  %3518 = vrot.lane.b32.xlu0 %v3376_v38, %s4110_s29  ;;  %v8264_v16 = vld [vmem:[#allocation54_spill] sm:$0xff] }
 0x347   : > { %3520 = vrot.lane.b32.xlu1 %v3377_v50, %s4110_s29  ;;  %v3381_v50 = vmul.f32 %v7228_v1, %v6742_v61  ;;  %v2361_v61 = vadd.f32 %v8265_v21, %v8264_v16  ;;  %v3385_v21 = vmul.f32 %v7228_v1, %v8273_v15  ;;  %v8274_v16 = vld [vmem:[#allocation58_spill] sm:$0xff] }
 0x348   : > { %v7312_v35 = vpop.permute.xlu0 %3148 }
 0x349   : > { %8254 = vst [vmem:[#allocation121_spill] sm:$0xff] %v7312_v35  ;;  %v7316_v62 = vpop.permute.xlu1 %3150 }
 0x34a   : > { %8255 = vst [vmem:[#allocation122_spill] sm:$0xff] %v7316_v62  ;;  %3522 = vrot.lane.b32.xlu0 %v3378_v54, %s4110_s29  ;;  %v3382_v54 = vmul.f32 %v7228_v1, %v8259_v44  ;;  %v8261_v62 = vld [vmem:[#allocation93_spill] sm:$0xff] }
 0x34b   : > { %3524 = vrot.lane.b32.xlu1 %v3379_v14, %s4110_s29  ;;  %v8260_v14 = vld [vmem:[#allocation53_spill] sm:$0xff] }
 0x34c   : > { %v7322_v49 = vpop.permute.xlu0 %3152 }
 0x34d   : > { %8256 = vst [vmem:[#allocation123_spill] sm:$0xff] %v7322_v49  ;;  %v7326_v38 = vpop.permute.xlu1 %3154  ;;  %v2360_v49 = vadd.f32 %v8261_v62, %v8260_v14  ;;  %v3384_v62 = vmul.f32 %v7228_v1, %v8269_v31  ;;  %v8270_v14 = vld [vmem:[#allocation55_spill] sm:$0xff] }
 0x34e   : > { %8257 = vst [vmem:[#allocation124_spill] sm:$0xff] %v7326_v38  ;;  %3526 = vrot.lane.b32.xlu0 %v3380_v13, %s4110_s29  ;;  %v3383_v38 = vmul.f32 %v7228_v1, %v8263_v46  ;;  %v8266_v13 = vld [vmem:[#allocation103_spill] sm:$0xff] }
 0x34f   : > { %3528 = vrot.lane.b32.xlu1 %v3381_v50, %s4110_s29  ;;  %v2746_v50 = vadd.f32 %v8266_v13, %v2360_v49  ;;  %v2876_v49 = vmul.f32 %v6538_v18, %v8274_v16  ;;  %v8278_v31 = vld [vmem:[#allocation107_spill] sm:$0xff] }
 0x350   : > { %v7332_v20 = vpop.permute.xlu0 %3156 }
 0x351   : > { %8258 = vst [vmem:[#allocation125_spill] sm:$0xff] %v7332_v20  ;;  %v7338_v35 = vpop.permute.xlu1 %3158  ;;  %v8267_v20 = vld [vmem:[#allocation104_spill] sm:$0xff] }
 0x352   : > { %8262 = vst [vmem:[#allocation80_spill] sm:$0xff] %v7338_v35  ;;  %3530 = vrot.lane.b32.xlu0 %v3382_v54, %s4110_s29  ;;  %v2747_v36 = vadd.f32 %v8267_v20, %v2361_v61  ;;  %v8271_v35 = vld [vmem:[#allocation95_spill] sm:$0xff]  ;;  %v8275_v54 = vld [vmem:[#allocation56_spill] sm:$0xff] }
 0x353   : > { %3532 = vrot.lane.b32.xlu1 %v3383_v38, %s4110_s29  ;;  %v2362_v32 = vadd.f32 %v8271_v35, %v8270_v14  ;;  %v8276_v38 = vld [vmem:[#allocation96_spill] sm:$0xff]  ;;  %v2940_v35 = vadd.f32 %v2876_v49, %v2746_v50  ;;  %v2879_v50 = vmul.f32 %v6538_v18, %v6905_v26 }
 0x354   : > { %v7348_v44 = vpop.permute.xlu0 %3160  ;;  %v2363_v13 = vadd.f32 %v8276_v38, %v8275_v54  ;;  %v8277_v20 = vld [vmem:[#allocation112_spill] sm:$0xff]  ;;  %v8281_v38 = vld [vmem:[#allocation102_spill] sm:$0xff] }
 0x355   : > { %8268 = vst [vmem:[#allocation53_spill] sm:$0xff] %v7348_v44  ;;  %v7354_v46 = vpop.permute.xlu1 %3162  ;;  %v2877_v61 = vmul.f32 %v6538_v18, %v8277_v20  ;;  %v2748_v44 = vadd.f32 %v8278_v31, %v2362_v32  ;;  %v8279_v14 = vld [vmem:[#allocation108_spill] sm:$0xff]  ;;  %v8283_v31 = vld [vmem:[#allocation106_spill] sm:$0xff] }
 0x356   : > { %8272 = vst [vmem:[#allocation93_spill] sm:$0xff] %v7354_v46  ;;  %3534 = vrot.lane.b32.xlu0 %v3384_v62, %s4110_s29  ;;  %v2749_v46 = vadd.f32 %v8279_v14, %v2363_v13  ;;  %v3387_v62 = vmul.f32 %v7228_v1, %v8281_v38  ;;  %v8286_v38 = vld [vmem:[#allocation110_spill] sm:$0xff] }
 0x357   : > { %3536 = vrot.lane.b32.xlu1 %v3385_v21, %s4110_s29  ;;  %v2941_v15 = vadd.f32 %v2877_v61, %v2747_v36  ;;  %v2942_v36 = vadd.f32 %v2878_v30, %v2748_v44  ;;  %v8282_v21 = vld [vmem:[#allocation105_spill] sm:$0xff]  ;;  %v8285_v44 = vld [vmem:[#allocation114_spill] sm:$0xff] }
 0x358   : > { %v3165_v57 = vpop.permute.xlu0 %3164  ;;  %v3388_v49 = vmul.f32 %v7228_v1, %v8282_v21  ;;  %v8288_v21 = vld [vmem:[#allocation116_spill] sm:$0xff] }
 0x359   : > { %v7370_v45 = vadd.f32 %v3165_v57, %v2940_v35  ;;  %v3167_v54 = vpop.permute.xlu1 %3166  ;;  %v2943_v57 = vadd.f32 %v2879_v50, %v2749_v46  ;;  %v3389_v35 = vmul.f32 %v7228_v1, %v8283_v31  ;;  %v8287_v50 = vld [vmem:[#allocation60_spill] sm:$0xff]  ;;  %v3393_v31 = vmul.f32 %v7228_v1, %v8277_v20 }
 0x35a   : > { %v7376_v32 = vadd.f32 %v3167_v54, %v2941_v15  ;;  %3538 = vrot.lane.b32.xlu0 %v3386_v53, %s4110_s29  ;;  %v8284_v15 = vld [vmem:[#allocation109_spill] sm:$0xff] }
 0x35b   : > { %3540 = vrot.lane.b32.xlu1 %v3387_v62, %s4110_s29  ;;  %v3390_v30 = vmul.f32 %v7228_v1, %v8284_v15  ;;  %v3391_v62 = vmul.f32 %v7228_v1, %v8286_v38 }
 0x35c   : > { %v3169_v43 = vpop.permute.xlu0 %3168 }
 0x35d   : > { %v7384_v13 = vadd.f32 %v3169_v43, %v2942_v36  ;;  %v3171_v61 = vpop.permute.xlu1 %3170 }
 0x35e   : > { %v7388_v14 = vadd.f32 %v3171_v61, %v2943_v57  ;;  %3542 = vrot.lane.b32.xlu0 %v3388_v49, %s4110_s29  ;;  %v3392_v57 = vmul.f32 %v7228_v1, %v8274_v16 }
 0x35f   : > { %3544 = vrot.lane.b32.xlu1 %v3389_v35, %s4110_s29  ;;  %v8289_v35 = vld [vmem:[#allocation62_spill] sm:$0xff] }
 0x360   : > { %v3173_v53 = vpop.permute.xlu0 %3172 }
 0x361   : > { %v7395_v46 = vadd.f32 %v3173_v53, %v8285_v44  ;;  %v3175_v54 = vpop.permute.xlu1 %3174 }
 0x362   : > { %v7400_v36 = vadd.f32 %v3175_v54, %v8287_v50  ;;  %3546 = vrot.lane.b32.xlu0 %v3390_v30, %s4110_s29  ;;  %v3394_v30 = vmul.f32 %v7228_v1, %v6900_v58  ;;  %v3395_v54 = vmul.f32 %v7228_v1, %v6905_v26 }
 0x363   : > { %3548 = vrot.lane.b32.xlu1 %v3391_v62, %s4110_s29  ;;  %v8290_v62 = vld [vmem:[#allocation111_spill] sm:$0xff] }
 0x364   : > { %v3177_v43 = vpop.permute.xlu0 %3176  ;;  %v3396_v50 = vmul.f32 %v7228_v1, %v8290_v62  ;;  %v8295_v62 = vld [vmem:[#allocation61_spill] sm:$0xff] }
 0x365   : > { %v7407_v49 = vadd.f32 %v3177_v43, %v8288_v21  ;;  %v3179_v61 = vpop.permute.xlu1 %3178  ;;  %v8291_v43 = vld [vmem:[#allocation57_spill] sm:$0xff] }
 0x366   : > { %v7412_v53 = vadd.f32 %v3179_v61, %v8289_v35  ;;  %3550 = vrot.lane.b32.xlu0 %v3392_v57, %s4110_s29  ;;  %v3397_v57 = vmul.f32 %v7228_v1, %v8291_v43  ;;  %v8292_v21 = vld [vmem:[#allocation113_spill] sm:$0xff]  ;;  %v8293_v35 = vld [vmem:[#allocation59_spill] sm:$0xff] }
 0x367   : > { %3552 = vrot.lane.b32.xlu1 %v3393_v31, %s4110_s29  ;;  %v3398_v61 = vmul.f32 %v7228_v1, %v8292_v21  ;;  %v8296_v43 = vld [vmem:[#allocation117_spill] sm:$0xff]  ;;  %v8297_v21 = vld [vmem:[#allocation63_spill] sm:$0xff] }
 0x368   : > { %v3181_v15 = vpop.permute.xlu0 %3180 }
 0x369   : > { %v7419_v16 = vadd.f32 %v3181_v15, %v6938_v28  ;;  %v3183_v44 = vpop.permute.xlu1 %3182  ;;  %v3399_v15 = vmul.f32 %v7228_v1, %v8293_v35  ;;  %v8298_v35 = vld [vmem:[#allocation64_spill] sm:$0xff] }
 0x36a   : > { %v7424_v20 = vadd.f32 %v3183_v44, %v6944_v17  ;;  %3554 = vrot.lane.b32.xlu0 %v3394_v30, %s4110_s29  ;;  %v8294_v44 = vld [vmem:[#allocation115_spill] sm:$0xff] }
 0x36b   : > { %3556 = vrot.lane.b32.xlu1 %v3395_v54, %s4110_s29  ;;  %v3400_v54 = vmul.f32 %v7228_v1, %v8294_v44  ;;  %v8299_v44 = vld [vmem:[#allocation65_spill] sm:$0xff] }
 0x36c   : > { %v3185_v38 = vpop.permute.xlu0 %3184 }
 0x36d   : > { %v7431_v58 = vadd.f32 %v3185_v38, %v6960_v7  ;;  %v3187_v28 = vpop.permute.xlu1 %3186 }
 0x36e   : > { %v7436_v26 = vadd.f32 %v3187_v28, %v6966_v11  ;;  %3558 = vrot.lane.b32.xlu0 %v3396_v50, %s4110_s29  ;;  %v3401_v50 = vmul.f32 %v7228_v1, %v8295_v62  ;;  %v8300_v62 = vld [vmem:[#allocation66_spill] sm:$0xff] }
 0x36f   : > { %3560 = vrot.lane.b32.xlu1 %v3397_v57, %s4110_s29  ;;  %v3402_v57 = vmul.f32 %v7228_v1, %v8296_v43  ;;  %v8301_v43 = vld [vmem:[#allocation67_spill] sm:$0xff] }
 0x370   : > { %v3189_v17 = vpop.permute.xlu0 %3188 }
 0x371   : > { %v7443_v31 = vadd.f32 %v3189_v17, %v6982_v48  ;;  %v3191_v7 = vpop.permute.xlu1 %3190 }
 0x372   : > { %v7448_v30 = vadd.f32 %v3191_v7, %v6988_v40  ;;  %3562 = vrot.lane.b32.xlu0 %v3398_v61, %s4110_s29  ;;  %v3403_v61 = vmul.f32 %v7228_v1, %v8297_v21  ;;  %v8302_v21 = vld [vmem:[#allocation27_spill] sm:$0xff] }
 0x373   : > { %3564 = vrot.lane.b32.xlu1 %v3399_v15, %s4110_s29  ;;  %v3404_v15 = vmul.f32 %v7228_v1, %v8298_v35  ;;  %v8303_v35 = vld [vmem:[#allocation28_spill] sm:$0xff] }
 0x374   : > { %v3193_v11 = vpop.permute.xlu0 %3192 }
 0x375   : > { %v7455_v38 = vadd.f32 %v3193_v11, %v7004_v41  ;;  %v3195_v48 = vpop.permute.xlu1 %3194 }
 0x376   : > { %v7460_v28 = vadd.f32 %v3195_v48, %v7010_v59  ;;  %3566 = vrot.lane.b32.xlu0 %v3400_v54, %s4110_s29  ;;  %v3405_v54 = vmul.f32 %v7228_v1, %v8299_v44  ;;  %v8304_v44 = vld [vmem:[#allocation29_spill] sm:$0xff] }
 0x377   : > { %3568 = vrot.lane.b32.xlu1 %v3401_v50, %s4110_s29  ;;  %v3406_v50 = vmul.f32 %v7228_v1, %v8300_v62  ;;  %v8305_v62 = vld [vmem:[#allocation69_spill] sm:$0xff] }
 0x378   : > { %v3197_v40 = vpop.permute.xlu0 %3196 }
 0x379   : > { %v7467_v17 = vadd.f32 %v3197_v40, %v7026_v9  ;;  %v3199_v41 = vpop.permute.xlu1 %3198 }
 0x37a   : > { %v7472_v7 = vadd.f32 %v3199_v41, %v7032_v47  ;;  %3570 = vrot.lane.b32.xlu0 %v3402_v57, %s4110_s29  ;;  %v3407_v57 = vmul.f32 %v7228_v1, %v8301_v43  ;;  %v8306_v43 = vld [vmem:[#allocation31_spill] sm:$0xff] }
 0x37b   : > { %3572 = vrot.lane.b32.xlu1 %v3403_v61, %s4110_s29  ;;  %v3408_v61 = vmul.f32 %v7228_v1, %v8302_v21  ;;  %v8307_v21 = vld [vmem:[#allocation71_spill] sm:$0xff] }
 0x37c   : > { %v3201_v59 = vpop.permute.xlu0 %3200 }
 0x37d   : > { %v7479_v11 = vadd.f32 %v3201_v59, %v7048_v2  ;;  %v3203_v9 = vpop.permute.xlu1 %3202 }
 0x37e   : > { %v7484_v48 = vadd.f32 %v3203_v9, %v7054_v6  ;;  %3574 = vrot.lane.b32.xlu0 %v3404_v15, %s4110_s29  ;;  %v3409_v15 = vmul.f32 %v7228_v1, %v8303_v35  ;;  %v8308_v35 = vld [vmem:[#allocation33_spill] sm:$0xff] }
 0x37f   : > { %3576 = vrot.lane.b32.xlu1 %v3405_v54, %s4110_s29  ;;  %v3410_v54 = vmul.f32 %v7228_v1, %v8304_v44  ;;  %v8309_v44 = vld [vmem:[#allocation34_spill] sm:$0xff] }
 0x380   : > { %v3205_v47 = vpop.permute.xlu0 %3204 }
 0x381   : > { %v7491_v40 = vadd.f32 %v3205_v47, %v7070_v8  ;;  %v3207_v2 = vpop.permute.xlu1 %3206 }
 0x382   : > { %v7496_v41 = vadd.f32 %v3207_v2, %v7076_v37  ;;  %3578 = vrot.lane.b32.xlu0 %v3406_v50, %s4110_s29  ;;  %v3411_v50 = vmul.f32 %v7228_v1, %v8305_v62  ;;  %v8310_v62 = vld [vmem:[#allocation35_spill] sm:$0xff] }
 0x383   : > { %3580 = vrot.lane.b32.xlu1 %v3407_v57, %s4110_s29  ;;  %v3412_v57 = vmul.f32 %v7228_v1, %v8306_v43  ;;  %v8311_v43 = vld [vmem:[#allocation36_spill] sm:$0xff] }
 0x384   : > { %v3209_v6 = vpop.permute.xlu0 %3208 }
 0x385   : > { %v7503_v59 = vadd.f32 %v3209_v6, %v7092_v19  ;;  %v3211_v8 = vpop.permute.xlu1 %3210 }
 0x386   : > { %v7508_v9 = vadd.f32 %v3211_v8, %v7098_v24  ;;  %3582 = vrot.lane.b32.xlu0 %v3408_v61, %s4110_s29  ;;  %v3413_v61 = vmul.f32 %v7228_v1, %v8307_v21  ;;  %v3418_v21 = vmul.f32 %v7228_v1, %v7105_v27 }
 0x387   : > { %3584 = vrot.lane.b32.xlu1 %v3409_v15, %s4110_s29  ;;  %v3414_v15 = vmul.f32 %v7228_v1, %v8308_v35 }
 0x388   : > { %v3213_v37 = vpop.permute.xlu0 %3212 }
 0x389   : > { %v7515_v47 = vadd.f32 %v3213_v37, %v7114_v55  ;;  %v3215_v19 = vpop.permute.xlu1 %3214 }
 0x38a   : > { %v7520_v2 = vadd.f32 %v3215_v19, %v7120_v10  ;;  %3586 = vrot.lane.b32.xlu0 %v3410_v54, %s4110_s29  ;;  %v3415_v54 = vmul.f32 %v7228_v1, %v8309_v44  ;;  %v3421_v44 = vmul.f32 %v7228_v1, %v7134_v5  ;;  %v3422_v5 = vmul.f32 %v7228_v1, %v7149_v39 }
 0x38b   : > { %3588 = vrot.lane.b32.xlu1 %v3411_v50, %s4110_s29  ;;  %v3416_v50 = vmul.f32 %v7228_v1, %v8310_v62  ;;  %v8315_v62 = vld [vmem:[#allocation13_spill] sm:$0xff] }
 0x38c   : > { %v3217_v24 = vpop.permute.xlu0 %3216 }
 0x38d   : > { %v7527_v6 = vadd.f32 %v3217_v24, %v7136_v12  ;;  %v3219_v55 = vpop.permute.xlu1 %3218 }
 0x38e   : > { %v7532_v8 = vadd.f32 %v3219_v55, %v7142_v23  ;;  %3590 = vrot.lane.b32.xlu0 %v3412_v57, %s4110_s29  ;;  %v3417_v57 = vmul.f32 %v7228_v1, %v8311_v43 }
 0x38f   : > { %3592 = vrot.lane.b32.xlu1 %v3413_v61, %s4110_s29 }
 0x390   : > { %v3221_v10 = vpop.permute.xlu0 %3220 }
 0x391   : > { %v7539_v37 = vadd.f32 %v3221_v10, %v7158_v25  ;;  %v3223_v12 = vpop.permute.xlu1 %3222  ;;  %v3419_v10 = vmul.f32 %v7228_v1, %v7112_v63 }
 0x392   : > { %v7544_v19 = vadd.f32 %v3223_v12, %v7164_v29  ;;  %3594 = vrot.lane.b32.xlu0 %v3414_v15, %s4110_s29  ;;  %v8313_v12 = vld [vmem:[#allocation30_spill] sm:$0xff] }
 0x393   : > { %3596 = vrot.lane.b32.xlu1 %v3415_v54, %s4110_s29  ;;  %v3297_v27 = vadd.f32 %v7204_v60, %v8313_v12  ;;  %v8314_v54 = vld [vmem:[#allocation10_spill] sm:$0xff] }
 0x394   : > { %v3225_v23 = vpop.permute.xlu0 %3224 }
 0x395   : > { %v7551_v24 = vadd.f32 %v3225_v23, %v7180_v22  ;;  %v3227_v25 = vpop.permute.xlu1 %3226  ;;  %v3298_v23 = vadd.f32 %v7210_v42, %v8314_v54 }
 0x396   : > { %v7556_v55 = vadd.f32 %v3227_v25, %v7186_v3  ;;  %3598 = vrot.lane.b32.xlu0 %v3416_v50, %s4110_s29  ;;  %v8312_v3 = vld [vmem:[#allocation68_spill] sm:$0xff] }
 0x397   : > { %3600 = vrot.lane.b32.xlu1 %v3417_v57, %s4110_s29  ;;  %v3296_v15 = vadd.f32 %v7198_v52, %v8312_v3  ;;  %v3423_v57 = vmul.f32 %v7228_v1, %v7156_v56  ;;  %v8319_v3 = vld [vmem:[#allocation37_spill] sm:$0xff] }
 0x398   : > { %v3229_v29 = vpop.permute.xlu0 %3228  ;;  %v3424_v56 = vmul.f32 %v7228_v1, %v8319_v3 }
 0x399   : > { %v7563_v61 = vadd.f32 %v3229_v29, %v7196_v51  ;;  %v3231_v22 = vpop.permute.xlu1 %3230  ;;  %v3420_v51 = vmul.f32 %v7228_v1, %v7127_v33  ;;  %v3299_v33 = vadd.f32 %v7214_v4, %v8315_v62  ;;  %v8316_v29 = vld [vmem:[#allocation12_spill] sm:$0xff] }
 0x39a   : > { %v7568_v35 = vadd.f32 %v3231_v22, %v7202_v34  ;;  %3602 = vrot.lane.b32.xlu0 %v3418_v21, %s4110_s29  ;;  %v3300_v21 = vadd.f32 %v7220_v0, %v8316_v29  ;;  %v8317_v4 = vld [vmem:[#allocation16_spill] sm:$0xff]  ;;  %v8318_v22 = vld [vmem:[#allocation39_spill] sm:$0xff] }
 0x39b   : > { %3604 = vrot.lane.b32.xlu1 %v3419_v10, %s4110_s29  ;;  %v3301_v39 = vadd.f32 %v8318_v22, %v8317_v4 }
 0x39c   : > { %v3491_v63 = vpop.permute.xlu0 %3490 }
 0x39d   : > { %v3682_v34 = vadd.f32 %v3491_v63, %v3296_v15  ;;  %v3493_v52 = vpop.permute.xlu1 %3492 }
 0x39e   : > { %v3683_v60 = vadd.f32 %v3493_v52, %v3297_v27  ;;  %3606 = vrot.lane.b32.xlu0 %v3420_v51, %s4110_s29  ;;  %v8320_v27 = vld [vmem:[#allocation38_spill] sm:$0xff]  ;;  %v8321_v51 = vld [vmem:[#allocation19_spill] sm:$0xff] }
 0x39f   : > { %3747 = vst.msk [vmem:[%s7581_s15] sm:$0xff] %vm3746_vm6, %v3682_v34  ;;  %3608 = vrot.lane.b32.xlu1 %v3421_v44, %s4110_s29  ;;  %v3425_v0 = vmul.f32 %v7228_v1, %v8320_v27  ;;  %v8322_v34 = vld [vmem:[#allocation6_spill] sm:$0xff] }
 0x3a0   : > { %3748 = vst.msk [vmem:[%s7581_s15 + $0x8] sm:$0xff] %vm3746_vm6, %v3683_v60  ;;  %v3495_v50 = vpop.permute.xlu0 %3494  ;;  %v3302_v52 = vadd.f32 %v8322_v34, %v8321_v51  ;;  %v8323_v44 = vld [vmem:[#allocation74_spill] sm:$0xff]  ;;  %v8324_v60 = vld [vmem:[#allocation7_spill] sm:$0xff]  ;;  %v8333_v34 = vld [vmem:[#allocation77_spill] sm:$0xff] }
 0x3a1   : > { %v3684_v25 = vadd.f32 %v3495_v50, %v3298_v23  ;;  %v3497_v43 = vpop.permute.xlu1 %3496  ;;  %v3303_v54 = vadd.f32 %v8324_v60, %v8323_v44  ;;  %v8325_v50 = vld [vmem:[#allocation75_spill] sm:$0xff]  ;;  %v8335_v60 = vld [vmem:[#allocation22_spill] sm:$0xff] }
 0x3a2   : > { %v3685_v42 = vadd.f32 %v3497_v43, %v3299_v33  ;;  %3610 = vrot.lane.b32.xlu0 %v3422_v5, %s4110_s29  ;;  %v8326_v5 = vld [vmem:[#allocation8_spill] sm:$0xff] }
 0x3a3   : > { %3749 = vst.msk [vmem:[%s7581_s15 + $0x10] sm:$0xff] %vm3746_vm6, %v3684_v25  ;;  %3612 = vrot.lane.b32.xlu1 %v3423_v57, %s4110_s29  ;;  %v3304_v25 = vadd.f32 %v8326_v5, %v8325_v50  ;;  %v8327_v43 = vld [vmem:[#allocation20_spill] sm:$0xff]  ;;  %v8328_v57 = vld [vmem:[#allocation9_spill] sm:$0xff]  ;;  %v8337_v5 = vld [vmem:[#allocation78_spill] sm:$0xff] }
 0x3a4   : > { %3750 = vst.msk [vmem:[%s7581_s15 + $0x18] sm:$0xff] %vm3746_vm6, %v3685_v42  ;;  %v3499_v10 = vpop.permute.xlu0 %3498  ;;  %v3305_v42 = vadd.f32 %v8328_v57, %v8327_v43  ;;  %v8339_v57 = vld [vmem:[#allocation23_spill] sm:$0xff] }
 0x3a5   : > { %v3686_v15 = vadd.f32 %v3499_v10, %v3300_v21  ;;  %v3501_v12 = vpop.permute.xlu1 %3500  ;;  %v8330_v10 = vld [vmem:[#allocation72_spill] sm:$0xff] }
 0x3a6   : > { %v3687_v63 = vadd.f32 %v3501_v12, %v3301_v39  ;;  %3614 = vrot.lane.b32.xlu0 %v3424_v56, %s4110_s29  ;;  %v8329_v39 = vld [vmem:[#allocation76_spill] sm:$0xff]  ;;  %v8331_v56 = vld [vmem:[#allocation21_spill] sm:$0xff] }
 0x3a7   : > { %3751 = vst.msk [vmem:[%s7581_s15 + $0x20] sm:$0xff] %vm3746_vm6, %v3686_v15  ;;  %3616 = vrot.lane.b32.xlu1 %v3425_v0, %s4110_s29  ;;  %v3306_v3 = vadd.f32 %v8330_v10, %v8329_v39  ;;  %v8332_v15 = vld [vmem:[#allocation73_spill] sm:$0xff]  ;;  %v8341_v10 = vld [vmem:[#allocation79_spill] sm:$0xff] }
 0x3a8   : > { %3752 = vst.msk [vmem:[%s7581_s15 + $0x28] sm:$0xff] %vm3746_vm6, %v3687_v63  ;;  %v3503_v23 = vpop.permute.xlu0 %3502  ;;  %v3307_v12 = vadd.f32 %v8332_v15, %v8331_v56  ;;  %v8343_v15 = vld [vmem:[#allocation24_spill] sm:$0xff] }
 0x3a9   : > { %v3688_v62 = vadd.f32 %v3503_v23, %v3302_v52  ;;  %v3505_v1 = vpop.permute.xlu1 %3504  ;;  %v8334_v52 = vld [vmem:[#allocation70_spill] sm:$0xff] }
 0x3aa   : > { %v3689_v33 = vadd.f32 %v3505_v1, %v3303_v54  ;;  %v3308_v44 = vadd.f32 %v8334_v52, %v8333_v34  ;;  %v8336_v54 = vld [vmem:[#allocation32_spill] sm:$0xff]  ;;  %v8345_v52 = vld [vmem:[#allocation45_spill] sm:$0xff] }
 0x3ab   : > { %3753 = vst.msk [vmem:[%s7581_s15 + $0x30] sm:$0xff] %vm3746_vm6, %v3688_v62  ;;  %v3309_v23 = vadd.f32 %v8336_v54, %v8335_v60  ;;  %v8347_v54 = vld [vmem:[#allocation81_spill] sm:$0xff] }
 0x3ac   : > { %3754 = vst.msk [vmem:[%s7581_s15 + $0x38] sm:$0xff] %vm3746_vm6, %v3689_v33  ;;  %v3507_v29 = vpop.permute.xlu0 %3506 }
 0x3ad   : > { %v3690_v21 = vadd.f32 %v3507_v29, %v3304_v25  ;;  %v3509_v4 = vpop.permute.xlu1 %3508  ;;  %v8338_v25 = vld [vmem:[#allocation14_spill] sm:$0xff] }
 0x3ae   : > { %v3691_v22 = vadd.f32 %v3509_v4, %v3305_v42  ;;  %v3310_v43 = vadd.f32 %v8338_v25, %v8337_v5  ;;  %v8340_v42 = vld [vmem:[#allocation11_spill] sm:$0xff]  ;;  %v8351_v5 = vld [vmem:[#allocation26_spill] sm:$0xff] }
 0x3af   : > { %3755 = vst.msk [vmem:[%s7581_s15 + $0x40] sm:$0xff] %vm3746_vm6, %v3690_v21  ;;  %v3311_v29 = vadd.f32 %v8340_v42, %v8339_v57  ;;  %v8352_v25 = vld [vmem:[#allocation118_spill] sm:$0xff]  ;;  %v8353_v42 = vld [vmem:[#allocation40_spill] sm:$0xff] }
 0x3b0   : > { %3756 = vst.msk [vmem:[%s7581_s15 + $0x48] sm:$0xff] %vm3746_vm6, %v3691_v22  ;;  %v3511_v27 = vpop.permute.xlu0 %3510 }
 0x3b1   : > { %v3692_v0 = vadd.f32 %v3511_v27, %v3306_v3  ;;  %v3513_v63 = vpop.permute.xlu1 %3512  ;;  %v8342_v3 = vld [vmem:[#allocation17_spill] sm:$0xff] }
 0x3b2   : > { %v3693_v51 = vadd.f32 %v3513_v63, %v3307_v12  ;;  %v3312_v56 = vadd.f32 %v8342_v3, %v8341_v10  ;;  %v8344_v12 = vld [vmem:[#allocation15_spill] sm:$0xff] }
 0x3b3   : > { %3757 = vst.msk [vmem:[%s7581_s15 + $0x50] sm:$0xff] %vm3746_vm6, %v3692_v0  ;;  %v3313_v27 = vadd.f32 %v8344_v12, %v8343_v15  ;;  %v8355_v3 = vld [vmem:[#allocation47_spill] sm:$0xff]  ;;  %v8357_v12 = vld [vmem:[#allocation82_spill] sm:$0xff] }
 0x3b4   : > { %3758 = vst.msk [vmem:[%s7581_s15 + $0x58] sm:$0xff] %vm3746_vm6, %v3693_v51  ;;  %v3515_v62 = vpop.permute.xlu0 %3514 }
 0x3b5   : > { %v3694_v1 = vadd.f32 %v3515_v62, %v3308_v44  ;;  %v3517_v33 = vpop.permute.xlu1 %3516  ;;  %v8346_v44 = vld [vmem:[#allocation85_spill] sm:$0xff] }
 0x3b6   : > { %v3695_v50 = vadd.f32 %v3517_v33, %v3309_v23  ;;  %v2352_v60 = vadd.f32 %v8346_v44, %v8345_v52  ;;  %v8348_v23 = vld [vmem:[#allocation18_spill] sm:$0xff]  ;;  %v8360_v52 = vld [vmem:[#allocation88_spill] sm:$0xff] }
 0x3b7   : > { %3759 = vst.msk [vmem:[%s7581_s15 + $0x60] sm:$0xff] %vm3746_vm6, %v3694_v1  ;;  %v3314_v62 = vadd.f32 %v8348_v23, %v8347_v54  ;;  %v8349_v1 = vld [vmem:[#allocation46_spill] sm:$0xff]  ;;  %v8362_v54 = vld [vmem:[#allocation120_spill] sm:$0xff] }
 0x3b8   : > { %3760 = vst.msk [vmem:[%s7581_s15 + $0x68] sm:$0xff] %vm3746_vm6, %v3695_v50  ;;  %v3519_v21 = vpop.permute.xlu0 %3518  ;;  %v8350_v33 = vld [vmem:[#allocation86_spill] sm:$0xff] }
 0x3b9   : > { %v3696_v4 = vadd.f32 %v3519_v21, %v3310_v43  ;;  %v3521_v22 = vpop.permute.xlu1 %3520  ;;  %v2353_v50 = vadd.f32 %v8350_v33, %v8349_v1  ;;  %v3315_v43 = vadd.f32 %v8352_v25, %v8351_v5 }
 0x3ba   : > { %v3697_v39 = vadd.f32 %v3521_v22, %v3311_v29  ;;  %v2738_v29 = vadd.f32 %v8353_v42, %v2352_v60  ;;  %v8354_v22 = vld [vmem:[#allocation41_spill] sm:$0xff]  ;;  %v8361_v60 = vld [vmem:[#allocation83_spill] sm:$0xff]  ;;  %v8364_v42 = vld [vmem:[#allocation42_spill] sm:$0xff] }
 0x3bb   : > { %3761 = vst.msk [vmem:[%s7581_s15 + $0x70] sm:$0xff] %vm3746_vm6, %v3696_v4  ;;  %v3317_v23 = vadd.f32 %v8362_v54, %v8361_v60  ;;  %v8371_v54 = vld [vmem:[#allocation43_spill] sm:$0xff] }
 0x3bc   : > { %3762 = vst.msk [vmem:[%s7581_s15 + $0x78] sm:$0xff] %vm3746_vm6, %v3697_v39  ;;  %v3523_v0 = vpop.permute.xlu0 %3522  ;;  %v2739_v39 = vadd.f32 %v8354_v22, %v2353_v50  ;;  %v8363_v50 = vld [vmem:[#allocation84_spill] sm:$0xff] }
 0x3bd   : > { %v3698_v63 = vadd.f32 %v3523_v0, %v3312_v56  ;;  %v3525_v51 = vpop.permute.xlu1 %3524  ;;  %v8356_v56 = vld [vmem:[#allocation87_spill] sm:$0xff] }
 0x3be   : > { %v3699_v34 = vadd.f32 %v3525_v51, %v3313_v27  ;;  %v2354_v15 = vadd.f32 %v8356_v56, %v8355_v3  ;;  %v8358_v27 = vld [vmem:[#allocation119_spill] sm:$0xff]  ;;  %v8365_v3 = vld [vmem:[#allocation49_spill] sm:$0xff] }
 0x3bf   : > { %3763 = vst.msk [vmem:[%s7581_s15 + $0x80] sm:$0xff] %vm3746_vm6, %v3698_v63  ;;  %v3316_v0 = vadd.f32 %v8358_v27, %v8357_v12  ;;  %v4055_v63 = vld [vmem:[#allocation2 + $0x10a] sm:$0xff]  ;;  %v8366_v56 = vld [vmem:[#allocation89_spill] sm:$0xff] }
 0x3c0   : > { %3764 = vst.msk [vmem:[%s7581_s15 + $0x88] sm:$0xff] %vm3746_vm6, %v3699_v34  ;;  %v3527_v57 = vpop.permute.xlu0 %3526  ;;  %v2868_v51 = vmul.f32 %v4055_v63, %v6538_v18  ;;  %v8359_v34 = vld [vmem:[#allocation48_spill] sm:$0xff]  ;;  %v2740_v5 = vadd.f32 %v8363_v50, %v2354_v15  ;;  %v2356_v12 = vadd.f32 %v8366_v56, %v8365_v3  ;;  %v8367_v27 = vld [vmem:[#allocation121_spill] sm:$0xff]  ;;  %v8369_v15 = vld [vmem:[#allocation90_spill] sm:$0xff] }
 0x3c1   : > { %v3700_v21 = vadd.f32 %v3527_v57, %v3314_v62  ;;  %v3529_v4 = vpop.permute.xlu1 %3528  ;;  %v2355_v44 = vadd.f32 %v8360_v52, %v8359_v34  ;;  %v4056_v62 = vld [vmem:[#allocation2 + $0x112] sm:$0xff]  ;;  %v4057_v34 = vld [vmem:[#allocation2 + $0x122] sm:$0xff] }
 0x3c2   : > { %v3701_v10 = vadd.f32 %v3529_v4, %v3315_v43  ;;  %v2869_v1 = vmul.f32 %v4056_v62, %v6538_v18  ;;  %v2932_v25 = vadd.f32 %v2868_v51, %v2738_v29  ;;  %v2870_v52 = vmul.f32 %v4057_v34, %v6538_v18  ;;  %v8370_v29 = vld [vmem:[#allocation122_spill] sm:$0xff]  ;;  %v4058_v51 = vld [vmem:[#allocation2 + $0x12a] sm:$0xff] }
 0x3c3   : > { %3765 = vst.msk [vmem:[%s7581_s15 + $0x90] sm:$0xff] %vm3746_vm6, %v3700_v21  ;;  %v2741_v21 = vadd.f32 %v8364_v42, %v2355_v44  ;;  %v8372_v50 = vld [vmem:[#allocation44_spill] sm:$0xff]  ;;  %v8373_v42 = vld [vmem:[#allocation51_spill] sm:$0xff]  ;;  %v4059_v34 = vld [vmem:[#allocation2 + $0x13a] sm:$0xff] }
 0x3c4   : > { %3766 = vst.msk [vmem:[%s7581_s15 + $0x98] sm:$0xff] %vm3746_vm6, %v3701_v10  ;;  %v3531_v33 = vpop.permute.xlu0 %3530  ;;  %v2933_v4 = vadd.f32 %v2869_v1, %v2739_v39  ;;  %v3318_v63 = vadd.f32 %v8367_v27, %v2932_v25  ;;  %v8368_v10 = vld [vmem:[#allocation50_spill] sm:$0xff]  ;;  %v2871_v39 = vmul.f32 %v4058_v51, %v6538_v18  ;;  %v2934_v62 = vadd.f32 %v2870_v52, %v2740_v5  ;;  %v8374_v3 = vld [vmem:[#allocation91_spill] sm:$0xff]  ;;  %v8378_v5 = vld [vmem:[#allocation124_spill] sm:$0xff] }
 0x3c5   : > { %v3702_v43 = vadd.f32 %v3531_v33, %v3316_v0  ;;  %v3533_v57 = vpop.permute.xlu1 %3532  ;;  %v2357_v60 = vadd.f32 %v8369_v15, %v8368_v10  ;;  %v8375_v56 = vld [vmem:[#allocation123_spill] sm:$0xff]  ;;  %v2872_v10 = vmul.f32 %v4059_v34, %v6538_v18  ;;  %v4062_v34 = vld [vmem:[#allocation2 + $0x15a] sm:$0xff] }
 0x3c6   : > { %v3703_v22 = vadd.f32 %v3533_v57, %v3317_v23  ;;  %v3319_v0 = vadd.f32 %v8370_v29, %v2933_v4  ;;  %v2742_v23 = vadd.f32 %v8371_v54, %v2356_v12  ;;  %v2358_v4 = vadd.f32 %v8374_v3, %v8373_v42  ;;  %v8377_v12 = vld [vmem:[#allocation92_spill] sm:$0xff]  ;;  %v4060_v52 = vld [vmem:[#allocation2 + $0x142] sm:$0xff] }
 0x3c7   : > { %3767 = vst.msk [vmem:[%s7581_s15 + $0xa0] sm:$0xff] %vm3746_vm6, %v3702_v43  ;;  %v2743_v25 = vadd.f32 %v8372_v50, %v2357_v60  ;;  %v2935_v43 = vadd.f32 %v2871_v39, %v2741_v21  ;;  %v3320_v27 = vadd.f32 %v8375_v56, %v2934_v62  ;;  %v2873_v21 = vmul.f32 %v4060_v52, %v6538_v18  ;;  %v8379_v29 = vld [vmem:[#allocation99_spill] sm:$0xff]  ;;  %v8380_v54 = vld [vmem:[#allocation100_spill] sm:$0xff]  ;;  %v8381_v50 = vld [vmem:[#allocation125_spill] sm:$0xff] }
 0x3c8   : > { %3768 = vst.msk [vmem:[%s7581_s15 + $0xa8] sm:$0xff] %vm3746_vm6, %v3703_v22  ;;  %v3535_v44 = vpop.permute.xlu0 %3534  ;;  %v8376_v22 = vld [vmem:[#allocation52_spill] sm:$0xff]  ;;  %v2936_v51 = vadd.f32 %v2872_v10, %v2742_v23  ;;  %v2875_v23 = vmul.f32 %v4062_v34, %v6538_v18 }
 0x3c9   : > { %v3704_v1 = vadd.f32 %v3535_v44, %v3318_v63  ;;  %v3537_v33 = vpop.permute.xlu1 %3536  ;;  %v2359_v15 = vadd.f32 %v8377_v12, %v8376_v22  ;;  %v3321_v63 = vadd.f32 %v8378_v5, %v2935_v43  ;;  %v4061_v43 = vld [vmem:[#allocation2 + $0x152] sm:$0xff] }
 0x3ca   : > { %v3705_v57 = vadd.f32 %v3537_v33, %v3319_v0  ;;  %v2744_v0 = vadd.f32 %v8379_v29, %v2358_v4  ;;  %v3322_v42 = vadd.f32 %v8381_v50, %v2936_v51  ;;  %v2874_v3 = vmul.f32 %v4061_v43, %v6538_v18 }
 0x3cb   : > { %3769 = vst.msk [vmem:[%s7581_s15 + $0xb0] sm:$0xff] %vm3746_vm6, %v3704_v1  ;;  %v2745_v62 = vadd.f32 %v8380_v54, %v2359_v15  ;;  %v2937_v1 = vadd.f32 %v2873_v21, %v2743_v25  ;;  %v8383_v15 = vld [vmem:[#allocation53_spill] sm:$0xff] }
 0x3cc   : > { %3770 = vst.msk [vmem:[%s7581_s15 + $0xb8] sm:$0xff] %vm3746_vm6, %v3705_v57  ;;  %v3539_v60 = vpop.permute.xlu0 %3538  ;;  %v8382_v57 = vld [vmem:[#allocation80_spill] sm:$0xff]  ;;  %v2938_v4 = vadd.f32 %v2874_v3, %v2744_v0 }
 0x3cd   : > { %v3706_v39 = vadd.f32 %v3539_v60, %v3320_v27  ;;  %v3541_v44 = vpop.permute.xlu1 %3540  ;;  %v3323_v56 = vadd.f32 %v8382_v57, %v2937_v1  ;;  %v2939_v22 = vadd.f32 %v2875_v23, %v2745_v62 }
 0x3ce   : > { %v3707_v33 = vadd.f32 %v3541_v44, %v3321_v63  ;;  %v3324_v5 = vadd.f32 %v8383_v15, %v2938_v4  ;;  %v8384_v63 = vld [vmem:[#allocation93_spill] sm:$0xff] }
 0x3cf   : > { %3771 = vst.msk [vmem:[%s7581_s15 + $0xc0] sm:$0xff] %vm3746_vm6, %v3706_v39  ;;  %v3325_v52 = vadd.f32 %v8384_v63, %v2939_v22 }
 0x3d0   : > { %3772 = vst.msk [vmem:[%s7581_s15 + $0xc8] sm:$0xff] %vm3746_vm6, %v3707_v33  ;;  %v3543_v25 = vpop.permute.xlu0 %3542 }
 0x3d1   : > { %v3708_v27 = vadd.f32 %v3543_v25, %v3322_v42  ;;  %v3545_v10 = vpop.permute.xlu1 %3544 }
 0x3d2   : > { %v3709_v12 = vadd.f32 %v3545_v10, %v3323_v56 }
 0x3d3   : > { %3773 = vst.msk [vmem:[%s7581_s15 + $0xd0] sm:$0xff] %vm3746_vm6, %v3708_v27 }
 0x3d4   : > { %3774 = vst.msk [vmem:[%s7581_s15 + $0xd8] sm:$0xff] %vm3746_vm6, %v3709_v12  ;;  %v3547_v18 = vpop.permute.xlu0 %3546 }
 0x3d5   : > { %v3710_v21 = vadd.f32 %v3547_v18, %v3324_v5  ;;  %v3549_v60 = vpop.permute.xlu1 %3548 }
 0x3d6   : > { %v3711_v29 = vadd.f32 %v3549_v60, %v3325_v52 }
 0x3d7   : > { %3775 = vst.msk [vmem:[%s7581_s15 + $0xe0] sm:$0xff] %vm3746_vm6, %v3710_v21 }
 0x3d8   : > { %3776 = vst.msk [vmem:[%s7581_s15 + $0xe8] sm:$0xff] %vm3746_vm6, %v3711_v29  ;;  %v3551_v0 = vpop.permute.xlu0 %3550 }
 0x3d9   : > { %v3712_v51 = vadd.f32 %v3551_v0, %v7370_v45  ;;  %v3553_v39 = vpop.permute.xlu1 %3552 }
 0x3da   : > { %v3713_v44 = vadd.f32 %v3553_v39, %v7376_v32 }
 0x3db   : > { %3777 = vst.msk [vmem:[%s7581_s15 + $0xf0] sm:$0xff] %vm3746_vm6, %v3712_v51 }
 0x3dc   : > { %3778 = vst.msk [vmem:[%s7581_s15 + $0xf8] sm:$0xff] %vm3746_vm6, %v3713_v44  ;;  %v3555_v54 = vpop.permute.xlu0 %3554 }
 0x3dd   : > { %v3714_v62 = vadd.f32 %v3555_v54, %v7384_v13  ;;  %v3557_v1 = vpop.permute.xlu1 %3556 }
 0x3de   : > { %v3715_v33 = vadd.f32 %v3557_v1, %v7388_v14 }
 0x3df   : > { %3779 = vst.msk [vmem:[%s7581_s15 + $0x100] sm:$0xff] %vm3746_vm6, %v3714_v62 }
 0x3e0   : > { %3780 = vst.msk [vmem:[%s7581_s15 + $0x108] sm:$0xff] %vm3746_vm6, %v3715_v33  ;;  %v3559_v45 = vpop.permute.xlu0 %3558 }
 0x3e1   : > { %v3716_v32 = vadd.f32 %v3559_v45, %v7395_v46  ;;  %v3561_v50 = vpop.permute.xlu1 %3560 }
 0x3e2   : > { %v3717_v42 = vadd.f32 %v3561_v50, %v7400_v36 }
 0x3e3   : > { %3781 = vst.msk [vmem:[%s7581_s15 + $0x110] sm:$0xff] %vm3746_vm6, %v3716_v32 }
 0x3e4   : > { %3782 = vst.msk [vmem:[%s7581_s15 + $0x118] sm:$0xff] %vm3746_vm6, %v3717_v42  ;;  %v3563_v13 = vpop.permute.xlu0 %3562 }
 0x3e5   : > { %v3718_v14 = vadd.f32 %v3563_v13, %v7407_v49  ;;  %v3565_v43 = vpop.permute.xlu1 %3564 }
 0x3e6   : > { %v3719_v3 = vadd.f32 %v3565_v43, %v7412_v53 }
 0x3e7   : > { %3783 = vst.msk [vmem:[%s7581_s15 + $0x120] sm:$0xff] %vm3746_vm6, %v3718_v14 }
 0x3e8   : > { %3784 = vst.msk [vmem:[%s7581_s15 + $0x128] sm:$0xff] %vm3746_vm6, %v3719_v3  ;;  %v3567_v46 = vpop.permute.xlu0 %3566 }
 0x3e9   : > { %v3720_v36 = vadd.f32 %v3567_v46, %v7419_v16  ;;  %v3569_v57 = vpop.permute.xlu1 %3568 }
 0x3ea   : > { %v3721_v56 = vadd.f32 %v3569_v57, %v7424_v20 }
 0x3eb   : > { %3785 = vst.msk [vmem:[%s7581_s15 + $0x130] sm:$0xff] %vm3746_vm6, %v3720_v36 }
 0x3ec   : > { %3786 = vst.msk [vmem:[%s7581_s15 + $0x138] sm:$0xff] %vm3746_vm6, %v3721_v56  ;;  %v3571_v49 = vpop.permute.xlu0 %3570 }
 0x3ed   : > { %v3722_v53 = vadd.f32 %v3571_v49, %v7431_v58  ;;  %v3573_v34 = vpop.permute.xlu1 %3572 }
 0x3ee   : > { %v3723_v23 = vadd.f32 %v3573_v34, %v7436_v26 }
 0x3ef   : > { %3787 = vst.msk [vmem:[%s7581_s15 + $0x140] sm:$0xff] %vm3746_vm6, %v3722_v53 }
 0x3f0   : > { %3788 = vst.msk [vmem:[%s7581_s15 + $0x148] sm:$0xff] %vm3746_vm6, %v3723_v23  ;;  %v3575_v16 = vpop.permute.xlu0 %3574 }
 0x3f1   : > { %v3724_v20 = vadd.f32 %v3575_v16, %v7443_v31  ;;  %v3577_v25 = vpop.permute.xlu1 %3576 }
 0x3f2   : > { %v3725_v4 = vadd.f32 %v3577_v25, %v7448_v30 }
 0x3f3   : > { %3789 = vst.msk [vmem:[%s7581_s15 + $0x150] sm:$0xff] %vm3746_vm6, %v3724_v20 }
 0x3f4   : > { %3790 = vst.msk [vmem:[%s7581_s15 + $0x158] sm:$0xff] %vm3746_vm6, %v3725_v4  ;;  %v3579_v58 = vpop.permute.xlu0 %3578 }
 0x3f5   : > { %v3726_v26 = vadd.f32 %v3579_v58, %v7455_v38  ;;  %v3581_v27 = vpop.permute.xlu1 %3580 }
 0x3f6   : > { %v3727_v10 = vadd.f32 %v3581_v27, %v7460_v28 }
 0x3f7   : > { %3791 = vst.msk [vmem:[%s7581_s15 + $0x160] sm:$0xff] %vm3746_vm6, %v3726_v26 }
 0x3f8   : > { %3792 = vst.msk [vmem:[%s7581_s15 + $0x168] sm:$0xff] %vm3746_vm6, %v3727_v10  ;;  %v3583_v31 = vpop.permute.xlu0 %3582 }
 0x3f9   : > { %v3728_v30 = vadd.f32 %v3583_v31, %v7467_v17  ;;  %v3585_v22 = vpop.permute.xlu1 %3584 }
 0x3fa   : > { %v3729_v12 = vadd.f32 %v3585_v22, %v7472_v7 }
 0x3fb   : > { %3793 = vst.msk [vmem:[%s7581_s15 + $0x170] sm:$0xff] %vm3746_vm6, %v3728_v30 }
 0x3fc   : > { %3794 = vst.msk [vmem:[%s7581_s15 + $0x178] sm:$0xff] %vm3746_vm6, %v3729_v12  ;;  %v3587_v38 = vpop.permute.xlu0 %3586 }
 0x3fd   : > { %v3730_v28 = vadd.f32 %v3587_v38, %v7479_v11  ;;  %v3589_v15 = vpop.permute.xlu1 %3588 }
 0x3fe   : > { %v3731_v5 = vadd.f32 %v3589_v15, %v7484_v48 }
 0x3ff   : > { %3795 = vst.msk [vmem:[%s7581_s15 + $0x180] sm:$0xff] %vm3746_vm6, %v3730_v28 }
 0x400   : > { %3796 = vst.msk [vmem:[%s7581_s15 + $0x188] sm:$0xff] %vm3746_vm6, %v3731_v5  ;;  %v3591_v17 = vpop.permute.xlu0 %3590 }
 0x401   : > { %v3732_v7 = vadd.f32 %v3591_v17, %v7491_v40  ;;  %v3593_v63 = vpop.permute.xlu1 %3592 }
 0x402   : > { %v3733_v52 = vadd.f32 %v3593_v63, %v7496_v41 }
 0x403   : > { %3797 = vst.msk [vmem:[%s7581_s15 + $0x190] sm:$0xff] %vm3746_vm6, %v3732_v7 }
 0x404   : > { %3798 = vst.msk [vmem:[%s7581_s15 + $0x198] sm:$0xff] %vm3746_vm6, %v3733_v52  ;;  %v3595_v11 = vpop.permute.xlu0 %3594 }
 0x405   : > { %v3734_v48 = vadd.f32 %v3595_v11, %v7503_v59  ;;  %v3597_v18 = vpop.permute.xlu1 %3596 }
 0x406   : > { %v3735_v21 = vadd.f32 %v3597_v18, %v7508_v9 }
 0x407   : > { %3799 = vst.msk [vmem:[%s7581_s15 + $0x1a0] sm:$0xff] %vm3746_vm6, %v3734_v48 }
 0x408   : > { %3800 = vst.msk [vmem:[%s7581_s15 + $0x1a8] sm:$0xff] %vm3746_vm6, %v3735_v21  ;;  %v3599_v40 = vpop.permute.xlu0 %3598 }
 0x409   : > { %v3736_v41 = vadd.f32 %v3599_v40, %v7515_v47  ;;  %v3601_v60 = vpop.permute.xlu1 %3600 }
 0x40a   : > { %v3737_v29 = vadd.f32 %v3601_v60, %v7520_v2 }
 0x40b   : > { %3801 = vst.msk [vmem:[%s7581_s15 + $0x1b0] sm:$0xff] %vm3746_vm6, %v3736_v41 }
 0x40c   : > { %3802 = vst.msk [vmem:[%s7581_s15 + $0x1b8] sm:$0xff] %vm3746_vm6, %v3737_v29  ;;  %v3603_v59 = vpop.permute.xlu0 %3602 }
 0x40d   : > { %v3738_v9 = vadd.f32 %v3603_v59, %v7527_v6  ;;  %v3605_v0 = vpop.permute.xlu1 %3604 }
 0x40e   : > { %v3739_v51 = vadd.f32 %v3605_v0, %v7532_v8 }
 0x40f   : > { %3803 = vst.msk [vmem:[%s7581_s15 + $0x1c0] sm:$0xff] %vm3746_vm6, %v3738_v9 }
 0x410   : > { %3804 = vst.msk [vmem:[%s7581_s15 + $0x1c8] sm:$0xff] %vm3746_vm6, %v3739_v51  ;;  %v3607_v47 = vpop.permute.xlu0 %3606 }
 0x411   : > { %v3740_v2 = vadd.f32 %v3607_v47, %v7539_v37  ;;  %v3609_v39 = vpop.permute.xlu1 %3608 }
 0x412   : > { %v3741_v44 = vadd.f32 %v3609_v39, %v7544_v19 }
 0x413   : > { %3805 = vst.msk [vmem:[%s7581_s15 + $0x1d0] sm:$0xff] %vm3746_vm6, %v3740_v2 }
 0x414   : > { %3806 = vst.msk [vmem:[%s7581_s15 + $0x1d8] sm:$0xff] %vm3746_vm6, %v3741_v44  ;;  %v3611_v6 = vpop.permute.xlu0 %3610 }
 0x415   : > { %v3742_v54 = vadd.f32 %v3611_v6, %v7551_v24  ;;  %v3613_v8 = vpop.permute.xlu1 %3612 }
 0x416   : > { %v3743_v62 = vadd.f32 %v3613_v8, %v7556_v55 }
 0x417   : > { %3807 = vst.msk [vmem:[%s7581_s15 + $0x1e0] sm:$0xff] %vm3746_vm6, %v3742_v54 }
 0x418   : > { %3808 = vst.msk [vmem:[%s7581_s15 + $0x1e8] sm:$0xff] %vm3746_vm6, %v3743_v62  ;;  %v3615_v1 = vpop.permute.xlu0 %3614 }
 0x419   : > { %v3744_v37 = vadd.f32 %v3615_v1, %v7563_v61  ;;  %v3617_v33 = vpop.permute.xlu1 %3616 }
 0x41a   : > { %v3745_v19 = vadd.f32 %v3617_v33, %v7568_v35 }
 0x41b   : > { %3809 = vst.msk [vmem:[%s7581_s15 + $0x1f0] sm:$0xff] %vm3746_vm6, %v3744_v37 }
 0x41c   : > { %3810 = vst.msk [vmem:[%s7581_s15 + $0x1f8] sm:$0xff] %vm3746_vm6, %v3745_v19 }
 0x41d PF: > { %s13_s11 = sadd.s32 1, %s4104_s11   ;;  %s8385_s9 = smov %s4100_s10 }
 0x41e   : > { %p10_p2 = scmp.ge.s32.totalorder %s13_s11, 4   ;;  %s8386_s10 = smov %s8388_s13 }
 0x420   :  { %12 = sbr.rel (!%p10_p2) target bundleno = 2 (0x2), region = 63 }
 0x427   :  { %3843 = vsyncpa [#allocation4], 1 }
 0x428   :  { %3845 = vsyncpa [#allocation4 + $0x1], 1 }

</bundles_post_ra>
